<compile_context>
chip_gen: v7x
topology: tpu7x:2x2x1
jax: 0.10.0
libtpu: 0.0.40
codegen_flags: <defaults>
</compile_context>

<pallas_src>
import numpy as np
import jax
import jax.numpy as jnp
from jax.experimental import pallas as pl
from jax.experimental.pallas import tpu as pltpu


def _gelu(x):
    # tanh-form GELU (EUP tanh slot inside the kernel).
    # TODO(synk): PyTorch nn.GELU() default is the exact-erf form; the tanh
    # approximation differs by <~1e-3 per element (the in-file reference uses
    # the same tanh form so the kernel-vs-reference check is apples-to-apples).
    c = 0.7978845608028654  # sqrt(2/pi)
    return 0.5 * x * (1.0 + jnp.tanh(c * (x + 0.044715 * (x * x * x))))


# ---------------------------------------------------------------------------
# Fused Pallas kernel:
#   Inception(d_model->d_ff) -> GELU -> Inception(d_ff->d_model)
#   -> softmax-weighted accumulate into the running residual sum
# One grid step processes a batch tile of `bt` elements; each conv is a single
# im2col + one bf16 MXU matmul with f32 accumulation.
# ---------------------------------------------------------------------------
def _make_fused_conv_accum_kernel(H, W, Cin, Cff, Cout, K, bt, total):
    p = (K - 1) // 2
    Hp, Wp = H + 2 * p, W + 2 * p
    rows = H * W                       # padded sequence length for this period

    def _pad_hw(v):
        # (bt, H, W, C) -> (bt, Hp, Wp, C): per-image zero halo built in
        # registers (no host-side jnp.pad, no VMEM scratch round trip).
        c = v.shape[-1]
        if p == 0:
            return v
        zr = jnp.zeros((bt, p, W, c), v.dtype)
        v = jnp.concatenate([zr, v, zr], axis=1)
        zc = jnp.zeros((bt, Hp, p, c), v.dtype)
        return jnp.concatenate([zc, v, zc], axis=2)

    def _im2col(vp):
        # (bt, Hp, Wp, C) -> (bt*H*W, K*K*C): K*K shifted windows stacked along
        # the contraction (lane) axis, then a lanes-preserving collapse.
        # TODO(synk): for Cin/Cff >= ~128 switch to tap-wise accumulation
        #   (acc_f32 += window @ w[dh, dw]) to avoid the K^2 im2col VMEM blowup
        #   (the key v7x constraint at real d_ff), and consider staging the
        #   halo once in a VMEM scratch with pl.ds/pl.multiple_of windows.
        c = vp.shape[-1]
        cols = []
        for dh in range(K):
            for dw in range(K):
                cols.append(vp[:, dh:dh + H, dw:dw + W, :])
        col = jnp.concatenate(cols, axis=-1)              # (bt, H, W, K*K*C)
        return col.reshape(bt * rows, K * K * c)

    def kernel(acc_ref, x_ref, w1_ref, b1_ref, w2_ref, b2_ref, pw_ref, o_ref):
        # ---- Inception block 1 (Cin -> Cff): one bf16 MXU matmul ----
        x = x_ref[...].astype(jnp.bfloat16)               # (bt, H, W, Cin)
        col1 = _im2col(_pad_hw(x))                        # (bt*H*W, K*K*Cin) bf16
        h1 = jnp.dot(col1, w1_ref[...],
                     preferred_element_type=jnp.float32)  # f32 accumulation
        h1 = _gelu(h1 + b1_ref[...])                      # (bt*H*W, Cff) f32

        # ---- Inception block 2 (Cff -> Cout): intermediate stays on-chip ----
        col2 = _im2col(_pad_hw(h1.astype(jnp.bfloat16).reshape(bt, H, W, Cff)))
        out = jnp.dot(col2, w2_ref[...],
                      preferred_element_type=jnp.float32)
        out = out + b2_ref[...]                           # (bt*H*W, Cout) f32

        # ---- fused epilogue: residual-carrying softmax-weighted accumulate ----
        #   acc <- acc + softmax_weight[b] * conv_out[b, :total, :]
        # TODO(synk): Cout < 128 at these toy sizes means masked vst stores; at
        #   production d_model (>=128) the store is lane-dense.  Flattening to
        #   (bt, total*Cout) would force an in-kernel cross-lane relayout, not
        #   worth it here.
        b0 = pl.program_id(0) * bt
        for j in range(bt):                               # static unroll
            w = pw_ref[b0 + j]                            # f32 scalar from SMEM
            contrib = out[j * rows: j * rows + total, :]  # (total, Cout)
            o_ref[j] = (acc_ref[j].astype(jnp.float32)
                        + w * contrib).astype(o_ref.dtype)

    return kernel


def _pick_batch_tile(B, rows, target_m=128):
    """Largest divisor of B with bt*rows <= ~target_m (fills the MXU M dim)."""
    cap = max(1, target_m // max(rows, 1))
    bt = 1
    for d in range(1, B + 1):
        if B % d == 0 and d <= cap:
            bt = d
    return bt


def inception_conv_accumulate(acc, x_nhwc, w1, b1, w2, b2, pw_i, *, total):
    """Returns acc + pw_i[:,None,None] * Conv(GELU(Conv(x_nhwc)))[:, :total, :]."""
    B, H, W, Cin = x_nhwc.shape
    K = w1.shape[0]
    Cff = w1.shape[-1]
    Cout = w2.shape[-1]
    assert acc.shape == (B, total, Cout) and total <= H * W

    # Weight slabs: one contiguous bf16 2D VMEM tile per conv (half the DMA /
    # footprint of f32; bf16 is the MXU-native operand on v5e/v6e/v7x).
    w1_2d = w1.reshape(K * K * Cin, Cff).astype(jnp.bfloat16)
    w2_2d = w2.reshape(K * K * Cff, Cout).astype(jnp.bfloat16)

    bt = _pick_batch_tile(B, H * W)
    kernel = _make_fused_conv_accum_kernel(H, W, Cin, Cff, Cout, K, bt, total)

    # TODO(synk): for production shapes (d_ff ~ 2048, long sequences) add an
    #   H-row tile axis with a p-row halo — keeps im2col buffers inside v7x's
    #   64 MiB VMEM, gives v7x's two TensorCores a second parallel grid axis,
    #   and then set vmem_limit_bytes explicitly.
    # TODO(synk): under jit with a donated accumulator, input_output_aliases
    #   ={0: 0} would update acc in place instead of allocating a new output.
    return pl.pallas_call(
        kernel,
        out_shape=jax.ShapeDtypeStruct((B, total, Cout), acc.dtype),
        grid_spec=pltpu.PrefetchScalarGridSpec(
            num_scalar_prefetch=0,
            grid=(B // bt,),
            in_specs=[
                pl.BlockSpec((bt, total, Cout), lambda b: (b, 0, 0)),      # acc
                pl.BlockSpec((bt, H, W, Cin), lambda b: (b, 0, 0, 0)),     # x
                pl.BlockSpec((K * K * Cin, Cff), lambda b: (0, 0)),        # w1
                pl.BlockSpec((1, Cff), lambda b: (0, 0)),                  # b1
                pl.BlockSpec((K * K * Cff, Cout), lambda b: (0, 0)),       # w2
                pl.BlockSpec((1, Cout), lambda b: (0, 0)),                 # b2
                # per-batch softmax weights: scalars in SMEM (no lane padding)
                pl.BlockSpec(memory_space=pltpu.MemorySpace.SMEM),         # pw
            ],
            out_specs=pl.BlockSpec((bt, total, Cout), lambda b: (b, 0, 0)),
        ),
        compiler_params=pltpu.CompilerParams(dimension_semantics=("parallel",)),
    )(acc, x_nhwc, w1_2d, b1, w2_2d, b2, pw_i)


# ---------------------------------------------------------------------------
# FFT_for_Period (plain JAX + host; PyTorch also pulls top_list to CPU)
# ---------------------------------------------------------------------------
def fft_for_period(x, k):
    xf = jnp.fft.rfft(x, axis=1)
    amp = jnp.abs(xf)                                   # (B, F, N)
    freq = amp.mean(axis=0).mean(axis=-1)               # (F,)
    freq = freq.at[0].set(0.0)
    _, top = jax.lax.top_k(freq, k)
    # TODO(synk): this device_get forces a host sync per call (PyTorch does the
    # same .cpu().numpy()); cache compiled kernels per period-shape / bucket
    # periods to avoid retrace + Mosaic recompile inside a training loop.
    top = np.asarray(jax.device_get(top))
    top = np.maximum(top, 1)                            # guard: never bin 0
    period = x.shape[1] // top                          # numpy ints (static shapes)
    period_weight = amp.mean(axis=-1)[:, top]           # (B, k)
    return period, period_weight


# ---------------------------------------------------------------------------
# TimesBlock forward (output-relevant path)
# ---------------------------------------------------------------------------
def times_block_forward(x, params, *, seq_len, pred_len, top_k):
    B, T, N = x.shape
    total = seq_len + pred_len
    assert T == total
    period_list, period_weight = fft_for_period(x, top_k)
    pw = jax.nn.softmax(period_weight, axis=1)          # (B, k) f32

    # Running accumulator carries the residual: result = x + sum_i pw_i*conv_i.
    acc = x
    for i in range(top_k):
        period = int(period_list[i])
        if total % period != 0:
            length = (total // period + 1) * period
            pad = jnp.zeros((B, length - total, N), x.dtype)
            out = jnp.concatenate([x, pad], axis=1)
        else:
            length = total
            out = x
        # NHWC per-period tensor: (B, H=length//period, W=period, C=N)
        out = out.reshape(B, length // period, period, N)
        # TODO(synk): the patch_embedding / ConvTranspose2d / Transformer branch
        #   (out_1) in the PyTorch forward never contributes to the returned
        #   value (dead code), so it is intentionally not computed here.
        acc = inception_conv_accumulate(acc, out, params["w1"], params["b1"],
                                        params["w2"], params["b2"],
                                        pw[:, i], total=total)
    return acc


# ---------------------------------------------------------------------------
# Parameter init: Inception_Block_V1 folded into one effective KxK conv
# ---------------------------------------------------------------------------
def init_inception_effective(key, cin, cout, num_kernels):
    K = 2 * num_kernels - 1
    p = num_kernels - 1
    w_eff = jnp.zeros((K, K, cin, cout), jnp.float32)
    b_eff = jnp.zeros((cout,), jnp.float32)
    keys = jax.random.split(key, 2 * num_kernels)
    for i in range(num_kernels):
        ks = 2 * i + 1
        std = (2.0 / (cin * ks * ks)) ** 0.5
        wi = jax.random.normal(keys[2 * i], (ks, ks, cin, cout), jnp.float32) * std
        bi = jax.random.normal(keys[2 * i + 1], (cout,), jnp.float32) * 0.02
        pad = p - i
        w_eff = w_eff + jnp.pad(wi, ((pad, pad), (pad, pad), (0, 0), (0, 0)))
        b_eff = b_eff + bi
    return w_eff / num_kernels, (b_eff / num_kernels)[None, :]   # bias as (1, cout)


# ---------------------------------------------------------------------------
# Pure-JAX reference (same tanh-GELU and bf16-operand / f32-accum matmul path)
# ---------------------------------------------------------------------------
def _conv_ref(x, w, b):
    y = jax.lax.conv_general_dilated(
        x.astype(jnp.bfloat16), w.astype(jnp.bfloat16),
        window_strides=(1, 1), padding="SAME",
        dimension_numbers=("NHWC", "HWIO", "NHWC"),
        preferred_element_type=jnp.float32)
    return y + b


def times_block_reference(x, params, *, seq_len, pred_len, top_k):
    B, T, N = x.shape
    total = seq_len + pred_len
    period_list, period_weight = fft_for_period(x, top_k)
    res = []
    for i in range(top_k):
        period = int(period_list[i])
        if total % period != 0:
            length = (total // period + 1) * period
            pad = jnp.zeros((B, length - total, N), x.dtype)
            out = jnp.concatenate([x, pad], axis=1)
        else:
            length = total
            out = x
        out = out.reshape(B, length // period, period, N)
        h = _gelu(_conv_ref(out, params["w1"], params["b1"]))
        out = _conv_ref(h, params["w2"], params["b2"])
        out = out.reshape(B, length, N)[:, :total, :]
        res.append(out)
    res = jnp.stack(res, axis=1)                        # (B, k, T, N)
    pw = jax.nn.softmax(period_weight, axis=1)
    return x + jnp.einsum("bktn,bk->btn", res, pw)


if __name__ == "__main__":
    # configs (small, consistent with the module)
    seq_len, pred_len = 12, 4          # T = 16
    d_model, d_ff = 16, 32
    num_kernels, top_k = 3, 2
    B = 2
    T = seq_len + pred_len

    key = jax.random.PRNGKey(0)
    kx, k1, k2 = jax.random.split(key, 3)
    x = jax.random.normal(kx, (B, T, d_model), jnp.float32)

    w1, b1 = init_inception_effective(k1, d_model, d_ff, num_kernels)
    w2, b2 = init_inception_effective(k2, d_ff, d_model, num_kernels)
    params = {"w1": w1, "b1": b1, "w2": w2, "b2": b2}

    out = times_block_forward(x, params, seq_len=seq_len, pred_len=pred_len,
                              top_k=top_k)
    out = jax.block_until_ready(out)

    ref = times_block_reference(x, params, seq_len=seq_len, pred_len=pred_len,
                                top_k=top_k)
    np.testing.assert_allclose(np.asarray(out), np.asarray(ref),
                               rtol=1e-2, atol=1e-2)

    print("KERNEL_OK")
</pallas_src>

<mosaic_0001>
module attributes {stable_mosaic.version = 11 : i64} {
  func.func @kernel(%arg0: i32, %arg1: memref<2x16x16xf32, #tpu.memory_space<vmem>>, %arg2: memref<2x8x2x16xf32, #tpu.memory_space<vmem>>, %arg3: memref<400x32xbf16, #tpu.memory_space<vmem>>, %arg4: memref<1x32xf32, #tpu.memory_space<vmem>>, %arg5: memref<800x16xbf16, #tpu.memory_space<vmem>>, %arg6: memref<1x16xf32, #tpu.memory_space<vmem>>, %arg7: memref<2xf32, #tpu.memory_space<smem>>, %arg8: memref<2x16x16xf32, #tpu.memory_space<vmem>>) attributes {dimension_semantics = [#tpu.dimension_semantics<parallel>], iteration_bounds = array<i64: 1>, scalar_prefetch = 0 : i64, scratch_operands = 0 : i64, tpu.core_type = #tpu.core_type<tc>, window_params = [{transform_indices = @transform_0, window_bounds = array<i64: 2, 16, 16>}, {transform_indices = @transform_1, window_bounds = array<i64: 2, 8, 2, 16>}, {pipeline_mode = #tpu.pipeline_mode<synchronous>, transform_indices = @transform_2, window_bounds = array<i64: 400, 32>}, {pipeline_mode = #tpu.pipeline_mode<synchronous>, transform_indices = @transform_3, window_bounds = array<i64: 1, 32>}, {pipeline_mode = #tpu.pipeline_mode<synchronous>, transform_indices = @transform_4, window_bounds = array<i64: 800, 16>}, {pipeline_mode = #tpu.pipeline_mode<synchronous>, transform_indices = @transform_5, window_bounds = array<i64: 1, 16>}, {transform_indices = @transform_6, window_bounds = array<i64: 2>}, {transform_indices = @transform_7, window_bounds = array<i64: 2, 16, 16>}]} {
    %c0 = arith.constant 0 : index
    %c0_0 = arith.constant 0 : index
    %c0_1 = arith.constant 0 : index
    %c0_2 = arith.constant 0 : index
    %0 = vector.load %arg2[%c0, %c0_0, %c0_1, %c0_2] : memref<2x8x2x16xf32, #tpu.memory_space<vmem>>, vector<2x8x2x16xf32>
    %1 = arith.truncf %0 : vector<2x8x2x16xf32> to vector<2x8x2x16xbf16>
    %cst = arith.constant 0.000000e+00 : bf16
    %2 = vector.broadcast %cst : bf16 to vector<2x2x2x16xbf16>
    %3 = tpu.concatenate %2, %1, %2 in 1 : vector<2x2x2x16xbf16>, vector<2x8x2x16xbf16>, vector<2x2x2x16xbf16> -> vector<2x12x2x16xbf16>
    %cst_3 = arith.constant 0.000000e+00 : bf16
    %4 = vector.broadcast %cst_3 : bf16 to vector<2x12x2x16xbf16>
    %5 = tpu.concatenate %4, %3, %4 in 2 : vector<2x12x2x16xbf16>, vector<2x12x2x16xbf16>, vector<2x12x2x16xbf16> -> vector<2x12x6x16xbf16>
    %6 = vector.extract_strided_slice %5 {offsets = [0, 0, 0, 0], sizes = [2, 8, 2, 16], strides = [1, 1, 1, 1]} : vector<2x12x6x16xbf16> to vector<2x8x2x16xbf16>
    %7 = vector.extract_strided_slice %5 {offsets = [0, 0, 1, 0], sizes = [2, 8, 2, 16], strides = [1, 1, 1, 1]} : vector<2x12x6x16xbf16> to vector<2x8x2x16xbf16>
    %8 = vector.extract_strided_slice %5 {offsets = [0, 0, 2, 0], sizes = [2, 8, 2, 16], strides = [1, 1, 1, 1]} : vector<2x12x6x16xbf16> to vector<2x8x2x16xbf16>
    %9 = vector.extract_strided_slice %5 {offsets = [0, 0, 3, 0], sizes = [2, 8, 2, 16], strides = [1, 1, 1, 1]} : vector<2x12x6x16xbf16> to vector<2x8x2x16xbf16>
    %10 = vector.extract_strided_slice %5 {offsets = [0, 0, 4, 0], sizes = [2, 8, 2, 16], strides = [1, 1, 1, 1]} : vector<2x12x6x16xbf16> to vector<2x8x2x16xbf16>
    %11 = vector.extract_strided_slice %5 {offsets = [0, 1, 0, 0], sizes = [2, 8, 2, 16], strides = [1, 1, 1, 1]} : vector<2x12x6x16xbf16> to vector<2x8x2x16xbf16>
    %12 = vector.extract_strided_slice %5 {offsets = [0, 1, 1, 0], sizes = [2, 8, 2, 16], strides = [1, 1, 1, 1]} : vector<2x12x6x16xbf16> to vector<2x8x2x16xbf16>
    %13 = vector.extract_strided_slice %5 {offsets = [0, 1, 2, 0], sizes = [2, 8, 2, 16], strides = [1, 1, 1, 1]} : vector<2x12x6x16xbf16> to vector<2x8x2x16xbf16>
    %14 = vector.extract_strided_slice %5 {offsets = [0, 1, 3, 0], sizes = [2, 8, 2, 16], strides = [1, 1, 1, 1]} : vector<2x12x6x16xbf16> to vector<2x8x2x16xbf16>
    %15 = vector.extract_strided_slice %5 {offsets = [0, 1, 4, 0], sizes = [2, 8, 2, 16], strides = [1, 1, 1, 1]} : vector<2x12x6x16xbf16> to vector<2x8x2x16xbf16>
    %16 = vector.extract_strided_slice %5 {offsets = [0, 2, 0, 0], sizes = [2, 8, 2, 16], strides = [1, 1, 1, 1]} : vector<2x12x6x16xbf16> to vector<2x8x2x16xbf16>
    %17 = vector.extract_strided_slice %5 {offsets = [0, 2, 1, 0], sizes = [2, 8, 2, 16], strides = [1, 1, 1, 1]} : vector<2x12x6x16xbf16> to vector<2x8x2x16xbf16>
    %18 = vector.extract_strided_slice %5 {offsets = [0, 2, 2, 0], sizes = [2, 8, 2, 16], strides = [1, 1, 1, 1]} : vector<2x12x6x16xbf16> to vector<2x8x2x16xbf16>
    %19 = vector.extract_strided_slice %5 {offsets = [0, 2, 3, 0], sizes = [2, 8, 2, 16], strides = [1, 1, 1, 1]} : vector<2x12x6x16xbf16> to vector<2x8x2x16xbf16>
    %20 = vector.extract_strided_slice %5 {offsets = [0, 2, 4, 0], sizes = [2, 8, 2, 16], strides = [1, 1, 1, 1]} : vector<2x12x6x16xbf16> to vector<2x8x2x16xbf16>
    %21 = vector.extract_strided_slice %5 {offsets = [0, 3, 0, 0], sizes = [2, 8, 2, 16], strides = [1, 1, 1, 1]} : vector<2x12x6x16xbf16> to vector<2x8x2x16xbf16>
    %22 = vector.extract_strided_slice %5 {offsets = [0, 3, 1, 0], sizes = [2, 8, 2, 16], strides = [1, 1, 1, 1]} : vector<2x12x6x16xbf16> to vector<2x8x2x16xbf16>
    %23 = vector.extract_strided_slice %5 {offsets = [0, 3, 2, 0], sizes = [2, 8, 2, 16], strides = [1, 1, 1, 1]} : vector<2x12x6x16xbf16> to vector<2x8x2x16xbf16>
    %24 = vector.extract_strided_slice %5 {offsets = [0, 3, 3, 0], sizes = [2, 8, 2, 16], strides = [1, 1, 1, 1]} : vector<2x12x6x16xbf16> to vector<2x8x2x16xbf16>
    %25 = vector.extract_strided_slice %5 {offsets = [0, 3, 4, 0], sizes = [2, 8, 2, 16], strides = [1, 1, 1, 1]} : vector<2x12x6x16xbf16> to vector<2x8x2x16xbf16>
    %26 = vector.extract_strided_slice %5 {offsets = [0, 4, 0, 0], sizes = [2, 8, 2, 16], strides = [1, 1, 1, 1]} : vector<2x12x6x16xbf16> to vector<2x8x2x16xbf16>
    %27 = vector.extract_strided_slice %5 {offsets = [0, 4, 1, 0], sizes = [2, 8, 2, 16], strides = [1, 1, 1, 1]} : vector<2x12x6x16xbf16> to vector<2x8x2x16xbf16>
    %28 = vector.extract_strided_slice %5 {offsets = [0, 4, 2, 0], sizes = [2, 8, 2, 16], strides = [1, 1, 1, 1]} : vector<2x12x6x16xbf16> to vector<2x8x2x16xbf16>
    %29 = vector.extract_strided_slice %5 {offsets = [0, 4, 3, 0], sizes = [2, 8, 2, 16], strides = [1, 1, 1, 1]} : vector<2x12x6x16xbf16> to vector<2x8x2x16xbf16>
    %30 = vector.extract_strided_slice %5 {offsets = [0, 4, 4, 0], sizes = [2, 8, 2, 16], strides = [1, 1, 1, 1]} : vector<2x12x6x16xbf16> to vector<2x8x2x16xbf16>
    %31 = tpu.concatenate %6, %7, %8, %9, %10, %11, %12, %13, %14, %15, %16, %17, %18, %19, %20, %21 in 3 : vector<2x8x2x16xbf16>, vector<2x8x2x16xbf16>, vector<2x8x2x16xbf16>, vector<2x8x2x16xbf16>, vector<2x8x2x16xbf16>, vector<2x8x2x16xbf16>, vector<2x8x2x16xbf16>, vector<2x8x2x16xbf16>, vector<2x8x2x16xbf16>, vector<2x8x2x16xbf16>, vector<2x8x2x16xbf16>, vector<2x8x2x16xbf16>, vector<2x8x2x16xbf16>, vector<2x8x2x16xbf16>, vector<2x8x2x16xbf16>, vector<2x8x2x16xbf16> -> vector<2x8x2x256xbf16>
    %32 = tpu.concatenate %22, %23, %24, %25, %26, %27, %28, %29, %30 in 3 : vector<2x8x2x16xbf16>, vector<2x8x2x16xbf16>, vector<2x8x2x16xbf16>, vector<2x8x2x16xbf16>, vector<2x8x2x16xbf16>, vector<2x8x2x16xbf16>, vector<2x8x2x16xbf16>, vector<2x8x2x16xbf16>, vector<2x8x2x16xbf16> -> vector<2x8x2x144xbf16>
    %33 = tpu.concatenate %31, %32 in 3 : vector<2x8x2x256xbf16>, vector<2x8x2x144xbf16> -> vector<2x8x2x400xbf16>
    %34 = vector.shape_cast %33 : vector<2x8x2x400xbf16> to vector<32x400xbf16>
    %c0_4 = arith.constant 0 : index
    %c0_5 = arith.constant 0 : index
    %35 = vector.load %arg3[%c0_4, %c0_5] : memref<400x32xbf16, #tpu.memory_space<vmem>>, vector<400x32xbf16>
    %cst_6 = arith.constant dense<0.000000e+00> : vector<32x32xf32>
    %36 = tpu.matmul %34, %35, %cst_6 {dimension_numbers = #tpu.dot_dimension_numbers<[1], [0], [0], [1], [0, 0, 1, 1], [], []>} : vector<32x400xbf16>, vector<400x32xbf16>, vector<32x32xf32> -> vector<32x32xf32>
    %c0_7 = arith.constant 0 : index
    %c0_8 = arith.constant 0 : index
    %37 = vector.load %arg4[%c0_7, %c0_8] : memref<1x32xf32, #tpu.memory_space<vmem>>, vector<1x32xf32>
    %38 = vector.broadcast %37 : vector<1x32xf32> to vector<32x32xf32>
    %39 = arith.addf %36, %38 : vector<32x32xf32>
    %cst_9 = arith.constant 5.000000e-01 : f32
    %40 = vector.broadcast %cst_9 : f32 to vector<32x32xf32>
    %41 = arith.mulf %40, %39 : vector<32x32xf32>
    %42 = arith.mulf %39, %39 : vector<32x32xf32>
    %43 = arith.mulf %42, %39 : vector<32x32xf32>
    %cst_10 = arith.constant 4.471500e-02 : f32
    %44 = vector.broadcast %cst_10 : f32 to vector<32x32xf32>
    %45 = arith.mulf %44, %43 : vector<32x32xf32>
    %46 = arith.addf %39, %45 : vector<32x32xf32>
    %cst_11 = arith.constant 0.797884583 : f32
    %47 = vector.broadcast %cst_11 : f32 to vector<32x32xf32>
    %48 = arith.mulf %47, %46 : vector<32x32xf32>
    %49 = math.tanh %48 : vector<32x32xf32>
    %cst_12 = arith.constant 1.000000e+00 : f32
    %50 = vector.broadcast %cst_12 : f32 to vector<32x32xf32>
    %51 = arith.addf %50, %49 : vector<32x32xf32>
    %52 = arith.mulf %41, %51 : vector<32x32xf32>
    %53 = arith.truncf %52 : vector<32x32xf32> to vector<32x32xbf16>
    %54 = vector.shape_cast %53 : vector<32x32xbf16> to vector<2x8x2x32xbf16>
    %cst_13 = arith.constant 0.000000e+00 : bf16
    %55 = vector.broadcast %cst_13 : bf16 to vector<2x2x2x32xbf16>
    %56 = tpu.concatenate %55, %54, %55 in 1 : vector<2x2x2x32xbf16>, vector<2x8x2x32xbf16>, vector<2x2x2x32xbf16> -> vector<2x12x2x32xbf16>
    %cst_14 = arith.constant 0.000000e+00 : bf16
    %57 = vector.broadcast %cst_14 : bf16 to vector<2x12x2x32xbf16>
    %58 = tpu.concatenate %57, %56, %57 in 2 : vector<2x12x2x32xbf16>, vector<2x12x2x32xbf16>, vector<2x12x2x32xbf16> -> vector<2x12x6x32xbf16>
    %59 = vector.extract_strided_slice %58 {offsets = [0, 0, 0, 0], sizes = [2, 8, 2, 32], strides = [1, 1, 1, 1]} : vector<2x12x6x32xbf16> to vector<2x8x2x32xbf16>
    %60 = vector.extract_strided_slice %58 {offsets = [0, 0, 1, 0], sizes = [2, 8, 2, 32], strides = [1, 1, 1, 1]} : vector<2x12x6x32xbf16> to vector<2x8x2x32xbf16>
    %61 = vector.extract_strided_slice %58 {offsets = [0, 0, 2, 0], sizes = [2, 8, 2, 32], strides = [1, 1, 1, 1]} : vector<2x12x6x32xbf16> to vector<2x8x2x32xbf16>
    %62 = vector.extract_strided_slice %58 {offsets = [0, 0, 3, 0], sizes = [2, 8, 2, 32], strides = [1, 1, 1, 1]} : vector<2x12x6x32xbf16> to vector<2x8x2x32xbf16>
    %63 = vector.extract_strided_slice %58 {offsets = [0, 0, 4, 0], sizes = [2, 8, 2, 32], strides = [1, 1, 1, 1]} : vector<2x12x6x32xbf16> to vector<2x8x2x32xbf16>
    %64 = vector.extract_strided_slice %58 {offsets = [0, 1, 0, 0], sizes = [2, 8, 2, 32], strides = [1, 1, 1, 1]} : vector<2x12x6x32xbf16> to vector<2x8x2x32xbf16>
    %65 = vector.extract_strided_slice %58 {offsets = [0, 1, 1, 0], sizes = [2, 8, 2, 32], strides = [1, 1, 1, 1]} : vector<2x12x6x32xbf16> to vector<2x8x2x32xbf16>
    %66 = vector.extract_strided_slice %58 {offsets = [0, 1, 2, 0], sizes = [2, 8, 2, 32], strides = [1, 1, 1, 1]} : vector<2x12x6x32xbf16> to vector<2x8x2x32xbf16>
    %67 = vector.extract_strided_slice %58 {offsets = [0, 1, 3, 0], sizes = [2, 8, 2, 32], strides = [1, 1, 1, 1]} : vector<2x12x6x32xbf16> to vector<2x8x2x32xbf16>
    %68 = vector.extract_strided_slice %58 {offsets = [0, 1, 4, 0], sizes = [2, 8, 2, 32], strides = [1, 1, 1, 1]} : vector<2x12x6x32xbf16> to vector<2x8x2x32xbf16>
    %69 = vector.extract_strided_slice %58 {offsets = [0, 2, 0, 0], sizes = [2, 8, 2, 32], strides = [1, 1, 1, 1]} : vector<2x12x6x32xbf16> to vector<2x8x2x32xbf16>
    %70 = vector.extract_strided_slice %58 {offsets = [0, 2, 1, 0], sizes = [2, 8, 2, 32], strides = [1, 1, 1, 1]} : vector<2x12x6x32xbf16> to vector<2x8x2x32xbf16>
    %71 = vector.extract_strided_slice %58 {offsets = [0, 2, 2, 0], sizes = [2, 8, 2, 32], strides = [1, 1, 1, 1]} : vector<2x12x6x32xbf16> to vector<2x8x2x32xbf16>
    %72 = vector.extract_strided_slice %58 {offsets = [0, 2, 3, 0], sizes = [2, 8, 2, 32], strides = [1, 1, 1, 1]} : vector<2x12x6x32xbf16> to vector<2x8x2x32xbf16>
    %73 = vector.extract_strided_slice %58 {offsets = [0, 2, 4, 0], sizes = [2, 8, 2, 32], strides = [1, 1, 1, 1]} : vector<2x12x6x32xbf16> to vector<2x8x2x32xbf16>
    %74 = vector.extract_strided_slice %58 {offsets = [0, 3, 0, 0], sizes = [2, 8, 2, 32], strides = [1, 1, 1, 1]} : vector<2x12x6x32xbf16> to vector<2x8x2x32xbf16>
    %75 = vector.extract_strided_slice %58 {offsets = [0, 3, 1, 0], sizes = [2, 8, 2, 32], strides = [1, 1, 1, 1]} : vector<2x12x6x32xbf16> to vector<2x8x2x32xbf16>
    %76 = vector.extract_strided_slice %58 {offsets = [0, 3, 2, 0], sizes = [2, 8, 2, 32], strides = [1, 1, 1, 1]} : vector<2x12x6x32xbf16> to vector<2x8x2x32xbf16>
    %77 = vector.extract_strided_slice %58 {offsets = [0, 3, 3, 0], sizes = [2, 8, 2, 32], strides = [1, 1, 1, 1]} : vector<2x12x6x32xbf16> to vector<2x8x2x32xbf16>
    %78 = vector.extract_strided_slice %58 {offsets = [0, 3, 4, 0], sizes = [2, 8, 2, 32], strides = [1, 1, 1, 1]} : vector<2x12x6x32xbf16> to vector<2x8x2x32xbf16>
    %79 = vector.extract_strided_slice %58 {offsets = [0, 4, 0, 0], sizes = [2, 8, 2, 32], strides = [1, 1, 1, 1]} : vector<2x12x6x32xbf16> to vector<2x8x2x32xbf16>
    %80 = vector.extract_strided_slice %58 {offsets = [0, 4, 1, 0], sizes = [2, 8, 2, 32], strides = [1, 1, 1, 1]} : vector<2x12x6x32xbf16> to vector<2x8x2x32xbf16>
    %81 = vector.extract_strided_slice %58 {offsets = [0, 4, 2, 0], sizes = [2, 8, 2, 32], strides = [1, 1, 1, 1]} : vector<2x12x6x32xbf16> to vector<2x8x2x32xbf16>
    %82 = vector.extract_strided_slice %58 {offsets = [0, 4, 3, 0], sizes = [2, 8, 2, 32], strides = [1, 1, 1, 1]} : vector<2x12x6x32xbf16> to vector<2x8x2x32xbf16>
    %83 = vector.extract_strided_slice %58 {offsets = [0, 4, 4, 0], sizes = [2, 8, 2, 32], strides = [1, 1, 1, 1]} : vector<2x12x6x32xbf16> to vector<2x8x2x32xbf16>
    %84 = tpu.concatenate %59, %60, %61, %62, %63, %64, %65, %66, %67, %68, %69, %70, %71, %72, %73, %74 in 3 : vector<2x8x2x32xbf16>, vector<2x8x2x32xbf16>, vector<2x8x2x32xbf16>, vector<2x8x2x32xbf16>, vector<2x8x2x32xbf16>, vector<2x8x2x32xbf16>, vector<2x8x2x32xbf16>, vector<2x8x2x32xbf16>, vector<2x8x2x32xbf16>, vector<2x8x2x32xbf16>, vector<2x8x2x32xbf16>, vector<2x8x2x32xbf16>, vector<2x8x2x32xbf16>, vector<2x8x2x32xbf16>, vector<2x8x2x32xbf16>, vector<2x8x2x32xbf16> -> vector<2x8x2x512xbf16>
    %85 = tpu.concatenate %75, %76, %77, %78, %79, %80, %81, %82, %83 in 3 : vector<2x8x2x32xbf16>, vector<2x8x2x32xbf16>, vector<2x8x2x32xbf16>, vector<2x8x2x32xbf16>, vector<2x8x2x32xbf16>, vector<2x8x2x32xbf16>, vector<2x8x2x32xbf16>, vector<2x8x2x32xbf16>, vector<2x8x2x32xbf16> -> vector<2x8x2x288xbf16>
    %86 = tpu.concatenate %84, %85 in 3 : vector<2x8x2x512xbf16>, vector<2x8x2x288xbf16> -> vector<2x8x2x800xbf16>
    %87 = vector.shape_cast %86 : vector<2x8x2x800xbf16> to vector<32x800xbf16>
    %c0_15 = arith.constant 0 : index
    %c0_16 = arith.constant 0 : index
    %88 = vector.load %arg5[%c0_15, %c0_16] : memref<800x16xbf16, #tpu.memory_space<vmem>>, vector<800x16xbf16>
    %cst_17 = arith.constant dense<0.000000e+00> : vector<32x16xf32>
    %89 = tpu.matmul %87, %88, %cst_17 {dimension_numbers = #tpu.dot_dimension_numbers<[1], [0], [0], [1], [0, 0, 1, 1], [], []>} : vector<32x800xbf16>, vector<800x16xbf16>, vector<32x16xf32> -> vector<32x16xf32>
    %c0_18 = arith.constant 0 : index
    %c0_19 = arith.constant 0 : index
    %90 = vector.load %arg6[%c0_18, %c0_19] : memref<1x16xf32, #tpu.memory_space<vmem>>, vector<1x16xf32>
    %91 = vector.broadcast %90 : vector<1x16xf32> to vector<32x16xf32>
    %92 = arith.addf %89, %91 : vector<32x16xf32>
    %c2_i32 = arith.constant 2 : i32
    %93 = arith.muli %arg0, %c2_i32 : i32
    %c0_i32 = arith.constant 0 : i32
    %94 = arith.addi %93, %c0_i32 : i32
    %95 = arith.index_cast %94 : i32 to index
    %96 = memref.load %arg7[%95] : memref<2xf32, #tpu.memory_space<smem>>
    %97 = vector.extract_strided_slice %92 {offsets = [0, 0], sizes = [16, 16], strides = [1, 1]} : vector<32x16xf32> to vector<16x16xf32>
    %c0_20 = arith.constant 0 : index
    %c0_21 = arith.constant 0 : index
    %c0_22 = arith.constant 0 : index
    %98 = vector.load %arg1[%c0_20, %c0_21, %c0_22] : memref<2x16x16xf32, #tpu.memory_space<vmem>>, vector<1x16x16xf32>
    %99 = vector.shape_cast %98 : vector<1x16x16xf32> to vector<16x16xf32>
    %100 = vector.broadcast %96 : f32 to vector<16x16xf32>
    %101 = arith.mulf %100, %97 : vector<16x16xf32>
    %102 = arith.addf %99, %101 : vector<16x16xf32>
    %c0_23 = arith.constant 0 : index
    %c0_24 = arith.constant 0 : index
    %c0_25 = arith.constant 0 : index
    %103 = vector.load %arg8[%c0_23, %c0_24, %c0_25] : memref<2x16x16xf32, #tpu.memory_space<vmem>>, vector<1x16x16xf32>
    %104 = vector.shape_cast %103 : vector<1x16x16xf32> to vector<16x16xf32>
    %105 = vector.shape_cast %102 : vector<16x16xf32> to vector<1x16x16xf32>
    tpu.vector_store %arg8[%c0_23, %c0_24, %c0_25], %105 {strides = array<i32>} : memref<2x16x16xf32, #tpu.memory_space<vmem>>, vector<1x16x16xf32>,
    %c1_i32 = arith.constant 1 : i32
    %106 = arith.addi %93, %c1_i32 : i32
    %107 = arith.index_cast %106 : i32 to index
    %108 = memref.load %arg7[%107] : memref<2xf32, #tpu.memory_space<smem>>
    %109 = vector.extract_strided_slice %92 {offsets = [16, 0], sizes = [16, 16], strides = [1, 1]} : vector<32x16xf32> to vector<16x16xf32>
    %c1 = arith.constant 1 : index
    %c0_26 = arith.constant 0 : index
    %c0_27 = arith.constant 0 : index
    %110 = vector.load %arg1[%c1, %c0_26, %c0_27] : memref<2x16x16xf32, #tpu.memory_space<vmem>>, vector<1x16x16xf32>
    %111 = vector.shape_cast %110 : vector<1x16x16xf32> to vector<16x16xf32>
    %112 = vector.broadcast %108 : f32 to vector<16x16xf32>
    %113 = arith.mulf %112, %109 : vector<16x16xf32>
    %114 = arith.addf %111, %113 : vector<16x16xf32>
    %c1_28 = arith.constant 1 : index
    %c0_29 = arith.constant 0 : index
    %c0_30 = arith.constant 0 : index
    %115 = vector.load %arg8[%c1_28, %c0_29, %c0_30] : memref<2x16x16xf32, #tpu.memory_space<vmem>>, vector<1x16x16xf32>
    %116 = vector.shape_cast %115 : vector<1x16x16xf32> to vector<16x16xf32>
    %117 = vector.shape_cast %114 : vector<16x16xf32> to vector<1x16x16xf32>
    tpu.vector_store %arg8[%c1_28, %c0_29, %c0_30], %117 {strides = array<i32>} : memref<2x16x16xf32, #tpu.memory_space<vmem>>, vector<1x16x16xf32>,
    return
  }
  func.func @transform_0(%arg0: i32) -> (i32, i32, i32) {
    %c0_i32 = arith.constant 0 : i32
    %c0_i32_0 = arith.constant 0 : i32
    %c0_i32_1 = arith.constant 0 : i32
    return %arg0, %c0_i32, %c0_i32_0 : i32, i32, i32
  }
  func.func @transform_1(%arg0: i32) -> (i32, i32, i32, i32) {
    %c0_i32 = arith.constant 0 : i32
    %c0_i32_0 = arith.constant 0 : i32
    %c0_i32_1 = arith.constant 0 : i32
    %c0_i32_2 = arith.constant 0 : i32
    return %arg0, %c0_i32, %c0_i32_0, %c0_i32_1 : i32, i32, i32, i32
  }
  func.func @transform_2(%arg0: i32) -> (i32, i32) {
    %c0_i32 = arith.constant 0 : i32
    %c0_i32_0 = arith.constant 0 : i32
    %c0_i32_1 = arith.constant 0 : i32
    return %c0_i32, %c0_i32_0 : i32, i32
  }
  func.func @transform_3(%arg0: i32) -> (i32, i32) {
    %c0_i32 = arith.constant 0 : i32
    %c0_i32_0 = arith.constant 0 : i32
    %c0_i32_1 = arith.constant 0 : i32
    return %c0_i32, %c0_i32_0 : i32, i32
  }
  func.func @transform_4(%arg0: i32) -> (i32, i32) {
    %c0_i32 = arith.constant 0 : i32
    %c0_i32_0 = arith.constant 0 : i32
    %c0_i32_1 = arith.constant 0 : i32
    return %c0_i32, %c0_i32_0 : i32, i32
  }
  func.func @transform_5(%arg0: i32) -> (i32, i32) {
    %c0_i32 = arith.constant 0 : i32
    %c0_i32_0 = arith.constant 0 : i32
    %c0_i32_1 = arith.constant 0 : i32
    return %c0_i32, %c0_i32_0 : i32, i32
  }
  func.func @transform_6(%arg0: i32) -> i32 {
    %c0_i32 = arith.constant 0 : i32
    %c0_i32_0 = arith.constant 0 : i32
    return %c0_i32 : i32
  }
  func.func @transform_7(%arg0: i32) -> (i32, i32, i32) {
    %c0_i32 = arith.constant 0 : i32
    %c0_i32_0 = arith.constant 0 : i32
    %c0_i32_1 = arith.constant 0 : i32
    return %arg0, %c0_i32, %c0_i32_0 : i32, i32, i32
  }
}

</mosaic_0001>

<bundles_post_ra>
// kernel: tpu_custom_call.1
= control target key start
LH: loop header
LB: loop body
LE: loop exit
PB: predicated region body
PF: predicated region fallthrough
CT: control target
= control target key end

     0   :  { %12 = vsyncpa [#allocation4], 0  ;;  %s10567_s0 = inlined_call_operand.vmem [shape: f32[2,16,16], index: 0, kind: input, shape index: {}]   ;;  %s10568_s1 = inlined_call_operand.vmem [shape: f32[2,8,2,16], index: 1, kind: input, shape index: {}]   ;;  %s10569_s2 = inlined_call_operand.vmem [shape: bf16[400,32], index: 2, kind: input, shape index: {}]   ;;  %s10570_s3 = inlined_call_operand.vmem [shape: f32[1,32], index: 3, kind: input, shape index: {}]   ;;  %s10571_s4 = inlined_call_operand.vmem [shape: bf16[800,16], index: 4, kind: input, shape index: {}]   ;;  %s10572_s5 = inlined_call_operand.vmem [shape: f32[1,16], index: 5, kind: input, shape index: {}]   ;;  %s10573_s6 = inlined_call_operand.vmem [shape: f32[2], index: 6, kind: input, shape index: {}]   ;;  %s10574_s7 = inlined_call_operand.hbm [shape: f32[2,16,16], index: 7, kind: output, shape index: {}]  }
   0x1   :  { %13 = vsyncpa [#allocation3], 0  ;;  %s32_s26 = sshll.u32 %s10573_s6, 4  ;;  %s33_s26 = int_to_ptr.vmem [resolvable:$true] %s32_s26 }
   0x2   :  { %s6023_s27 = scalar_lea.vmem %s33_s26, 16  ;;  %p6028_p1 = scmp.lt.s32.totalorder %s33_s26, %s33_s26 }
   0x3   :  { %p6024_p0 = scmp.ne.s32.totalorder %s33_s26, %s6023_s27  ;;  %p6029_p2 = scmp.lt.s32.totalorder %s6023_s27, %s6023_s27 }
   0x5   :  { %p6030_p3 = por %p6029_p2, %p6028_p1 }
   0x7   :  { %p6031_p4 = pnand %p6030_p3, %p6024_p0 }
   0x9   :  { %6034 = shalt.err (!%p6031_p4)
}
   0xa   :  { %s6061_s28 = smov [#allocation2]  }
   0xb   :  { %35 = dma.vmem_to_smem %s33_s26, 16, %s6061_s28, [#allocation4]  }
   0xc   :  { %6057 = dma.done.wait [#allocation4], 16  }
   0xd   :  { %6058 = vsyncadd [#allocation4], 4294967280 }
   0xe   :  { %39 = sfence }
   0xf   :  { %vm107_vm0 = vcmask 1040384   ;;  %v42_v0 = vld [vmem:[%s10568_s1 + $0x2] sm:$0x3]  ;;  %v10575_v1 = vmov 0   ;;  %vm143_vm1 = vcmask 1041408   ;;  %s6063_s21 = smov 16  }
  0x10   :  { %v90_v2 = vrot.slane %v10575_v1, 7  ;;  %v58_v3 = vpack.c.bf16 %v42_v0, %v42_v0  ;;  %v41_v4 = vld [vmem:[%s10568_s1] sm:$0x3]  ;;  %v43_v5 = vld [vmem:[%s10568_s1 + $0x4] sm:$0x3]  ;;  %2388 = vmatprep.subr.bf16.mxu1 %v10575_v1  ;;  %s6064_s30 = smov 32  }
  0x11   :  { %v57_v6 = vpack.c.bf16 %v41_v4, %v41_v4  ;;  %v59_v7 = vpack.c.bf16 %v43_v5, %v43_v5  ;;  %v44_v8 = vld [vmem:[%s10568_s1 + $0x6] sm:$0x3]  ;;  %v45_v9 = vld [vmem:[%s10568_s1 + $0x8] sm:$0x3]  ;;  %v46_v17 = vld [vmem:[%s10568_s1 + $0xa] sm:$0x3] }
  0x12   :  { %v110_v10 = vsel %vm107_vm0, 0, %v90_v2  ;;  %v92_v11 = vrot.slane %v58_v3, 7  ;;  %v60_v12 = vpack.c.bf16 %v44_v8, %v44_v8  ;;  %v61_v13 = vpack.c.bf16 %v45_v9, %v45_v9  ;;  %v49_v37 = vld [vmem:[%s10568_s1 + $0x10] sm:$0x3]  ;;  %v50_v42 = vld [vmem:[%s10568_s1 + $0x12] sm:$0x3] }
  0x13   :  { %v6136_v14 = vsel %vm143_vm1, %v110_v10, 0  ;;  %v91_v15 = vrot.slane %v57_v6, 7  ;;  %v93_v16 = vrot.slane %v59_v7, 7  ;;  %v62_v28 = vpack.c.bf16 %v46_v17, %v46_v17  ;;  %v51_v50 = vld [vmem:[%s10568_s1 + $0x14] sm:$0x3]  ;;  %s6065_s6 = smov 48  }
  0x14   :  { %10841 = vst [vmem:[#allocation8_spill] sm:$0xff] %v6136_v14  ;;  %v6142_v18 = vshrl.u32 %v6136_v14, 16  ;;  %v6145_v19 = vshll.u32 %v6136_v14, 16  ;;  %v114_v20 = vsel %vm107_vm0, 0, %v92_v11  ;;  %v94_v21 = vrot.slane %v60_v12, 7  ;;  %s6066_s8 = smov 64  }
  0x15   :  { %v6149_v22 = vsel %vm143_vm1, %v114_v20, 0  ;;  %v112_v23 = vsel %vm107_vm0, 0, %v91_v15  ;;  %v116_v24 = vsel %vm107_vm0, 0, %v93_v16  ;;  %v95_v25 = vrot.slane %v61_v13, 7  ;;  %v52_v51 = vld [vmem:[%s10568_s1 + $0x16] sm:$0x3] }
  0x16   :  { %10842 = vst [vmem:[#allocation9_spill] sm:$0xff] %v6142_v18  ;;  %10843 = vst [vmem:[#allocation10_spill] sm:$0xff] %v6145_v19  ;;  %v165_v26 = vrot.slane %v6145_v19, 1  ;;  %v10582_v27 = vshrl.u32 %v6149_v22, 16  ;;  %v10581_v29 = vshll.u32 %v6149_v22, 16  ;;  %v6157_v30 = vsel %vm143_vm1, %v112_v23, 0 }
  0x17   :  { %v6160_v31 = vsel %vm143_vm1, %v116_v24, 0  ;;  %v118_v32 = vsel %vm107_vm0, 0, %v94_v21  ;;  %v10584_v34 = vshrl.u32 %v6157_v30, 16  ;;  %v10583_v35 = vshll.u32 %v6157_v30, 16  ;;  %v53_v55 = vld [vmem:[%s10568_s1 + $0x18] sm:$0x3] }
  0x18   :  { %v6164_v33 = vor.u32 %v165_v26, %v6142_v18  ;;  %v6169_v36 = vshrl.u32 %v6160_v31, 16  ;;  %v177_v38 = vrot.slane %v10581_v29, 1  ;;  %v6177_v39 = vshll.u32 %v6160_v31, 16  ;;  %v54_v16 = vld [vmem:[%s10568_s1 + $0x1a] sm:$0x3]  ;;  %s6067_s11 = smov 80  }
  0x19   :  { %v6180_v40 = vsel %vm143_vm1, %v118_v32, 0  ;;  %v120_v41 = vsel %vm107_vm0, 0, %v95_v25  ;;  %v171_v43 = vrot.slane %v10583_v35, 1  ;;  %v96_v49 = vrot.slane %v62_v28, 7  ;;  %s6068_s14 = smov 96   ;;  %s6069_s17 = smov 112  }
  0x1a   :  { %10844 = vst [vmem:[#allocation11_spill] sm:$0xff] %v6164_v33  ;;  %239 = vrot.lane.b32.xlu0 %v6164_v33, %s6063_s21  ;;  %v6191_v44 = vshrl.u32 %v6180_v40, 16  ;;  %v6194_v45 = vshll.u32 %v6180_v40, 16  ;;  %v6198_v46 = vor.u32 %v177_v38, %v10582_v27  ;;  %v183_v47 = vrot.slane %v6177_v39, 1  ;;  %s6071_s23 = smov [#allocation5]  }
  0x1b   :  { %v6202_v48 = vsel %vm143_vm1, %v120_v41, 0  ;;  %v6212_v52 = vor.u32 %v171_v43, %v10584_v34  ;;  %v122_v58 = vsel %vm107_vm0, 0, %v96_v49  ;;  %v65_v59 = vpack.c.bf16 %v49_v37, %v49_v37  ;;  %s5674_s24 = sshll.u32 %s6071_s23, 4  ;;  %s5675_s24 = int_to_ptr.vmem [resolvable:$true] %s5674_s24 }
  0x1c   :  { %v189_v53 = vrot.slane %v6194_v45, 1  ;;  %v6216_v54 = vshrl.u32 %v6202_v48, 16  ;;  %243 = vrot.lane.b32.xlu1 %v6198_v46, %s6063_s21  ;;  %v6224_v56 = vor.u32 %v183_v47, %v6169_v36  ;;  %v6227_v57 = vshll.u32 %v6202_v48, 16  ;;  %s6035_s25 = scalar_lea.vmem %s5675_s24, 512  ;;  %p6040_p6 = scmp.lt.s32.totalorder %s5675_s24, %s5675_s24 }
  0x1d   :  { %v6236_v61 = vsel %vm143_vm1, %v122_v58, 0  ;;  %v66_v62 = vpack.c.bf16 %v50_v42, %v50_v42  ;;  %v99_v3 = vrot.slane %v65_v59, 7  ;;  %v67_v5 = vpack.c.bf16 %v51_v50, %v51_v50  ;;  %p6036_p5 = scmp.ne.s32.totalorder %s5675_s24, %s6035_s25  ;;  %p6041_p7 = scmp.lt.s32.totalorder %s6035_s25, %s6035_s25 }
  0x1e   :  { %241 = vrot.lane.b32.xlu0 %v6212_v52, %s6063_s21  ;;  %v6233_v60 = vor.u32 %v189_v53, %v6191_v44  ;;  %v195_v63 = vrot.slane %v6227_v57, 1  ;;  %v6240_v0 = vshrl.u32 %v6236_v61, 16  ;;  %v6243_v2 = vshll.u32 %v6236_v61, 16 }
  0x1f   :  { %v100_v4 = vrot.slane %v66_v62, 7  ;;  %v68_v6 = vpack.c.bf16 %v52_v51, %v52_v51  ;;  %v128_v9 = vsel %vm107_vm0, 0, %v99_v3  ;;  %v69_v10 = vpack.c.bf16 %v53_v55, %v53_v55  ;;  %p6042_p8 = por %p6041_p7, %p6040_p6 }
  0x20   :  { %245 = vrot.lane.b32.xlu1 %v6224_v56, %s6063_s21  ;;  %v6248_v7 = vor.u32 %v195_v63, %v6216_v54  ;;  %v201_v8 = vrot.slane %v6243_v2, 1  ;;  %v6255_v11 = vsel %vm143_vm1, %v128_v9, 0  ;;  %v101_v13 = vrot.slane %v67_v5, 7 }
  0x21   :  { %10845 = vst [vmem:[#allocation12_spill] sm:$0xff] %v6255_v11  ;;  %v130_v12 = vsel %vm107_vm0, 0, %v100_v4  ;;  %v102_v15 = vrot.slane %v68_v6, 7  ;;  %v10580_v20 = vshrl.u32 %v6255_v11, 16  ;;  %v10579_v21 = vshll.u32 %v6255_v11, 16  ;;  %p6043_p9 = pnand %p6042_p8, %p6036_p5 }
  0x22   :  { %247 = vrot.lane.b32.xlu0 %v6233_v60, %s6063_s21  ;;  %v6262_v17 = vor.u32 %v201_v8, %v6240_v0  ;;  %v6267_v23 = vsel %vm143_vm1, %v130_v12, 0  ;;  %v132_v26 = vsel %vm107_vm0, 0, %v101_v13  ;;  %v103_v41 = vrot.slane %v69_v10, 7 }
  0x23   :  { %10846 = vst [vmem:[#allocation13_spill] sm:$0xff] %v6267_v23  ;;  %v10578_v24 = vshrl.u32 %v6267_v23, 16  ;;  %v10577_v25 = vshll.u32 %v6267_v23, 16  ;;  %v134_v28 = vsel %vm107_vm0, 0, %v102_v15  ;;  %v207_v32 = vrot.slane %v10579_v21, 1 }
  0x24   :  { %249 = vrot.lane.b32.xlu1 %v6248_v7, %s6063_s21  ;;  %v6278_v37 = vsel %vm143_vm1, %v132_v26, 0  ;;  %v6281_v38 = vsel %vm143_vm1, %v134_v28, 0  ;;  %v136_v53 = vsel %vm107_vm0, 0, %v103_v41  ;;  %v70_v55 = vpack.c.bf16 %v54_v16, %v54_v16 }
  0x25   :  { %10847 = vst [vmem:[#allocation14_spill] sm:$0xff] %v6278_v37  ;;  %10848 = vst [vmem:[#allocation15_spill] sm:$0xff] %v6281_v38  ;;  %v213_v42 = vrot.slane %v10577_v25, 1  ;;  %v6288_v43 = vshrl.u32 %v6278_v37, 16  ;;  %v6291_v47 = vshll.u32 %v6278_v37, 16  ;;  %v6294_v49 = vshrl.u32 %v6281_v38, 16 }
  0x26   :  { %251 = vrot.lane.b32.xlu0 %v6262_v17, %s6063_s21  ;;  %v6298_v50 = vor.u32 %v207_v32, %v10580_v20  ;;  %v6301_v51 = vshll.u32 %v6281_v38, 16  ;;  %v6313_v63 = vsel %vm143_vm1, %v136_v53, 0  ;;  %v104_v3 = vrot.slane %v70_v55, 7 }
  0x27   :  { %10849 = vst [vmem:[#allocation16_spill] sm:$0xff] %v6288_v43  ;;  %10850 = vst [vmem:[#allocation17_spill] sm:$0xff] %v6294_v49  ;;  %v6306_v58 = vor.u32 %v213_v42, %v10578_v24  ;;  %v219_v59 = vrot.slane %v6291_v47, 1  ;;  %v6321_v5 = vshrl.u32 %v6313_v63, 16  ;;  %v6324_v6 = vshll.u32 %v6313_v63, 16 }
  0x28   :  { %10851 = vst [vmem:[#allocation18_spill] sm:$0xff] %v6298_v50  ;;  %253 = vrot.lane.b32.xlu1 %v6298_v50, %s6063_s21  ;;  %v225_v62 = vrot.slane %v6301_v51, 1  ;;  %10853 = vst [vmem:[#allocation20_spill] sm:$0xff] %v6313_v63  ;;  %v138_v9 = vsel %vm107_vm0, 0, %v104_v3  ;;  %v6354_v32 = vrot.slane %v6136_v14, 1  ;;  %v6359_v41 = vrot.slane %v6157_v30, 1 }
  0x29   :  { %10852 = vst [vmem:[#allocation19_spill] sm:$0xff] %v6306_v58  ;;  %v6318_v4 = vor.u32 %v219_v59, %v6288_v43  ;;  %10855 = vst [vmem:[#allocation22_spill] sm:$0xff] %v6321_v5  ;;  %v231_v10 = vrot.slane %v6324_v6, 1  ;;  %v6332_v12 = vsel %vm143_vm1, %v138_v9, 0  ;;  %v6364_v42 = vrot.slane %v6149_v22, 1 }
  0x2a   :  { %255 = vrot.lane.b32.xlu0 %v6306_v58, %s6063_s21  ;;  %v6327_v8 = vor.u32 %v225_v62, %v6294_v49  ;;  %10857 = vst [vmem:[#allocation24_spill] sm:$0xff] %v6332_v12  ;;  %v6337_v13 = vshrl.u32 %v6332_v12, 16  ;;  %v6340_v15 = vshll.u32 %v6332_v12, 16  ;;  %10861 = vst [vmem:[#allocation28_spill] sm:$0xff] %v6354_v32  ;;  %v6369_v53 = vrot.slane %v6160_v31, 1 }
  0x2b   :  { %10854 = vst [vmem:[#allocation21_spill] sm:$0xff] %v6318_v4  ;;  %v6345_v16 = vor.u32 %v231_v10, %v6321_v5  ;;  %10862 = vst [vmem:[#allocation29_spill] sm:$0xff] %v6364_v42  ;;  %v6374_v55 = vrot.slane %v6180_v40, 1  ;;  %v6379_v59 = vrot.slane %v6202_v48, 1  ;;  %v6384_v62 = vrot.slane %v6236_v61, 1 }
  0x2c   :  { %10856 = vst [vmem:[#allocation23_spill] sm:$0xff] %v6327_v8  ;;  %257 = vrot.lane.b32.xlu1 %v6318_v4, %s6063_s21  ;;  %10858 = vst [vmem:[#allocation25_spill] sm:$0xff] %v6337_v13  ;;  %v237_v26 = vrot.slane %v6340_v15, 1  ;;  %v6389_v3 = vrot.slane %v6255_v11, 1  ;;  %v317_v9 = vrot.slane %v6142_v18, 1  ;;  %v318_v10 = vrot.slane %v6145_v19, 2 }
  0x2d   :  { %10859 = vst [vmem:[#allocation26_spill] sm:$0xff] %v6345_v16  ;;  %10863 = vst [vmem:[#allocation30_spill] sm:$0xff] %v6369_v53  ;;  %v6397_v1 = vrot.slane %v6267_v23, 1  ;;  %v329_v25 = vrot.slane %v6191_v44, 1  ;;  %v332_v24 = vrot.slane %v6216_v54, 1  ;;  %v335_v21 = vrot.slane %v6240_v0, 1 }
  0x2e   :  { %259 = vrot.lane.b32.xlu0 %v6327_v8, %s6063_s21  ;;  %v6351_v28 = vor.u32 %v237_v26, %v6337_v13  ;;  %10864 = vst [vmem:[#allocation31_spill] sm:$0xff] %v6374_v55  ;;  %10865 = vst [vmem:[#allocation32_spill] sm:$0xff] %v6379_v59  ;;  %v326_v26 = vrot.slane %v6169_v36, 1  ;;  %v344_v20 = vrot.slane %v6288_v43, 1  ;;  %v347_v29 = vrot.slane %v6294_v49, 1 }
  0x2f   :  { %10866 = vst [vmem:[#allocation33_spill] sm:$0xff] %v6384_v62  ;;  %10867 = vst [vmem:[#allocation34_spill] sm:$0xff] %v6389_v3  ;;  %v6407_v27 = vrot.slane %v6278_v37, 1  ;;  %v350_v35 = vrot.slane %v6321_v5, 1  ;;  %v353_v34 = vrot.slane %v6337_v13, 1  ;;  %v6417_v43 = vrot.slane %v6313_v63, 1 }
  0x30   :  { %261 = vrot.lane.b32.xlu1 %v6345_v16, %s6063_s21  ;;  %10860 = vst [vmem:[#allocation27_spill] sm:$0xff] %v6351_v28  ;;  %10868 = vst [vmem:[#allocation35_spill] sm:$0xff] %v6397_v1  ;;  %v6420_v49 = vrot.slane %v6332_v12, 1  ;;  %v10873_v13 = vshll.u32 %v6157_v30, 16  ;;  %v327_v19 = vrot.slane %v6177_v39, 2  ;;  %v1242_v18 = vrot.slane %v6191_v44, 7 }
  0x31   :  { %10869 = vst [vmem:[#allocation36_spill] sm:$0xff] %v6407_v27  ;;  %v10879_v44 = vshrl.u32 %v6255_v11, 16  ;;  %vm779_vm2 = vcmask 130048   ;;  %vm806_vm3 = vcmask 261120   ;;  %vm833_vm4 = vcmask 392192  }
  0x32   :  { %263 = vrot.lane.b32.xlu0 %v6351_v28, %s6063_s21  ;;  %10871 = vst [vmem:[#allocation38_spill] sm:$0xff] %v6420_v49  ;;  %v321_v5 = vrot.slane %v10873_v13, 2  ;;  %v1240_v13 = vrot.slane %v6169_v36, 7  ;;  %v336_v36 = vrot.slane %v6243_v2, 2  ;;  %vm860_vm5 = vcmask 523264  }
  0x33   :  { %vm887_vm6 = vcmask 654336   ;;  %vm918_vm7 = vcmask 785408   ;;  %vm949_vm8 = vcmask 916480  }
  0x34   :  { %291 = vrot.lane.b32.xlu1 %v6354_v32, %s6064_s30 }
  0x36   :  { %293 = vrot.lane.b32.xlu0 %v6359_v41, %s6064_s30 }
  0x38   :  { %295 = vrot.lane.b32.xlu1 %v6364_v42, %s6064_s30  ;;  %v6414_v42 = vrot.slane %v6281_v38, 1 }
  0x3a   :  { %297 = vrot.lane.b32.xlu0 %v6369_v53, %s6064_s30  ;;  %10870 = vst [vmem:[#allocation37_spill] sm:$0xff] %v6414_v42 }
  0x3c   :  { %299 = vrot.lane.b32.xlu1 %v6374_v55, %s6064_s30  ;;  %v10875_v55 = vshll.u32 %v6149_v22, 16 }
  0x3e   :  { %301 = vrot.lane.b32.xlu0 %v6379_v59, %s6064_s30  ;;  %v324_v53 = vrot.slane %v10875_v55, 2  ;;  %v6447_v55 = vor.u32 %v1240_v13, %v6177_v39  ;;  %v6461_v39 = vor.u32 %v327_v19, %v326_v26 }
  0x40   :  { %303 = vrot.lane.b32.xlu1 %v6384_v62, %s6064_s30 }
  0x42   :  { %305 = vrot.lane.b32.xlu0 %v6389_v3, %s6064_s30  ;;  %v10872_v3 = vshrl.u32 %v6157_v30, 16 }
  0x44   :  { %307 = vrot.lane.b32.xlu1 %v6397_v1, %s6064_s30  ;;  %v320_v62 = vrot.slane %v10872_v3, 1  ;;  %v10874_v1 = vshrl.u32 %v6149_v22, 16  ;;  %v6437_v3 = vor.u32 %v318_v10, %v317_v9  ;;  %v6456_v10 = vor.u32 %v1242_v18, %v6194_v45 }
  0x46   :  { %309 = vrot.lane.b32.xlu0 %v6407_v27, %s6064_s30  ;;  %v323_v59 = vrot.slane %v10874_v1, 1  ;;  %10876 = vst [vmem:[#allocation39_spill] sm:$0xff] %v6437_v3  ;;  %v330_v27 = vrot.slane %v6194_v45, 2  ;;  %v6443_v1 = vor.u32 %v321_v5, %v320_v62  ;;  %v1244_v5 = vrot.slane %v6216_v54, 7 }
  0x47   :  { %v338_v62 = vrot.slane %v10879_v44, 1  ;;  %v10880_v45 = vshll.u32 %v6255_v11, 16  ;;  %v348_v44 = vrot.slane %v6301_v51, 2 }
  0x48   :  { %311 = vrot.lane.b32.xlu1 %v6414_v42, %s6064_s30  ;;  %10877 = vst [vmem:[#allocation40_spill] sm:$0xff] %v6443_v1  ;;  %v333_v42 = vrot.slane %v6227_v57, 2  ;;  %v6452_v9 = vor.u32 %v324_v53, %v323_v59  ;;  %v6466_v13 = vor.u32 %v1244_v5, %v6227_v57  ;;  %v1246_v53 = vrot.slane %v6240_v0, 7 }
  0x49   :  { %v6471_v18 = vor.u32 %v330_v27, %v329_v25  ;;  %v339_v54 = vrot.slane %v10880_v45, 2  ;;  %v10881_v59 = vshrl.u32 %v6267_v23, 16  ;;  %v10883_v0 = vshll.u32 %v6267_v23, 16 }
  0x4a   :  { %313 = vrot.lane.b32.xlu0 %v6417_v43, %s6064_s30  ;;  %10878 = vst [vmem:[#allocation41_spill] sm:$0xff] %v6452_v9  ;;  %v6478_v26 = vor.u32 %v1246_v53, %v6243_v2  ;;  %v6482_v57 = vor.u32 %v333_v42, %v332_v24  ;;  %v345_v27 = vrot.slane %v6291_v47, 2  ;;  %v6489_v25 = vor.u32 %v336_v36, %v335_v21 }
  0x4b   :  { %v341_v19 = vrot.slane %v10881_v59, 1  ;;  %v342_v5 = vrot.slane %v10883_v0, 2  ;;  %v351_v2 = vrot.slane %v6324_v6, 2  ;;  %v6495_v53 = vor.u32 %v339_v54, %v338_v62 }
  0x4c   :  { %315 = vrot.lane.b32.xlu1 %v6420_v49, %s6064_s30  ;;  %10882 = vst [vmem:[#allocation42_spill] sm:$0xff] %v6482_v57  ;;  %10884 = vst [vmem:[#allocation43_spill] sm:$0xff] %v6489_v25  ;;  %v354_v24 = vrot.slane %v6340_v15, 2  ;;  %v6499_v42 = vrot.slane %v6136_v14, 2  ;;  %v6507_v21 = vor.u32 %v345_v27, %v344_v20  ;;  %v6511_v36 = vor.u32 %v348_v44, %v347_v29 }
  0x4d   :  { %10885 = vst [vmem:[#allocation44_spill] sm:$0xff] %v6495_v53  ;;  %v6503_v45 = vor.u32 %v342_v5, %v341_v19  ;;  %v6515_v62 = vor.u32 %v351_v2, %v350_v35  ;;  %v6526_v20 = vrot.slane %v6157_v30, 2  ;;  %v6531_v29 = vrot.slane %v6149_v22, 2 }
  0x4e   :  { %356 = vrot.lane.b32.xlu0 %v6437_v3, %s6065_s6  ;;  %10886 = vst [vmem:[#allocation45_spill] sm:$0xff] %v6499_v42  ;;  %10888 = vst [vmem:[#allocation47_spill] sm:$0xff] %v6507_v21  ;;  %v6519_v54 = vor.u32 %v354_v24, %v353_v34  ;;  %v6536_v34 = vrot.slane %v6160_v31, 2  ;;  %v6541_v35 = vrot.slane %v6180_v40, 2  ;;  %v6546_v59 = vrot.slane %v6202_v48, 2 }
  0x4f   :  { %10887 = vst [vmem:[#allocation46_spill] sm:$0xff] %v6503_v45  ;;  %10889 = vst [vmem:[#allocation48_spill] sm:$0xff] %v6511_v36  ;;  %v6551_v19 = vrot.slane %v6236_v61, 2  ;;  %v6556_v0 = vrot.slane %v6255_v11, 2  ;;  %v6561_v5 = vrot.slane %v6267_v23, 2  ;;  %v6566_v27 = vrot.slane %v6278_v37, 2 }
  0x50   :  { %358 = vrot.lane.b32.xlu1 %v6443_v1, %s6065_s6  ;;  %10890 = vst [vmem:[#allocation49_spill] sm:$0xff] %v6515_v62  ;;  %10891 = vst [vmem:[#allocation50_spill] sm:$0xff] %v6519_v54  ;;  %v6571_v44 = vrot.slane %v6281_v38, 2  ;;  %v6576_v2 = vrot.slane %v6313_v63, 2  ;;  %v6581_v24 = vrot.slane %v6332_v12, 2 }
  0x51   :  { %10892 = vst [vmem:[#allocation51_spill] sm:$0xff] %v6556_v0  ;;  %10893 = vst [vmem:[#allocation52_spill] sm:$0xff] %v6561_v5 }
  0x52   :  { %360 = vrot.lane.b32.xlu0 %v6452_v9, %s6065_s6  ;;  %10894 = vst [vmem:[#allocation53_spill] sm:$0xff] %v6566_v27  ;;  %10895 = vst [vmem:[#allocation54_spill] sm:$0xff] %v6571_v44 }
  0x53   :  { %10896 = vst [vmem:[#allocation55_spill] sm:$0xff] %v6576_v2  ;;  %10897 = vst [vmem:[#allocation56_spill] sm:$0xff] %v6581_v24 }
  0x54   :  { %362 = vrot.lane.b32.xlu1 %v6461_v39, %s6065_s6 }
  0x56   :  { %364 = vrot.lane.b32.xlu0 %v6471_v18, %s6065_s6 }
  0x58   :  { %366 = vrot.lane.b32.xlu1 %v6482_v57, %s6065_s6 }
  0x5a   :  { %368 = vrot.lane.b32.xlu0 %v6489_v25, %s6065_s6 }
  0x5c   :  { %370 = vrot.lane.b32.xlu1 %v6495_v53, %s6065_s6 }
  0x5e   :  { %372 = vrot.lane.b32.xlu0 %v6503_v45, %s6065_s6 }
  0x60   :  { %374 = vrot.lane.b32.xlu1 %v6507_v21, %s6065_s6 }
  0x62   :  { %376 = vrot.lane.b32.xlu0 %v6511_v36, %s6065_s6 }
  0x64   :  { %378 = vrot.lane.b32.xlu1 %v6515_v62, %s6065_s6 }
  0x66   :  { %380 = vrot.lane.b32.xlu0 %v6519_v54, %s6065_s6  ;;  %v47_v54 = vld [vmem:[%s10568_s1 + $0xc] sm:$0x3] }
  0x67   :  { %v63_v62 = vpack.c.bf16 %v47_v54, %v47_v54 }
  0x68   :  { %395 = vrot.lane.b32.xlu1 %v6499_v42, %s6066_s8 }
  0x69   :  { %v97_v36 = vrot.slane %v63_v62, 7  ;;  %v55_v62 = vld [vmem:[%s10568_s1 + $0x1c] sm:$0x3] }
  0x6a   :  { %397 = vrot.lane.b32.xlu0 %v6526_v20, %s6066_s8 }
  0x6b   :  { %v124_v21 = vsel %vm107_vm0, 0, %v97_v36  ;;  %v71_v36 = vpack.c.bf16 %v55_v62, %v55_v62 }
  0x6c   :  { %399 = vrot.lane.b32.xlu1 %v6531_v29, %s6066_s8  ;;  %v6606_v54 = vsel %vm143_vm1, %v124_v21, 0 }
  0x6d   :  { %10899 = vst [vmem:[#allocation58_spill] sm:$0xff] %v6606_v54 }
  0x6e   :  { %401 = vrot.lane.b32.xlu0 %v6536_v34, %s6066_s8 }
  0x70   :  { %403 = vrot.lane.b32.xlu1 %v6541_v35, %s6066_s8 }
  0x72   :  { %405 = vrot.lane.b32.xlu0 %v6546_v59, %s6066_s8 }
  0x74   :  { %407 = vrot.lane.b32.xlu1 %v6551_v19, %s6066_s8 }
  0x76   :  { %409 = vrot.lane.b32.xlu0 %v6556_v0, %s6066_s8 }
  0x78   :  { %411 = vrot.lane.b32.xlu1 %v6561_v5, %s6066_s8 }
  0x7a   :  { %413 = vrot.lane.b32.xlu0 %v6566_v27, %s6066_s8 }
  0x7c   :  { %415 = vrot.lane.b32.xlu1 %v6571_v44, %s6066_s8 }
  0x7e   :  { %417 = vrot.lane.b32.xlu0 %v6576_v2, %s6066_s8 }
  0x80   :  { %419 = vrot.lane.b32.xlu1 %v6581_v24, %s6066_s8 }
  0x82   :  { %423 = vrot.lane.b32.xlu0 %v6136_v14, %s6067_s11 }
  0x84   :  { %425 = vrot.lane.b32.xlu1 %v6157_v30, %s6067_s11 }
  0x86   :  { %427 = vrot.lane.b32.xlu0 %v6149_v22, %s6067_s11 }
  0x88   :  { %429 = vrot.lane.b32.xlu1 %v6160_v31, %s6067_s11 }
  0x8a   :  { %431 = vrot.lane.b32.xlu0 %v6180_v40, %s6067_s11 }
  0x8c   :  { %v6601_v45 = vpop.permute.xlu0 %239  ;;  %433 = vrot.lane.b32.xlu1 %v6202_v48, %s6067_s11 }
  0x8d   :  { %10898 = vst [vmem:[#allocation57_spill] sm:$0xff] %v6601_v45 }
  0x8e   :  { %v6611_v53 = vpop.permute.xlu1 %243  ;;  %435 = vrot.lane.b32.xlu0 %v6236_v61, %s6067_s11 }
  0x8f   :  { %10900 = vst [vmem:[#allocation59_spill] sm:$0xff] %v6611_v53  ;;  %v105_v53 = vrot.slane %v71_v36, 7 }
  0x90   :  { %v6615_v3 = vpop.permute.xlu0 %241  ;;  %437 = vrot.lane.b32.xlu1 %v6606_v54, %s6067_s11 }
  0x91   :  { %10901 = vst [vmem:[#allocation60_spill] sm:$0xff] %v6615_v3  ;;  %v140_v62 = vsel %vm107_vm0, 0, %v105_v53 }
  0x92   :  { %v6619_v45 = vpop.permute.xlu1 %245  ;;  %439 = vrot.lane.b32.xlu0 %v6255_v11, %s6067_s11  ;;  %v6643_v36 = vsel %vm143_vm1, %v140_v62, 0  ;;  %v6660_v62 = vshll.u32 %v6606_v54, 16 }
  0x93   :  { %10902 = vst [vmem:[#allocation61_spill] sm:$0xff] %v6619_v45  ;;  %10908 = vst [vmem:[#allocation67_spill] sm:$0xff] %v6643_v36 }
  0x94   :  { %v6623_v21 = vpop.permute.xlu0 %247  ;;  %441 = vrot.lane.b32.xlu1 %v6267_v23, %s6067_s11 }
  0x95   :  { %10903 = vst [vmem:[#allocation62_spill] sm:$0xff] %v6623_v21 }
  0x96   :  { %v6627_v24 = vpop.permute.xlu1 %249  ;;  %443 = vrot.lane.b32.xlu0 %v6278_v37, %s6067_s11 }
  0x97   :  { %10904 = vst [vmem:[#allocation63_spill] sm:$0xff] %v6627_v24 }
  0x98   :  { %v6631_v3 = vpop.permute.xlu0 %251  ;;  %445 = vrot.lane.b32.xlu1 %v6281_v38, %s6067_s11 }
  0x99   :  { %10905 = vst [vmem:[#allocation64_spill] sm:$0xff] %v6631_v3 }
  0x9a   :  { %v6636_v45 = vpop.permute.xlu1 %253  ;;  %447 = vrot.lane.b32.xlu0 %v6313_v63, %s6067_s11 }
  0x9b   :  { %10906 = vst [vmem:[#allocation65_spill] sm:$0xff] %v6636_v45  ;;  %v48_v45 = vld [vmem:[%s10568_s1 + $0xe] sm:$0x3] }
  0x9c   :  { %v6640_v11 = vpop.permute.xlu0 %255  ;;  %449 = vrot.lane.b32.xlu1 %v6332_v12, %s6067_s11  ;;  %v64_v63 = vpack.c.bf16 %v48_v45, %v48_v45 }
  0x9d   :  { %10907 = vst [vmem:[#allocation66_spill] sm:$0xff] %v6640_v11 }
  0x9e   :  { %v6647_v37 = vpop.permute.xlu1 %257  ;;  %451 = vrot.lane.b32.xlu0 %v6643_v36, %s6067_s11 }
  0x9f   :  { %10909 = vst [vmem:[#allocation68_spill] sm:$0xff] %v6647_v37 }
  0xa0   :  { %v6651_v38 = vpop.permute.xlu0 %259  ;;  %465 = vrot.lane.b32.xlu1 %v6164_v33, %s6068_s14 }
  0xa1   :  { %10910 = vst [vmem:[#allocation69_spill] sm:$0xff] %v6651_v38  ;;  %v6671_v38 = vshrl.u32 %v6606_v54, 16 }
  0xa2   :  { %v6655_v53 = vpop.permute.xlu1 %261  ;;  %467 = vrot.lane.b32.xlu0 %v6212_v52, %s6068_s14 }
  0xa3   :  { %10911 = vst [vmem:[#allocation70_spill] sm:$0xff] %v6655_v53  ;;  %v457_v53 = vrot.slane %v6660_v62, 1 }
  0xa4   :  { %469 = vrot.lane.b32.xlu1 %v6198_v46, %s6068_s14  ;;  %v6664_v37 = vpop.permute.xlu0 %263 }
  0xa5   :  { %10912 = vst [vmem:[#allocation71_spill] sm:$0xff] %v6664_v37  ;;  %v6686_v12 = vor.u32 %v457_v53, %v6671_v38  ;;  %v6701_v53 = vshll.u32 %v6643_v36, 16 }
  0xa6   :  { %v6666_v11 = vpop.permute.xlu1 %291  ;;  %471 = vrot.lane.b32.xlu0 %v6224_v56, %s6068_s14 }
  0xa7   :  { %10913 = vst [vmem:[#allocation72_spill] sm:$0xff] %v6666_v11 }
  0xa8   :  { %473 = vrot.lane.b32.xlu1 %v6233_v60, %s6068_s14  ;;  %v6679_v33 = vpop.permute.xlu0 %293 }
  0xa9   :  { %10914 = vst [vmem:[#allocation73_spill] sm:$0xff] %v6679_v33  ;;  %v98_v33 = vrot.slane %v64_v63, 7  ;;  %v6713_v63 = vshrl.u32 %v6643_v36, 16 }
  0xaa   :  { %v6681_v37 = vpop.permute.xlu1 %295  ;;  %475 = vrot.lane.b32.xlu0 %v6248_v7, %s6068_s14 }
  0xab   :  { %10915 = vst [vmem:[#allocation74_spill] sm:$0xff] %v6681_v37 }
  0xac   :  { %477 = vrot.lane.b32.xlu1 %v6262_v17, %s6068_s14  ;;  %v6690_v23 = vpop.permute.xlu0 %297 }
  0xad   :  { %10916 = vst [vmem:[#allocation75_spill] sm:$0xff] %v6690_v23  ;;  %v126_v23 = vsel %vm107_vm0, 0, %v98_v33 }
  0xae   :  { %v6692_v11 = vpop.permute.xlu1 %299  ;;  %479 = vrot.lane.b32.xlu0 %v6686_v12, %s6068_s14 }
  0xaf   :  { %10917 = vst [vmem:[#allocation76_spill] sm:$0xff] %v6692_v11 }
  0xb0   :  { %481 = vrot.lane.b32.xlu1 %v6298_v50, %s6068_s14  ;;  %v6698_v37 = vpop.permute.xlu0 %301  ;;  %v463_v50 = vrot.slane %v6701_v53, 1 }
  0xb1   :  { %10918 = vst [vmem:[#allocation77_spill] sm:$0xff] %v6698_v37  ;;  %v6717_v37 = vsel %vm143_vm1, %v126_v23, 0  ;;  %v6737_v23 = vpack.i.bf16 %v6136_v14, %v6354_v32 }
  0xb2   :  { %v6703_v45 = vpop.permute.xlu1 %303  ;;  %483 = vrot.lane.b32.xlu0 %v6306_v58, %s6068_s14 }
  0xb3   :  { %10919 = vst [vmem:[#allocation78_spill] sm:$0xff] %v6703_v45  ;;  %10925 = vst [vmem:[#allocation84_spill] sm:$0xff] %v6737_v23 }
  0xb4   :  { %485 = vrot.lane.b32.xlu1 %v6318_v4, %s6068_s14  ;;  %v6710_v11 = vpop.permute.xlu0 %305  ;;  %v601_v4 = vshll.u32 %v6717_v37, 16 }
  0xb5   :  { %10920 = vst [vmem:[#allocation79_spill] sm:$0xff] %v6710_v11  ;;  %v6728_v11 = vor.u32 %v463_v50, %v6713_v63 }
  0xb6   :  { %v6719_v3 = vpop.permute.xlu1 %307  ;;  %487 = vrot.lane.b32.xlu0 %v6327_v8, %s6068_s14  ;;  %v603_v50 = vrot.slane %v601_v4, 1  ;;  %v678_v45 = vrot.slane %v601_v4, 2 }
  0xb7   :  { %10921 = vst [vmem:[#allocation80_spill] sm:$0xff] %v6719_v3  ;;  %10923 = vst [vmem:[#allocation82_spill] sm:$0xff] %v6728_v11 }
  0xb8   :  { %489 = vrot.lane.b32.xlu1 %v6345_v16, %s6068_s14  ;;  %v6725_v33 = vpop.permute.xlu0 %309 }
  0xb9   :  { %10922 = vst [vmem:[#allocation81_spill] sm:$0xff] %v6725_v33  ;;  %v599_v33 = vshrl.u32 %v6717_v37, 16 }
  0xba   :  { %v6731_v58 = vpop.permute.xlu1 %311  ;;  %491 = vrot.lane.b32.xlu0 %v6351_v28, %s6068_s14  ;;  %v527_v28 = vrot.slane %v6671_v38, 1 }
  0xbb   :  { %10924 = vst [vmem:[#allocation83_spill] sm:$0xff] %v6731_v58  ;;  %v6752_v32 = vor.u32 %v603_v50, %v599_v33  ;;  %v6768_v50 = vrot.slane %v6717_v37, 1 }
  0xbc   :  { %493 = vrot.lane.b32.xlu1 %v6728_v11, %s6068_s14  ;;  %v6741_v3 = vpop.permute.xlu0 %313 }
  0xbd   :  { %10926 = vst [vmem:[#allocation85_spill] sm:$0xff] %v6741_v3  ;;  %v528_v3 = vrot.slane %v6660_v62, 2 }
  0xbe   :  { %v6744_v16 = vpop.permute.xlu1 %315  ;;  %5926 = vrot.lane.b32.xlu0 %v6737_v23, %s6069_s17 }
  0xbf   :  { %10927 = vst [vmem:[#allocation86_spill] sm:$0xff] %v6744_v16  ;;  %v6760_v16 = vrot.slane %v6606_v54, 1 }
  0xc0   :  { %499 = vrot.lane.b32.xlu1 %v6359_v41, %s6069_s17  ;;  %v6750_v58 = vpop.permute.xlu0 %356 }
  0xc1   :  { %10928 = vst [vmem:[#allocation87_spill] sm:$0xff] %v6750_v58  ;;  %v677_v58 = vrot.slane %v599_v33, 1 }
  0xc2   :  { %v6755_v8 = vpop.permute.xlu1 %358  ;;  %1216 = vrot.lane.b32.xlu0 %v6686_v12, %s6063_s21 }
  0xc3   :  { %10929 = vst [vmem:[#allocation88_spill] sm:$0xff] %v6755_v8  ;;  %v6774_v8 = vor.u32 %v528_v3, %v527_v28  ;;  %v6780_v14 = vor.u32 %v678_v45, %v677_v58  ;;  %v1248_v28 = vrot.slane %v6671_v38, 7  ;;  %v1250_v3 = vrot.slane %v599_v33, 7 }
  0xc4   :  { %1218 = vrot.lane.b32.xlu1 %v6752_v32, %s6063_s21  ;;  %v6765_v23 = vpop.permute.xlu0 %360 }
  0xc5   :  { %10930 = vst [vmem:[#allocation89_spill] sm:$0xff] %v6765_v23  ;;  %10932 = vst [vmem:[#allocation91_spill] sm:$0xff] %v6774_v8  ;;  %v1251_v38 = vor.u32 %v1250_v3, %v601_v4  ;;  %v10947_v3 = vld [vmem:[#allocation32_spill] sm:$0xff] }
  0xc6   :  { %v6770_v24 = vpop.permute.xlu1 %362  ;;  %1224 = vrot.lane.b32.xlu0 %v6760_v16, %s6064_s30 }
  0xc7   :  { %10931 = vst [vmem:[#allocation90_spill] sm:$0xff] %v6770_v24 }
  0xc8   :  { %1226 = vrot.lane.b32.xlu1 %v6768_v50, %s6064_s30  ;;  %v6778_v21 = vpop.permute.xlu0 %364 }
  0xc9   :  { %10933 = vst [vmem:[#allocation92_spill] sm:$0xff] %v6778_v21 }
  0xca   :  { %v6782_v23 = vpop.permute.xlu1 %366  ;;  %1232 = vrot.lane.b32.xlu0 %v6774_v8, %s6065_s6 }
  0xcb   :  { %10934 = vst [vmem:[#allocation93_spill] sm:$0xff] %v6782_v23  ;;  %v10939_v23 = vld [vmem:[#allocation9_spill] sm:$0xff] }
  0xcc   :  { %1234 = vrot.lane.b32.xlu1 %v6780_v14, %s6065_s6  ;;  %v6788_v24 = vpop.permute.xlu0 %368 }
  0xcd   :  { %10935 = vst [vmem:[#allocation94_spill] sm:$0xff] %v6788_v24  ;;  %v1249_v24 = vor.u32 %v1248_v28, %v6660_v62  ;;  %v10946_v28 = vld [vmem:[#allocation31_spill] sm:$0xff] }
  0xce   :  { %v6790_v2 = vpop.permute.xlu1 %370  ;;  %1266 = vrot.lane.b32.xlu0 %v6447_v55, %s6066_s8 }
  0xcf   :  { %10936 = vst [vmem:[#allocation95_spill] sm:$0xff] %v6790_v2  ;;  %v1252_v2 = vrot.slane %v10939_v23, 7 }
  0xd0   :  { %1268 = vrot.lane.b32.xlu1 %v6456_v10, %s6066_s8  ;;  %v6797_v58 = vpop.permute.xlu0 %372  ;;  %v10942_v10 = vld [vmem:[#allocation10_spill] sm:$0xff] }
  0xd1   :  { %10937 = vst [vmem:[#allocation96_spill] sm:$0xff] %v6797_v58  ;;  %v6813_v33 = vor.u32 %v1252_v2, %v10942_v10  ;;  %v10945_v2 = vld [vmem:[#allocation30_spill] sm:$0xff] }
  0xd2   :  { %v6799_v45 = vpop.permute.xlu1 %374  ;;  %1270 = vrot.lane.b32.xlu0 %v6466_v13, %s6066_s8 }
  0xd3   :  { %10938 = vst [vmem:[#allocation97_spill] sm:$0xff] %v6799_v45  ;;  %10943 = vst [vmem:[#allocation10_spill] sm:$0xff] %v6813_v33 }
  0xd4   :  { %1272 = vrot.lane.b32.xlu1 %v6478_v26, %s6066_s8  ;;  %v6807_v55 = vpop.permute.xlu0 %376 }
  0xd5   :  { %10940 = vst [vmem:[#allocation9_spill] sm:$0xff] %v6807_v55 }
  0xd6   :  { %v6809_v21 = vpop.permute.xlu1 %378  ;;  %1274 = vrot.lane.b32.xlu0 %v1249_v24, %s6066_s8 }
  0xd7   :  { %10941 = vst [vmem:[#allocation98_spill] sm:$0xff] %v6809_v21 }
  0xd8   :  { %1276 = vrot.lane.b32.xlu1 %v1251_v38, %s6066_s8  ;;  %v6816_v13 = vpop.permute.xlu0 %380 }
  0xd9   :  { %10944 = vst [vmem:[#allocation99_spill] sm:$0xff] %v6816_v13 }
  0xda   :  { %v6818_v62 = vpop.permute.xlu1 %395  ;;  %1278 = vrot.lane.b32.xlu0 %v6813_v33, %s6066_s8  ;;  %v10948_v33 = vld [vmem:[#allocation33_spill] sm:$0xff] }
  0xdc   :  { %1292 = vrot.lane.b32.xlu1 %v6717_v37, %s6067_s11  ;;  %v6824_v4 = vpop.permute.xlu0 %397 }
  0xde   :  { %v6826_v26 = vpop.permute.xlu1 %399  ;;  %1296 = vrot.lane.b32.xlu0 %v6752_v32, %s6068_s14 }
  0xe0   :  { %503 = vrot.lane.b32.xlu1 %v10945_v2, %s6069_s17  ;;  %v6832_v24 = vpop.permute.xlu0 %401 }
  0xe2   :  { %v6834_v23 = vpop.permute.xlu1 %403  ;;  %505 = vrot.lane.b32.xlu0 %v10946_v28, %s6069_s17 }
  0xe4   :  { %507 = vrot.lane.b32.xlu1 %v10947_v3, %s6069_s17  ;;  %v6840_v38 = vpop.permute.xlu0 %405 }
  0xe6   :  { %v6842_v10 = vpop.permute.xlu1 %407  ;;  %509 = vrot.lane.b32.xlu0 %v10948_v33, %s6069_s17 }
  0xe8   :  { %511 = vrot.lane.b32.xlu1 %v6760_v16, %s6069_s17  ;;  %v6848_v13 = vpop.permute.xlu0 %409 }
  0xe9   :  { %10949 = vst [vmem:[#allocation30_spill] sm:$0xff] %v6848_v13 }
  0xea   :  { %v6850_v21 = vpop.permute.xlu1 %411  ;;  %535 = vrot.lane.b32.xlu0 %v6499_v42, %s6063_s21 }
  0xeb   :  { %10950 = vst [vmem:[#allocation31_spill] sm:$0xff] %v6850_v21 }
  0xec   :  { %537 = vrot.lane.b32.xlu1 %v6526_v20, %s6063_s21  ;;  %v6856_v55 = vpop.permute.xlu0 %413 }
  0xed   :  { %10951 = vst [vmem:[#allocation32_spill] sm:$0xff] %v6856_v55 }
  0xee   :  { %v6858_v45 = vpop.permute.xlu1 %415  ;;  %539 = vrot.lane.b32.xlu0 %v6531_v29, %s6063_s21 }
  0xef   :  { %10952 = vst [vmem:[#allocation33_spill] sm:$0xff] %v6858_v45  ;;  %v10654_v45 = vrot.slane %v6606_v54, 2 }
  0xf0   :  { %541 = vrot.lane.b32.xlu1 %v6536_v34, %s6063_s21  ;;  %v6864_v58 = vpop.permute.xlu0 %417 }
  0xf1   :  { %10953 = vst [vmem:[#allocation100_spill] sm:$0xff] %v6864_v58 }
  0xf2   :  { %v6866_v13 = vpop.permute.xlu1 %419  ;;  %543 = vrot.lane.b32.xlu0 %v6541_v35, %s6063_s21 }
  0xf3   :  { %10954 = vst [vmem:[#allocation101_spill] sm:$0xff] %v6866_v13 }
  0xf4   :  { %545 = vrot.lane.b32.xlu1 %v6546_v59, %s6063_s21  ;;  %v6872_v42 = vpop.permute.xlu0 %423 }
  0xf5   :  { %10955 = vst [vmem:[#allocation102_spill] sm:$0xff] %v6872_v42 }
  0xf6   :  { %v6875_v55 = vpop.permute.xlu1 %425  ;;  %547 = vrot.lane.b32.xlu0 %v6551_v19, %s6063_s21 }
  0xf7   :  { %10956 = vst [vmem:[#allocation103_spill] sm:$0xff] %v6875_v55 }
  0xf8   :  { %549 = vrot.lane.b32.xlu1 %v10654_v45, %s6063_s21  ;;  %v6882_v13 = vpop.permute.xlu0 %427 }
  0xf9   :  { %10957 = vst [vmem:[#allocation104_spill] sm:$0xff] %v6882_v13 }
  0xfa   :  { %v6884_v58 = vpop.permute.xlu1 %429  ;;  %1300 = vrot.lane.b32.xlu0 %v6768_v50, %s6069_s17 }
  0xfb   :  { %10958 = vst [vmem:[#allocation105_spill] sm:$0xff] %v6884_v58 }
  0xfc   :  { %567 = vrot.lane.b32.xlu1 %v6157_v30, %s6064_s30  ;;  %v6890_v21 = vpop.permute.xlu0 %431 }
  0xfd   :  { %10959 = vst [vmem:[#allocation106_spill] sm:$0xff] %v6890_v21 }
  0xfe   :  { %v6892_v55 = vpop.permute.xlu1 %433  ;;  %569 = vrot.lane.b32.xlu0 %v6149_v22, %s6064_s30 }
  0xff   :  { %10960 = vst [vmem:[#allocation107_spill] sm:$0xff] %v6892_v55 }
 0x100   :  { %571 = vrot.lane.b32.xlu1 %v6160_v31, %s6064_s30  ;;  %v6898_v45 = vpop.permute.xlu0 %435 }
 0x101   :  { %10961 = vst [vmem:[#allocation108_spill] sm:$0xff] %v6898_v45 }
 0x102   :  { %v6900_v13 = vpop.permute.xlu1 %437  ;;  %573 = vrot.lane.b32.xlu0 %v6180_v40, %s6064_s30 }
 0x103   :  { %10962 = vst [vmem:[#allocation109_spill] sm:$0xff] %v6900_v13 }
 0x104   :  { %575 = vrot.lane.b32.xlu1 %v6202_v48, %s6064_s30  ;;  %v6906_v58 = vpop.permute.xlu0 %439 }
 0x105   :  { %10963 = vst [vmem:[#allocation110_spill] sm:$0xff] %v6906_v58 }
 0x106   :  { %v6908_v21 = vpop.permute.xlu1 %441  ;;  %577 = vrot.lane.b32.xlu0 %v6236_v61, %s6064_s30 }
 0x107   :  { %10964 = vst [vmem:[#allocation111_spill] sm:$0xff] %v6908_v21 }
 0x108   :  { %579 = vrot.lane.b32.xlu1 %v6606_v54, %s6064_s30  ;;  %v6914_v55 = vpop.permute.xlu0 %443 }
 0x109   :  { %10965 = vst [vmem:[#allocation112_spill] sm:$0xff] %v6914_v55 }
 0x10a   :  { %v6916_v45 = vpop.permute.xlu1 %445  ;;  %581 = vrot.lane.b32.xlu0 %v6717_v37, %s6064_s30 }
 0x10b   :  { %10966 = vst [vmem:[#allocation113_spill] sm:$0xff] %v6916_v45  ;;  %v10991_v45 = vmov 0  }
 0x10c   :  { %611 = vrot.lane.b32.xlu1 %v6212_v52, %s6065_s6  ;;  %v6922_v13 = vpop.permute.xlu0 %447 }
 0x10d   :  { %10967 = vst [vmem:[#allocation114_spill] sm:$0xff] %v6922_v13 }
 0x10e   :  { %v6924_v58 = vpop.permute.xlu1 %449  ;;  %613 = vrot.lane.b32.xlu0 %v6198_v46, %s6065_s6 }
 0x10f   :  { %10968 = vst [vmem:[#allocation115_spill] sm:$0xff] %v6924_v58 }
 0x110   :  { %615 = vrot.lane.b32.xlu1 %v6224_v56, %s6065_s6  ;;  %v6930_v21 = vpop.permute.xlu0 %451 }
 0x111   :  { %10969 = vst [vmem:[#allocation116_spill] sm:$0xff] %v6930_v21  ;;  %v10977_v21 = vld [vmem:[#allocation29_spill] sm:$0xff] }
 0x112   :  { %v6932_v55 = vpop.permute.xlu1 %465  ;;  %617 = vrot.lane.b32.xlu0 %v6233_v60, %s6065_s6 }
 0x113   :  { %10970 = vst [vmem:[#allocation117_spill] sm:$0xff] %v6932_v55 }
 0x114   :  { %619 = vrot.lane.b32.xlu1 %v6248_v7, %s6065_s6  ;;  %v6938_v52 = vpop.permute.xlu0 %467 }
 0x115   :  { %10971 = vst [vmem:[#allocation118_spill] sm:$0xff] %v6938_v52  ;;  %v5945_v52 = vld [vmem:[%s10569_s2 + $0x8] sm:$0xff]  }
 0x116   :  { %v6940_v13 = vpop.permute.xlu1 %469  ;;  %621 = vrot.lane.b32.xlu0 %v6262_v17, %s6065_s6 }
 0x117   :  { %10972 = vst [vmem:[#allocation119_spill] sm:$0xff] %v6940_v13  ;;  %v5944_v13 = vld [vmem:[%s10569_s2 + $0x48] sm:$0xff]  }
 0x118   :  { %623 = vrot.lane.b32.xlu1 %v6686_v12, %s6065_s6  ;;  %v6946_v46 = vpop.permute.xlu0 %471 }
 0x119   :  { %10973 = vst [vmem:[#allocation120_spill] sm:$0xff] %v6946_v46 }
 0x11a   :  { %v6948_v56 = vpop.permute.xlu1 %473  ;;  %625 = vrot.lane.b32.xlu0 %v6752_v32, %s6065_s6 }
 0x11b   :  { %10974 = vst [vmem:[#allocation121_spill] sm:$0xff] %v6948_v56 }
 0x11c   :  { %645 = vrot.lane.b32.xlu1 %v6359_v41, %s6066_s8  ;;  %v6954_v60 = vpop.permute.xlu0 %475 }
 0x11d   :  { %10975 = vst [vmem:[#allocation122_spill] sm:$0xff] %v6954_v60 }
 0x11e   :  { %v6956_v7 = vpop.permute.xlu1 %477  ;;  %647 = vrot.lane.b32.xlu0 %v10977_v21, %s6066_s8 }
 0x11f   :  { %10976 = vst [vmem:[#allocation123_spill] sm:$0xff] %v6956_v7 }
 0x120   :  { %649 = vrot.lane.b32.xlu1 %v10945_v2, %s6066_s8  ;;  %v6962_v17 = vpop.permute.xlu0 %479 }
 0x121   :  { %10978 = vst [vmem:[#allocation29_spill] sm:$0xff] %v6962_v17  ;;  %v5947_v17 = vld [vmem:[%s10569_s2 + $0x50] sm:$0xff]  }
 0x122   :  { %v6964_v12 = vpop.permute.xlu1 %481  ;;  %651 = vrot.lane.b32.xlu0 %v10946_v28, %s6066_s8 }
 0x123   :  { %10979 = vst [vmem:[#allocation124_spill] sm:$0xff] %v6964_v12 }
 0x124   :  { %653 = vrot.lane.b32.xlu1 %v10947_v3, %s6066_s8  ;;  %v6970_v32 = vpop.permute.xlu0 %483 }
 0x125   :  { %10980 = vst [vmem:[#allocation125_spill] sm:$0xff] %v6970_v32 }
 0x126   :  { %v6972_v41 = vpop.permute.xlu1 %485  ;;  %655 = vrot.lane.b32.xlu0 %v10948_v33, %s6066_s8 }
 0x127   :  { %10981 = vst [vmem:[#allocation126_spill] sm:$0xff] %v6972_v41 }
 0x128   :  { %657 = vrot.lane.b32.xlu1 %v6760_v16, %s6066_s8  ;;  %v6978_v2 = vpop.permute.xlu0 %487 }
 0x129   :  { %10982 = vst [vmem:[#allocation127_spill] sm:$0xff] %v6978_v2  ;;  %v5940_v2 = vld [vmem:[%s10569_s2 + $0x80] sm:$0xff]  }
 0x12a   :  { %v6980_v58 = vpop.permute.xlu1 %489  ;;  %659 = vrot.lane.b32.xlu0 %v6768_v50, %s6066_s8  ;;  %2389 = vmatpush1.bf16.msra.mxu1 %v5940_v2 }
 0x12b   :  { %10983 = vst [vmem:[#allocation128_spill] sm:$0xff] %v6980_v58  ;;  %2390 = vmatprep.subr.bf16.mxu1 %v10991_v45 }
 0x12c   :  { %683 = vrot.lane.b32.xlu1 %v6443_v1, %s6067_s11  ;;  %v6986_v28 = vpop.permute.xlu0 %491 }
 0x12d   :  { %10984 = vst [vmem:[#allocation129_spill] sm:$0xff] %v6986_v28 }
 0x12e   :  { %v6988_v3 = vpop.permute.xlu1 %493  ;;  %685 = vrot.lane.b32.xlu0 %v6452_v9, %s6067_s11  ;;  %v56_v9 = vld [vmem:[%s10568_s1 + $0x1e] sm:$0x3] }
 0x12f   :  { %10985 = vst [vmem:[#allocation130_spill] sm:$0xff] %v6988_v3 }
 0x130   :  { %687 = vrot.lane.b32.xlu1 %v6461_v39, %s6067_s11  ;;  %v6994_v16 = vpop.permute.xlu0 %5926 }
 0x131   :  { %10986 = vst [vmem:[#allocation131_spill] sm:$0xff] %v6994_v16 }
 0x132   :  { %v6996_v33 = vpop.permute.xlu1 %499  ;;  %689 = vrot.lane.b32.xlu0 %v6471_v18, %s6067_s11 }
 0x133   :  { %10987 = vst [vmem:[#allocation132_spill] sm:$0xff] %v6996_v33  ;;  %v72_v33 = vpack.c.bf16 %v56_v9, %v56_v9  ;;  %v715_v9 = vrot.slane %v6717_v37, 2 }
 0x134   :  { %691 = vrot.lane.b32.xlu1 %v6482_v57, %s6067_s11  ;;  %v7002_v50 = vpop.permute.xlu0 %1216 }
 0x135   :  { %10988 = vst [vmem:[#allocation133_spill] sm:$0xff] %v7002_v50 }
 0x136   :  { %v7004_v32 = vpop.permute.xlu1 %1218  ;;  %693 = vrot.lane.b32.xlu0 %v6489_v25, %s6067_s11 }
 0x138   :  { %695 = vrot.lane.b32.xlu1 %v6774_v8, %s6067_s11  ;;  %v7010_v3 = vpop.permute.xlu0 %1224 }
 0x139   :  { %10989 = vst [vmem:[#allocation134_spill] sm:$0xff] %v7010_v3  ;;  %v5960_v3 = vld [vmem:[%s10569_s2 + $0x30] sm:$0xff]  }
 0x13a   :  { %v7012_v28 = vpop.permute.xlu1 %1226  ;;  %697 = vrot.lane.b32.xlu0 %v6780_v14, %s6067_s11 }
 0x13c   :  { %717 = vrot.lane.b32.xlu1 %v6526_v20, %s6068_s14  ;;  %v7018_v58 = vpop.permute.xlu0 %1232  ;;  %v5941_v20 = vld [vmem:[%s10569_s2 + $0x40] sm:$0xff]  }
 0x13d   :  { %10990 = vst [vmem:[#allocation135_spill] sm:$0xff] %v7018_v58  ;;  %5788 = vmatprep.subr.bf16.mxu0 %v5941_v20 }
 0x13e   :  { %v7023_v41 = vpop.permute.xlu1 %1234  ;;  %719 = vrot.lane.b32.xlu0 %v6531_v29, %s6068_s14  ;;  %v5942_v29 = vld [vmem:[%s10569_s2] sm:$0xff]  }
 0x13f   :  { %5789 = vmatpush3.bf16.msra.mxu0 %v5942_v29 }
 0x140   :  { %721 = vrot.lane.b32.xlu1 %v6536_v34, %s6068_s14  ;;  %v7029_v12 = vpop.permute.xlu0 %1266  ;;  %v5943_v34 = vld [vmem:[%s10569_s2 + $0x88] sm:$0xff]   ;;  %5790 = vmatprep.subr.bf16.mxu0 %v5944_v13  ;;  %v5949_v13 = vld [vmem:[%s10569_s2 + $0x98] sm:$0xff]  }
 0x141   :  { %2391 = vmatpush1.bf16.msra.mxu1 %v5943_v34  ;;  %v106_v34 = vrot.slane %v72_v33, 7 }
 0x142   :  { %v7044_v2 = vpop.permute.xlu1 %1268  ;;  %723 = vrot.lane.b32.xlu0 %v6541_v35, %s6068_s14  ;;  %2392 = vmatprep.subr.bf16.mxu1 %v10991_v45  ;;  %v5946_v35 = vld [vmem:[%s10569_s2 + $0x90] sm:$0xff]  }
 0x143   :  { %5791 = vmatpush3.bf16.msra.mxu0 %v5945_v52 }
 0x144   :  { %725 = vrot.lane.b32.xlu1 %v6546_v59, %s6068_s14  ;;  %v7050_v1 = vpop.permute.xlu0 %1270  ;;  %v10992_v59 = vrot.slane %v6606_v54, 2  ;;  %5792 = vmatprep.subr.bf16.mxu0 %v5947_v17  ;;  %v5952_v17 = vld [vmem:[%s10569_s2 + $0xa0] sm:$0xff]  }
 0x145   :  { %2393 = vmatpush1.bf16.msra.mxu1 %v5946_v35  ;;  %v142_v35 = vsel %vm107_vm0, 0, %v106_v34 }
 0x146   :  { %v7062_v20 = vpop.permute.xlu1 %1272  ;;  %727 = vrot.lane.b32.xlu0 %v6551_v19, %s6068_s14  ;;  %2394 = vmatprep.subr.bf16.mxu1 %v10991_v45  ;;  %v5948_v19 = vld [vmem:[%s10569_s2 + $0x10] sm:$0xff]  }
 0x147   :  { %5793 = vmatpush3.bf16.msra.mxu0 %v5948_v19 }
 0x148   :  { %729 = vrot.lane.b32.xlu1 %v10992_v59, %s6068_s14  ;;  %v7070_v29 = vpop.permute.xlu0 %1274  ;;  %v5950_v59 = vld [vmem:[%s10569_s2 + $0x58] sm:$0xff]  }
 0x149   :  { %10993 = vst [vmem:[#allocation136_spill] sm:$0xff] %v7070_v29  ;;  %2395 = vmatpush1.bf16.msra.mxu1 %v5949_v13  ;;  %5794 = vmatprep.subr.bf16.mxu0 %v5950_v59  ;;  %v5953_v13 = vld [vmem:[%s10569_s2 + $0x60] sm:$0xff]   ;;  %v11012_v29 = vld [vmem:[#allocation17_spill] sm:$0xff] }
 0x14a   :  { %v7082_v52 = vpop.permute.xlu1 %1276  ;;  %731 = vrot.lane.b32.xlu0 %v715_v9, %s6068_s14  ;;  %2396 = vmatprep.subr.bf16.mxu1 %v10991_v45  ;;  %v5951_v9 = vld [vmem:[%s10569_s2 + $0x18] sm:$0xff]   ;;  %v5954_v59 = vld [vmem:[%s10569_s2 + $0x20] sm:$0xff]  }
 0x14b   :  { %10994 = vst [vmem:[#allocation137_spill] sm:$0xff] %v7082_v52  ;;  %5795 = vmatpush3.bf16.msra.mxu0 %v5951_v9  ;;  %v5957_v52 = vld [vmem:[%s10569_s2 + $0x28] sm:$0xff]  }
 0x14c   :  { %501 = vrot.lane.b32.xlu1 %v10977_v21, %s6069_s17  ;;  %v7087_v33 = vpop.permute.xlu0 %1278  ;;  %v7105_v21 = vsel %vm143_vm1, %v142_v35, 0  ;;  %v5955_v35 = vld [vmem:[%s10569_s2 + $0xa8] sm:$0xff]   ;;  %5796 = vmatprep.subr.bf16.mxu0 %v5953_v13  ;;  %v5958_v13 = vld [vmem:[%s10569_s2 + $0xb0] sm:$0xff]  }
 0x14d   :  { %10995 = vst [vmem:[#allocation138_spill] sm:$0xff] %v7087_v33  ;;  %10997 = vst [vmem:[#allocation140_spill] sm:$0xff] %v7105_v21  ;;  %2397 = vmatpush1.bf16.msra.mxu1 %v5952_v17  ;;  %v7126_v17 = vshll.u32 %v7105_v21, 16 }
 0x14e   :  { %v7100_v19 = vpop.permute.xlu1 %1292  ;;  %749 = vrot.lane.b32.xlu0 %v6149_v22, %s6069_s17  ;;  %2398 = vmatprep.subr.bf16.mxu1 %v10991_v45 }
 0x14f   :  { %10996 = vst [vmem:[#allocation139_spill] sm:$0xff] %v7100_v19  ;;  %5797 = vmatpush3.bf16.msra.mxu0 %v5954_v59  ;;  %v5956_v19 = vld [vmem:[%s10569_s2 + $0x68] sm:$0xff]   ;;  %v609_v58 = vrot.slane %v7126_v17, 1 }
 0x150   :  { %751 = vrot.lane.b32.xlu1 %v6160_v31, %s6069_s17  ;;  %v7109_v34 = vpop.permute.xlu0 %1296  ;;  %5798 = vmatprep.subr.bf16.mxu0 %v5956_v19 }
 0x151   :  { %10998 = vst [vmem:[#allocation141_spill] sm:$0xff] %v7109_v34  ;;  %2399 = vmatpush1.bf16.msra.mxu1 %v5955_v35  ;;  %v7147_v35 = vshrl.u32 %v7105_v21, 16 }
 0x152   :  { %v7121_v9 = vpop.permute.xlu1 %503  ;;  %753 = vrot.lane.b32.xlu0 %v6180_v40, %s6069_s17  ;;  %2400 = vmatprep.subr.bf16.mxu1 %v10991_v45 }
 0x153   :  { %10999 = vst [vmem:[#allocation142_spill] sm:$0xff] %v7121_v9  ;;  %5799 = vmatpush3.bf16.msra.mxu0 %v5957_v52  ;;  %v5961_v52 = vld [vmem:[%s10569_s2 + $0xb8] sm:$0xff]  }
 0x154   :  { %755 = vrot.lane.b32.xlu1 %v6202_v48, %s6069_s17  ;;  %v7130_v34 = vpop.permute.xlu0 %505 }
 0x155   :  { %11000 = vst [vmem:[#allocation143_spill] sm:$0xff] %v7130_v34  ;;  %2401 = vmatpush1.bf16.msra.mxu1 %v5958_v13  ;;  %v7169_v13 = vor.u32 %v609_v58, %v7147_v35  ;;  %v7177_v34 = vrot.slane %v6643_v36, 1  ;;  %v5962_v58 = vld [vmem:[%s10569_s2 + $0x78] sm:$0xff]  }
 0x156   :  { %v7142_v59 = vpop.permute.xlu1 %507  ;;  %757 = vrot.lane.b32.xlu0 %v6236_v61, %s6069_s17  ;;  %2402 = vmatprep.subr.bf16.mxu1 %v10991_v45 }
 0x157   :  { %11001 = vst [vmem:[#allocation144_spill] sm:$0xff] %v7142_v59  ;;  %v5959_v59 = vld [vmem:[%s10569_s2 + $0x70] sm:$0xff]   ;;  %11005 = vst [vmem:[#allocation148_spill] sm:$0xff] %v7177_v34 }
 0x158   :  { %759 = vrot.lane.b32.xlu1 %v6606_v54, %s6069_s17  ;;  %v7152_v7 = vpop.permute.xlu0 %509  ;;  %5800 = vmatprep.subr.bf16.mxu0 %v5959_v59  ;;  %v5964_v59 = vld [vmem:[%s10569_s2 + $0xc0] sm:$0xff]  }
 0x159   :  { %11002 = vst [vmem:[#allocation145_spill] sm:$0xff] %v7152_v7  ;;  %5801 = vmatpush3.bf16.msra.mxu0 %v5960_v3  ;;  %v530_v7 = vrot.slane %v6713_v63, 1  ;;  %2403 = vmatpush1.bf16.msra.mxu1 %v5961_v52  ;;  %v5963_v3 = vld [vmem:[%s10569_s2 + $0x38] sm:$0xff]   ;;  %v7195_v52 = vrot.slane %v7105_v21, 1 }
 0x15a   :  { %v7164_v19 = vpop.permute.xlu1 %511  ;;  %761 = vrot.lane.b32.xlu0 %v6717_v37, %s6069_s17  ;;  %2404 = vmatprep.subr.bf16.mxu1 %v10991_v45  ;;  %v681_v45 = vrot.slane %v7126_v17, 2 }
 0x15b   :  { %11003 = vst [vmem:[#allocation146_spill] sm:$0xff] %v7164_v19  ;;  %v531_v19 = vrot.slane %v6701_v53, 2  ;;  %11007 = vst [vmem:[#allocation150_spill] sm:$0xff] %v7195_v52  ;;  %5802 = vmatprep.subr.bf16.mxu0 %v5962_v58  ;;  %v1256_v58 = vrot.slane %v11012_v29, 7 }
 0x15c   :  { %1220 = vrot.lane.b32.xlu1 %v6728_v11, %s6063_s21  ;;  %v7174_v60 = vpop.permute.xlu0 %535  ;;  %v680_v11 = vrot.slane %v7147_v35, 1 }
 0x15d   :  { %11004 = vst [vmem:[#allocation147_spill] sm:$0xff] %v7174_v60  ;;  %5803 = vmatpush3.bf16.msra.mxu0 %v5963_v3  ;;  %v7203_v54 = vor.u32 %v531_v19, %v530_v7  ;;  %2405 = vmatpush1.bf16.msra.mxu1 %v5964_v59  ;;  %v11014_v19 = vld [vmem:[#allocation22_spill] sm:$0xff]  ;;  %v1257_v59 = vor.u32 %v1256_v58, %v6301_v51 }
 0x15e   :  { %v7190_v60 = vpop.permute.xlu1 %537  ;;  %1222 = vrot.lane.b32.xlu0 %v7169_v13, %s6063_s21  ;;  %v7210_v46 = vor.u32 %v681_v45, %v680_v11  ;;  %v11016_v11 = vld [vmem:[#allocation25_spill] sm:$0xff] }
 0x15f   :  { %11006 = vst [vmem:[#allocation149_spill] sm:$0xff] %v7190_v60  ;;  %11009 = vst [vmem:[#allocation152_spill] sm:$0xff] %v7203_v54  ;;  %v11010_v60 = vld [vmem:[#allocation16_spill] sm:$0xff]  ;;  %v1260_v45 = vrot.slane %v11016_v11, 7 }
 0x160   :  { %1228 = vrot.lane.b32.xlu1 %v7177_v34, %s6064_s30  ;;  %v7201_v9 = vpop.permute.xlu0 %539  ;;  %v1254_v50 = vrot.slane %v11010_v60, 7  ;;  %11011 = vst [vmem:[#allocation16_spill] sm:$0xff] %v7210_v46 }
 0x161   :  { %11008 = vst [vmem:[#allocation151_spill] sm:$0xff] %v7201_v9  ;;  %v1258_v9 = vrot.slane %v11014_v19, 7  ;;  %v1264_v19 = vrot.slane %v7147_v35, 7 }
 0x162   :  { %v7206_v56 = vpop.permute.xlu1 %541  ;;  %1230 = vrot.lane.b32.xlu0 %v7195_v52, %s6064_s30  ;;  %v1255_v7 = vor.u32 %v1254_v50, %v6291_v47  ;;  %v1261_v50 = vor.u32 %v1260_v45, %v6340_v15 }
 0x164   :  { %1236 = vrot.lane.b32.xlu1 %v7203_v54, %s6065_s6  ;;  %v7215_v3 = vpop.permute.xlu0 %543  ;;  %v1259_v54 = vor.u32 %v1258_v9, %v6324_v6  ;;  %v1265_v6 = vor.u32 %v1264_v19, %v7126_v17 }
 0x165   :  { %11013 = vst [vmem:[#allocation17_spill] sm:$0xff] %v7215_v3  ;;  %v1262_v3 = vrot.slane %v6713_v63, 7 }
 0x166   :  { %v7219_v60 = vpop.permute.xlu1 %545  ;;  %1238 = vrot.lane.b32.xlu0 %v7210_v46, %s6065_s6 }
 0x167   :  { %11015 = vst [vmem:[#allocation22_spill] sm:$0xff] %v7219_v60  ;;  %v1263_v58 = vor.u32 %v1262_v3, %v6701_v53  ;;  %v11024_v53 = vld [vmem:[#allocation36_spill] sm:$0xff]  ;;  %v11027_v3 = vld [vmem:[#allocation37_spill] sm:$0xff] }
 0x168   :  { %1280 = vrot.lane.b32.xlu1 %v1255_v7, %s6066_s8  ;;  %v7226_v29 = vpop.permute.xlu0 %547 }
 0x169   :  { %11017 = vst [vmem:[#allocation25_spill] sm:$0xff] %v7226_v29 }
 0x16a   :  { %v7230_v47 = vpop.permute.xlu1 %549  ;;  %1282 = vrot.lane.b32.xlu0 %v1257_v59, %s6066_s8 }
 0x16b   :  { %11018 = vst [vmem:[#allocation153_spill] sm:$0xff] %v7230_v47  ;;  %v11068_v47 = vld [vmem:[#allocation15_spill] sm:$0xff] }
 0x16c   :  { %1284 = vrot.lane.b32.xlu1 %v1259_v54, %s6066_s8  ;;  %v7236_v51 = vpop.permute.xlu0 %1300 }
 0x16e   :  { %v7239_v7 = vpop.permute.xlu1 %567  ;;  %1286 = vrot.lane.b32.xlu0 %v1261_v50, %s6066_s8 }
 0x16f   :  { %11019 = vst [vmem:[#allocation154_spill] sm:$0xff] %v7239_v7  ;;  %v1463_v7 = vshll.u32 %v6774_v8, 16 }
 0x170   :  { %1288 = vrot.lane.b32.xlu1 %v1263_v58, %s6066_s8  ;;  %v7244_v63 = vpop.permute.xlu0 %569 }
 0x171   :  { %11020 = vst [vmem:[#allocation155_spill] sm:$0xff] %v7244_v63 }
 0x172   :  { %v7246_v9 = vpop.permute.xlu1 %571  ;;  %1290 = vrot.lane.b32.xlu0 %v1265_v6, %s6066_s8 }
 0x173   :  { %11021 = vst [vmem:[#allocation156_spill] sm:$0xff] %v7246_v9  ;;  %v11067_v9 = vld [vmem:[#allocation92_spill] sm:$0xff] }
 0x174   :  { %1294 = vrot.lane.b32.xlu1 %v7105_v21, %s6067_s11  ;;  %v7251_v15 = vpop.permute.xlu0 %573 }
 0x175   :  { %11022 = vst [vmem:[#allocation157_spill] sm:$0xff] %v7251_v15  ;;  %v11062_v15 = vld [vmem:[#allocation88_spill] sm:$0xff] }
 0x176   :  { %v7253_v54 = vpop.permute.xlu1 %575  ;;  %1298 = vrot.lane.b32.xlu0 %v7169_v13, %s6068_s14 }
 0x177   :  { %11023 = vst [vmem:[#allocation158_spill] sm:$0xff] %v7253_v54  ;;  %v6070_v54 = vmov 1966171168  }
 0x178   :  { %517 = vrot.lane.b32.xlu1 %v11024_v53, %s6069_s17  ;;  %v7259_v17 = vpop.permute.xlu0 %577 }
 0x179   :  { %11025 = vst [vmem:[#allocation36_spill] sm:$0xff] %v7259_v17  ;;  %v11051_v17 = vld [vmem:[#allocation74_spill] sm:$0xff] }
 0x17a   :  { %v7261_v35 = vpop.permute.xlu1 %579  ;;  %519 = vrot.lane.b32.xlu0 %v11027_v3, %s6069_s17 }
 0x17b   :  { %11026 = vst [vmem:[#allocation159_spill] sm:$0xff] %v7261_v35 }
 0x17c   :  { %521 = vrot.lane.b32.xlu1 %v6417_v43, %s6069_s17  ;;  %v7267_v59 = vpop.permute.xlu0 %581 }
 0x17d   :  { %11028 = vst [vmem:[#allocation37_spill] sm:$0xff] %v7267_v59  ;;  %v11061_v59 = vld [vmem:[#allocation87_spill] sm:$0xff] }
 0x17e   :  { %v7269_v11 = vpop.permute.xlu1 %611  ;;  %523 = vrot.lane.b32.xlu0 %v6420_v49, %s6069_s17 }
 0x17f   :  { %11029 = vst [vmem:[#allocation160_spill] sm:$0xff] %v7269_v11  ;;  %v11056_v11 = vld [vmem:[#allocation76_spill] sm:$0xff] }
 0x180   :  { %525 = vrot.lane.b32.xlu1 %v7177_v34, %s6069_s17  ;;  %v7275_v45 = vpop.permute.xlu0 %613 }
 0x181   :  { %11030 = vst [vmem:[#allocation161_spill] sm:$0xff] %v7275_v45 }
 0x182   :  { %v7277_v50 = vpop.permute.xlu1 %615  ;;  %551 = vrot.lane.b32.xlu0 %v6556_v0, %s6063_s21  ;;  %v10692_v0 = vrot.slane %v6643_v36, 2 }
 0x183   :  { %11031 = vst [vmem:[#allocation162_spill] sm:$0xff] %v7277_v50  ;;  %v11036_v50 = vld [vmem:[#allocation55_spill] sm:$0xff] }
 0x184   :  { %553 = vrot.lane.b32.xlu1 %v6561_v5, %s6063_s21  ;;  %v7283_v19 = vpop.permute.xlu0 %617  ;;  %v11037_v5 = vld [vmem:[#allocation56_spill] sm:$0xff] }
 0x185   :  { %11032 = vst [vmem:[#allocation163_spill] sm:$0xff] %v7283_v19 }
 0x186   :  { %v7285_v58 = vpop.permute.xlu1 %619  ;;  %555 = vrot.lane.b32.xlu0 %v6566_v27, %s6063_s21  ;;  %v11041_v27 = vld [vmem:[#allocation8_spill] sm:$0xff] }
 0x187   :  { %11033 = vst [vmem:[#allocation164_spill] sm:$0xff] %v7285_v58 }
 0x188   :  { %557 = vrot.lane.b32.xlu1 %v6571_v44, %s6063_s21  ;;  %v7291_v6 = vpop.permute.xlu0 %621  ;;  %v11040_v44 = vld [vmem:[#allocation57_spill] sm:$0xff] }
 0x189   :  { %11034 = vst [vmem:[#allocation165_spill] sm:$0xff] %v7291_v6 }
 0x18a   :  { %v7293_v46 = vpop.permute.xlu1 %623  ;;  %559 = vrot.lane.b32.xlu0 %v11036_v50, %s6063_s21  ;;  %v781_v50 = vsel %vm779_vm2, %v11041_v27, %v11040_v44  ;;  %v11047_v27 = vld [vmem:[#allocation63_spill] sm:$0xff] }
 0x18b   :  { %11035 = vst [vmem:[#allocation166_spill] sm:$0xff] %v7293_v46  ;;  %v11042_v46 = vld [vmem:[#allocation59_spill] sm:$0xff] }
 0x18c   :  { %561 = vrot.lane.b32.xlu1 %v11037_v5, %s6063_s21  ;;  %v7300_v19 = vpop.permute.xlu0 %625  ;;  %v785_v6 = vsel %vm779_vm2, %v6149_v22, %v11042_v46  ;;  %v11043_v5 = vld [vmem:[#allocation60_spill] sm:$0xff]  ;;  %v791_v22 = vsel %vm779_vm2, %v6202_v48, %v11047_v27  ;;  %v1415_v27 = vshll.u32 %v6461_v39, 16 }
 0x18d   :  { %11038 = vst [vmem:[#allocation167_spill] sm:$0xff] %v7300_v19  ;;  %v783_v45 = vsel %vm779_vm2, %v6157_v30, %v11043_v5  ;;  %v11048_v46 = vld [vmem:[#allocation64_spill] sm:$0xff] }
 0x18e   :  { %v7302_v58 = vpop.permute.xlu1 %645  ;;  %563 = vrot.lane.b32.xlu0 %v10692_v0, %s6063_s21  ;;  %v11045_v0 = vld [vmem:[#allocation61_spill] sm:$0xff]  ;;  %v793_v30 = vsel %vm779_vm2, %v6236_v61, %v11048_v46  ;;  %v11049_v5 = vld [vmem:[#allocation72_spill] sm:$0xff]  ;;  %v11055_v61 = vld [vmem:[#allocation39_spill] sm:$0xff] }
 0x18f   :  { %11039 = vst [vmem:[#allocation168_spill] sm:$0xff] %v7302_v58  ;;  %v787_v34 = vsel %vm779_vm2, %v6160_v31, %v11045_v0  ;;  %v11046_v58 = vld [vmem:[#allocation62_spill] sm:$0xff]  ;;  %v812_v31 = vsel %vm806_vm3, %v785_v6, %v11051_v17  ;;  %v11052_v0 = vld [vmem:[#allocation75_spill] sm:$0xff]  ;;  %v11054_v48 = vld [vmem:[#allocation12_spill] sm:$0xff]  ;;  %v1488_v46 = vshll.u32 %v11055_v61, 16 }
 0x190   :  { %1302 = vrot.lane.b32.xlu1 %v7195_v52, %s6069_s17  ;;  %v7318_v35 = vpop.permute.xlu0 %647  ;;  %v789_v44 = vsel %vm779_vm2, %v6180_v40, %v11046_v58  ;;  %v808_v52 = vsel %vm806_vm3, %v781_v50, %v11049_v5  ;;  %v814_v40 = vsel %vm806_vm3, %v787_v34, %v11052_v0  ;;  %v1611_v50 = vunpack.c.l.s4 %v6070_v54  ;;  %v11058_v6 = vld [vmem:[#allocation78_spill] sm:$0xff] }
 0x191   :  { %11044 = vst [vmem:[#allocation57_spill] sm:$0xff] %v7318_v35  ;;  %v11050_v35 = vld [vmem:[#allocation73_spill] sm:$0xff]  ;;  %v1613_v5 = vlaneseq  ;;  %v820_v34 = vsel %vm806_vm3, %v793_v30, %v11058_v6  ;;  %v1427_v0 = vshll.u32 %v6471_v18, 16  ;;  %v835_v54 = vsel %vm833_vm4, %v808_v52, %v11061_v59  ;;  %v11066_v52 = vld [vmem:[#allocation14_spill] sm:$0xff] }
 0x192   :  { %v810_v19 = vsel %vm806_vm3, %v783_v45, %v11050_v35  ;;  %v7340_v58 = vpop.permute.xlu1 %649  ;;  %583 = vrot.lane.b32.xlu0 %v11054_v48, %s6064_s30  ;;  %v816_v35 = vsel %vm806_vm3, %v789_v44, %v11056_v11  ;;  %v11057_v45 = vld [vmem:[#allocation77_spill] sm:$0xff]  ;;  %v1413_v30 = vshrl.u32 %v6461_v39, 16  ;;  %v1439_v6 = vshll.u32 %v6482_v57, 16 }
 0x193   :  { %11053 = vst [vmem:[#allocation59_spill] sm:$0xff] %v7340_v58  ;;  %v818_v17 = vsel %vm806_vm3, %v791_v22, %v11057_v45  ;;  %v11059_v48 = vld [vmem:[#allocation13_spill] sm:$0xff]  ;;  %v837_v49 = vsel %vm833_vm4, %v810_v19, %v11062_v15  ;;  %v11064_v22 = vld [vmem:[#allocation90_spill] sm:$0xff]  ;;  %v1486_v15 = vshrl.u32 %v11055_v61, 16  ;;  %v1417_v59 = vrot.slane %v1415_v27, 1 }
 0x194   :  { %585 = vrot.lane.b32.xlu1 %v11059_v48, %s6064_s30  ;;  %v7355_v58 = vpop.permute.xlu0 %651  ;;  %v11063_v11 = vld [vmem:[#allocation89_spill] sm:$0xff]  ;;  %v841_v45 = vsel %vm833_vm4, %v814_v40, %v11064_v22  ;;  %v1451_v48 = vshll.u32 %v6489_v25, 16  ;;  %v1490_v19 = vrot.slane %v1488_v46, 1  ;;  %v843_v40 = vsel %vm833_vm4, %v816_v35, %v11067_v9  ;;  %v11071_v27 = vld [vmem:[#allocation94_spill] sm:$0xff] }
 0x195   :  { %11060 = vst [vmem:[#allocation60_spill] sm:$0xff] %v7355_v58  ;;  %v839_v44 = vsel %vm833_vm4, %v812_v31, %v11063_v11  ;;  %v1612_v31 = vunpack.c.0.s8 %v1611_v50  ;;  %v1614_v11 = vshrl.u32 %v1613_v5, 7  ;;  %v1425_v22 = vshrl.u32 %v6471_v18, 16 }
 0x196   :  { %v7368_v58 = vpop.permute.xlu1 %653  ;;  %587 = vrot.lane.b32.xlu0 %v11066_v52, %s6064_s30  ;;  %v1429_v63 = vrot.slane %v1427_v0, 1  ;;  %v11070_v52 = vld [vmem:[#allocation93_spill] sm:$0xff]  ;;  %v847_v46 = vsel %vm833_vm4, %v820_v34, %v11071_v27  ;;  %v1437_v50 = vshrl.u32 %v6482_v57, 16  ;;  %v1476_v9 = vshll.u32 %v6780_v14, 16 }
 0x197   :  { %11065 = vst [vmem:[#allocation61_spill] sm:$0xff] %v7368_v58  ;;  %v845_v29 = vsel %vm833_vm4, %v818_v17, %v11070_v52  ;;  %v1307_v5 = vsel %vm779_vm2, %v6717_v37, %v7004_v32  ;;  %v1441_v35 = vrot.slane %v1439_v6, 1  ;;  %v1449_v0 = vshrl.u32 %v6489_v25, 16  ;;  %v11073_v17 = vld [vmem:[#allocation20_spill] sm:$0xff] }
 0x198   :  { %589 = vrot.lane.b32.xlu1 %v11068_v47, %s6064_s30  ;;  %v7379_v58 = vpop.permute.xlu0 %655  ;;  %v1453_v47 = vrot.slane %v1451_v48, 1  ;;  %v7397_v34 = vsel %vm860_vm5, %v835_v54, %v6818_v62  ;;  %v7399_v52 = vor.u32 %v1417_v59, %v1413_v30  ;;  %v7401_v27 = vor.u32 %v1490_v19, %v1486_v15 }
 0x199   :  { %11069 = vst [vmem:[#allocation62_spill] sm:$0xff] %v7379_v58  ;;  %11074 = vst [vmem:[#allocation64_spill] sm:$0xff] %v7397_v34  ;;  %v7403_v57 = vsub.s32 %v1612_v31, %v1614_v11  ;;  %v1342_v37 = vsel %vm860_vm5, %v835_v54, %v7087_v33  ;;  %v7407_v32 = vor.u32 %v1429_v63, %v1425_v22  ;;  %v1461_v48 = vshrl.u32 %v6774_v8, 16 }
 0x19a   :  { %v7391_v58 = vpop.permute.xlu1 %657  ;;  %591 = vrot.lane.b32.xlu0 %v11073_v17, %s6064_s30  ;;  %11075 = vst [vmem:[#allocation72_spill] sm:$0xff] %v7401_v27  ;;  %v1465_v6 = vrot.slane %v1463_v7, 1  ;;  %v11077_v17 = vld [vmem:[#allocation24_spill] sm:$0xff]  ;;  %v864_v30 = vsel %vm860_vm5, %v837_v49, %v6824_v4  ;;  %v1315_v15 = vsel %vm806_vm3, %v1307_v5, %v7012_v28  ;;  %v1474_v59 = vshrl.u32 %v6780_v14, 16 }
 0x19b   :  { %11072 = vst [vmem:[#allocation63_spill] sm:$0xff] %v7391_v58  ;;  %11076 = vst [vmem:[#allocation73_spill] sm:$0xff] %v7403_v57  ;;  %v1478_v19 = vrot.slane %v1476_v9, 1  ;;  %v866_v63 = vsel %vm860_vm5, %v839_v44, %v6826_v26  ;;  %v1323_v7 = vsel %vm833_vm4, %v1315_v15, %v7023_v41  ;;  %v7423_v54 = vor.u32 %v1441_v35, %v1437_v50  ;;  %v11106_v58 = vld [vmem:[#allocation135_spill] sm:$0xff] }
 0x19c   :  { %593 = vrot.lane.b32.xlu1 %v11077_v17, %s6064_s30  ;;  %v7412_v62 = vpop.permute.xlu0 %659  ;;  %v7425_v31 = vor.u32 %v1453_v47, %v1449_v0  ;;  %v1329_v49 = vsel %vm860_vm5, %v839_v44, %v7029_v12  ;;  %v1331_v14 = vsel %vm860_vm5, %v841_v45, %v7044_v2  ;;  %v1341_v4 = vsel %vm860_vm5, %v1323_v7, %v7087_v33  ;;  %v11087_v0 = vld [vmem:[#allocation107_spill] sm:$0xff]  ;;  %v11102_v17 = vld [vmem:[#allocation134_spill] sm:$0xff] }
 0x19d   :  { %11078 = vst [vmem:[#allocation74_spill] sm:$0xff] %v7412_v62  ;;  %v1364_v26 = vsel %vm887_vm6, %v1342_v37, %v6872_v42  ;;  %v868_v41 = vsel %vm860_vm5, %v841_v45, %v6832_v24  ;;  %v870_v28 = vsel %vm860_vm5, %v843_v40, %v6834_v23  ;;  %v1333_v47 = vsel %vm860_vm5, %v843_v40, %v7050_v1  ;;  %v11082_v45 = vld [vmem:[#allocation105_spill] sm:$0xff]  ;;  %v11083_v40 = vld [vmem:[#allocation106_spill] sm:$0xff] }
 0x19e   :  { %v7427_v11 = vpop.permute.xlu1 %683  ;;  %595 = vrot.lane.b32.xlu0 %v6643_v36, %s6064_s30  ;;  %v7445_v22 = vor.u32 %v1465_v6, %v1461_v48  ;;  %v872_v2 = vsel %vm860_vm5, %v845_v29, %v6840_v38  ;;  %v874_v44 = vsel %vm860_vm5, %v847_v46, %v6842_v10  ;;  %v1335_v24 = vsel %vm860_vm5, %v845_v29, %v7062_v20  ;;  %v11085_v10 = vld [vmem:[#allocation18_spill] sm:$0xff]  ;;  %v11086_v20 = vld [vmem:[#allocation103_spill] sm:$0xff]  ;;  %v11088_v6 = vld [vmem:[#allocation104_spill] sm:$0xff] }
 0x19f   :  { %11079 = vst [vmem:[#allocation75_spill] sm:$0xff] %v7427_v11  ;;  %v7457_v23 = vor.u32 %v1478_v19, %v1474_v59  ;;  %v1356_v1 = vsel %vm887_vm6, %v1329_v49, %v11082_v45  ;;  %v1357_v50 = vsel %vm887_vm6, %v1331_v14, %v11083_v40  ;;  %v1363_v9 = vsel %vm887_vm6, %v1341_v4, %v6872_v42  ;;  %v11089_v19 = vld [vmem:[#allocation108_spill] sm:$0xff]  ;;  %v11091_v4 = vld [vmem:[#allocation19_spill] sm:$0xff]  ;;  %v11103_v36 = vld [vmem:[#allocation109_spill] sm:$0xff] }
 0x1a0   :  { %597 = vrot.lane.b32.xlu1 %v7105_v21, %s6064_s30  ;;  %v7449_v12 = vpop.permute.xlu0 %685  ;;  %v1381_v38 = vsel %vm918_vm7, %v1364_v26, %v6932_v55  ;;  %v891_v29 = vsel %vm887_vm6, %v7397_v34, %v11086_v20  ;;  %v7475_v35 = vunpack.i.l.bf16 %v6994_v16  ;;  %v1358_v37 = vsel %vm887_vm6, %v1333_v47, %v11087_v0  ;;  %v11090_v49 = vld [vmem:[#allocation136_spill] sm:$0xff]  ;;  %v11095_v20 = vld [vmem:[#allocation133_spill] sm:$0xff]  ;;  %v11105_v21 = vld [vmem:[#allocation123_spill] sm:$0xff] }
 0x1a1   :  { %11080 = vst [vmem:[#allocation76_spill] sm:$0xff] %v7449_v12  ;;  %11081 = vst [vmem:[#allocation77_spill] sm:$0xff] %v7457_v23  ;;  %v889_v48 = vsel %vm887_vm6, %v7397_v34, %v6872_v42  ;;  %v893_v15 = vsel %vm887_vm6, %v864_v30, %v11088_v6  ;;  %v895_v59 = vsel %vm887_vm6, %v866_v63, %v11082_v45  ;;  %v11094_v45 = vld [vmem:[#allocation121_spill] sm:$0xff]  ;;  %v11096_v6 = vld [vmem:[#allocation58_spill] sm:$0xff] }
 0x1a2   :  { %v7467_v5 = vpop.permute.xlu1 %687  ;;  %627 = vrot.lane.b32.xlu0 %v11085_v10, %s6065_s6  ;;  %v1359_v7 = vsel %vm887_vm6, %v1335_v24, %v11089_v19  ;;  %v1337_v14 = vsel %vm860_vm5, %v847_v46, %v11090_v49  ;;  %v1380_v47 = vsel %vm918_vm7, %v1363_v9, %v6932_v55  ;;  %v1398_v30 = vsel %vm949_vm8, %v1381_v38, %v7475_v35  ;;  %v11093_v10 = vld [vmem:[#allocation120_spill] sm:$0xff]  ;;  %v11097_v49 = vld [vmem:[#allocation142_spill] sm:$0xff]  ;;  %v11098_v42 = vld [vmem:[#allocation143_spill] sm:$0xff] }
 0x1a3   :  { %11084 = vst [vmem:[#allocation78_spill] sm:$0xff] %v7467_v5  ;;  %v1373_v63 = vsel %vm918_vm7, %v1356_v1, %v11093_v10  ;;  %v1374_v24 = vsel %vm918_vm7, %v1357_v50, %v11094_v45  ;;  %v1305_v46 = vsel %vm779_vm2, %v11096_v6, %v11095_v20  ;;  %v11099_v9 = vld [vmem:[#allocation122_spill] sm:$0xff]  ;;  %v11101_v1 = vld [vmem:[#allocation21_spill] sm:$0xff]  ;;  %v1360_v20 = vsel %vm887_vm6, %v1337_v14, %v11103_v36  ;;  %v11104_v6 = vld [vmem:[#allocation144_spill] sm:$0xff] }
 0x1a4   :  { %629 = vrot.lane.b32.xlu1 %v11091_v4, %s6065_s6  ;;  %v7492_v26 = vpop.permute.xlu0 %689  ;;  %v1390_v4 = vsel %vm949_vm8, %v1373_v63, %v11097_v49  ;;  %v1391_v34 = vsel %vm949_vm8, %v1374_v24, %v11098_v42  ;;  %v1375_v33 = vsel %vm918_vm7, %v1358_v37, %v11099_v9  ;;  %v1313_v50 = vsel %vm806_vm3, %v1305_v46, %v11102_v17  ;;  %v11108_v17 = vld [vmem:[#allocation23_spill] sm:$0xff]  ;;  %v11110_v46 = vld [vmem:[#allocation137_spill] sm:$0xff] }
 0x1a5   :  { %11092 = vst [vmem:[#allocation87_spill] sm:$0xff] %v7492_v26  ;;  %v1392_v63 = vsel %vm949_vm8, %v1375_v33, %v11104_v6  ;;  %v1376_v24 = vsel %vm918_vm7, %v1359_v7, %v11105_v21  ;;  %v1321_v37 = vsel %vm833_vm4, %v1313_v50, %v11106_v58  ;;  %v1494_v26 = vshll.u32 %v1398_v30, 16  ;;  %v11111_v50 = vld [vmem:[#allocation139_spill] sm:$0xff]  ;;  %v11112_v62 = vld [vmem:[#allocation29_spill] sm:$0xff] }
 0x1a6   :  { %v7511_v38 = vpop.permute.xlu1 %691  ;;  %631 = vrot.lane.b32.xlu0 %v11101_v1, %s6065_s6  ;;  %v11107_v1 = vld [vmem:[#allocation145_spill] sm:$0xff]  ;;  %v897_v33 = vsel %vm887_vm6, %v868_v41, %v11083_v40  ;;  %v1339_v7 = vsel %vm860_vm5, %v1321_v37, %v11110_v46  ;;  %v1409_v12 = vshll.u32 %v1390_v4, 16  ;;  %v1421_v58 = vshll.u32 %v1391_v34, 16  ;;  %v11115_v46 = vld [vmem:[#allocation146_spill] sm:$0xff] }
 0x1a7   :  { %11100 = vst [vmem:[#allocation88_spill] sm:$0xff] %v7511_v38  ;;  %v1397_v38 = vsel %vm949_vm8, %v1380_v47, %v7475_v35  ;;  %v1393_v5 = vsel %vm949_vm8, %v1376_v24, %v11107_v1  ;;  %v899_v47 = vsel %vm887_vm6, %v870_v28, %v11087_v0  ;;  %v1362_v11 = vsel %vm887_vm6, %v1339_v7, %v11111_v50  ;;  %v11116_v7 = vld [vmem:[#allocation118_spill] sm:$0xff] }
 0x1a8   :  { %633 = vrot.lane.b32.xlu1 %v11108_v17, %s6065_s6  ;;  %v7531_v14 = vpop.permute.xlu0 %693  ;;  %v1433_v24 = vshll.u32 %v1392_v63, 16  ;;  %v1377_v17 = vsel %vm918_vm7, %v1360_v20, %v11112_v62  ;;  %v901_v41 = vsel %vm887_vm6, %v872_v2, %v11089_v19  ;;  %v1482_v40 = vshll.u32 %v1397_v38, 16  ;;  %v11119_v19 = vld [vmem:[#allocation119_spill] sm:$0xff] }
 0x1a9   :  { %11109 = vst [vmem:[#allocation89_spill] sm:$0xff] %v7531_v14  ;;  %v11114_v14 = vld [vmem:[#allocation26_spill] sm:$0xff]  ;;  %v1445_v37 = vshll.u32 %v1393_v5, 16  ;;  %v1394_v28 = vsel %vm949_vm8, %v1377_v17, %v11115_v46  ;;  %v903_v0 = vsel %vm887_vm6, %v874_v44, %v11103_v36  ;;  %v922_v50 = vsel %vm918_vm7, %v891_v29, %v11116_v7  ;;  %v11121_v17 = vld [vmem:[#allocation141_spill] sm:$0xff] }
 0x1aa   :  { %v7543_v23 = vpop.permute.xlu1 %695  ;;  %635 = vrot.lane.b32.xlu0 %v11114_v14, %s6065_s6  ;;  %v1496_v20 = vrot.slane %v1494_v26, 1  ;;  %v920_v2 = vsel %vm918_vm7, %v889_v48, %v6932_v55  ;;  %v7563_v14 = vsel %vm918_vm7, %v893_v15, %v11119_v19  ;;  %v1379_v25 = vsel %vm918_vm7, %v1362_v11, %v11121_v17 }
 0x1ab   :  { %11113 = vst [vmem:[#allocation90_spill] sm:$0xff] %v7543_v23  ;;  %v11117_v23 = vld [vmem:[#allocation27_spill] sm:$0xff]  ;;  %11120 = vst [vmem:[#allocation93_spill] sm:$0xff] %v7563_v14  ;;  %v1411_v36 = vrot.slane %v1409_v12, 1  ;;  %v1423_v44 = vrot.slane %v1421_v58, 1  ;;  %v1492_v60 = vshrl.u32 %v1398_v30, 16  ;;  %v926_v11 = vsel %vm918_vm7, %v895_v59, %v11093_v10 }
 0x1ac   :  { %637 = vrot.lane.b32.xlu1 %v11117_v23, %s6065_s6  ;;  %v7557_v8 = vpop.permute.xlu0 %697  ;;  %v1435_v29 = vrot.slane %v1433_v24, 1  ;;  %v1457_v26 = vshll.u32 %v1394_v28, 16  ;;  %v1396_v23 = vsel %vm949_vm8, %v1379_v25, %v7236_v51  ;;  %v1484_v48 = vrot.slane %v1482_v40, 1 }
 0x1ad   :  { %11118 = vst [vmem:[#allocation92_spill] sm:$0xff] %v7557_v8  ;;  %v11122_v8 = vld [vmem:[#allocation82_spill] sm:$0xff]  ;;  %v1407_v55 = vshrl.u32 %v1390_v4, 16  ;;  %v1419_v15 = vshrl.u32 %v1391_v34, 16  ;;  %v1447_v19 = vrot.slane %v1445_v37, 1  ;;  %v1480_v12 = vshrl.u32 %v1397_v38, 16 }
 0x1ae   :  { %v7569_v7 = vpop.permute.xlu1 %717  ;;  %639 = vrot.lane.b32.xlu0 %v11122_v8, %s6065_s6  ;;  %v1431_v58 = vshrl.u32 %v1392_v63, 16  ;;  %v1497_v25 = vor.u32 %v1496_v20, %v1492_v60  ;;  %v1443_v17 = vshrl.u32 %v1393_v5, 16  ;;  %v1469_v14 = vshll.u32 %v1396_v23, 16  ;;  %v11123_v38 = vld [vmem:[#allocation34_spill] sm:$0xff]  ;;  %v11124_v63 = vld [vmem:[#allocation132_spill] sm:$0xff] }
 0x1af   :  { %v1412_v51 = vor.u32 %v1411_v36, %v1407_v55  ;;  %v1424_v24 = vor.u32 %v1423_v44, %v1419_v15  ;;  %v928_v8 = vsel %vm918_vm7, %v897_v33, %v11094_v45  ;;  %v930_v34 = vsel %vm918_vm7, %v899_v47, %v11099_v9  ;;  %v11125_v47 = vld [vmem:[#allocation35_spill] sm:$0xff] }
 0x1b0   :  { %641 = vrot.lane.b32.xlu1 %v7169_v13, %s6065_s6  ;;  %v7577_v30 = vpop.permute.xlu0 %719  ;;  %v1436_v4 = vor.u32 %v1435_v29, %v1431_v58  ;;  %v1459_v59 = vrot.slane %v1457_v26, 1  ;;  %v932_v13 = vsel %vm918_vm7, %v901_v41, %v11105_v21  ;;  %v934_v55 = vsel %vm918_vm7, %v903_v0, %v11112_v62  ;;  %v11127_v44 = vld [vmem:[#allocation147_spill] sm:$0xff]  ;;  %v11130_v29 = vld [vmem:[#allocation149_spill] sm:$0xff] }
 0x1b1   :  { %v1448_v60 = vor.u32 %v1447_v19, %v1443_v17  ;;  %v7591_v5 = vor.u32 %v1484_v48, %v1480_v12  ;;  %v10708_v45 = vunpack.i.h.bf16 %v6994_v16  ;;  %v7596_v9 = vsel %vm949_vm8, %v922_v50, %v11124_v63  ;;  %v11132_v15 = vld [vmem:[#allocation151_spill] sm:$0xff]  ;;  %v11133_v19 = vld [vmem:[#allocation41_spill] sm:$0xff]  ;;  %v11135_v17 = vld [vmem:[#allocation22_spill] sm:$0xff] }
 0x1b2   :  { %v7583_v10 = vpop.permute.xlu1 %721  ;;  %661 = vrot.lane.b32.xlu0 %v11123_v38, %s6066_s8  ;;  %v1455_v33 = vshrl.u32 %v1394_v28, 16  ;;  %v1777_v21 = vcombine.low %v1497_v25, %v7401_v27  ;;  %v1609_v41 = vcombine.low %v1412_v51, %v7399_v52  ;;  %v1633_v62 = vcombine.low %v1424_v24, %v7407_v32  ;;  %v11134_v51 = vld [vmem:[#allocation17_spill] sm:$0xff] }
 0x1b3   :  { %v1471_v37 = vrot.slane %v1469_v14, 1  ;;  %v7607_v0 = vsel %vm949_vm8, %v920_v2, %v7475_v35  ;;  %v7611_v50 = vsel %vm949_vm8, %v926_v11, %v11097_v49  ;;  %v7615_v28 = vsel %vm949_vm8, %v928_v8, %v11098_v42  ;;  %v11136_v8 = vld [vmem:[#allocation42_spill] sm:$0xff] }
 0x1b4   :  { %663 = vrot.lane.b32.xlu1 %v11125_v47, %s6066_s8  ;;  %v7600_v40 = vpop.permute.xlu0 %723  ;;  %11126 = vst [vmem:[#allocation94_spill] sm:$0xff] %v7607_v0  ;;  %v1657_v20 = vcombine.low %v1436_v4, %v7423_v54  ;;  %v7618_v36 = vor.u32 %v1459_v59, %v1455_v33  ;;  %v7626_v32 = vsel %vm949_vm8, %v930_v34, %v11104_v6  ;;  %v1467_v2 = vshrl.u32 %v1396_v23, 16  ;;  %v11137_v4 = vld [vmem:[#allocation25_spill] sm:$0xff]  ;;  %v11138_v59 = vld [vmem:[#allocation43_spill] sm:$0xff] }
 0x1b5   :  { %v1681_v49 = vcombine.low %v1448_v60, %v7425_v31  ;;  %v1753_v42 = vcombine.low %v7591_v5, %v7401_v27  ;;  %v7633_v54 = vsel %vm949_vm8, %v932_v13, %v11107_v1  ;;  %v7637_v14 = vsel %vm949_vm8, %v934_v55, %v11115_v46  ;;  %v11131_v1 = vld [vmem:[#allocation40_spill] sm:$0xff]  ;;  %v11139_v13 = vld [vmem:[#allocation153_spill] sm:$0xff]  ;;  %v11141_v60 = vld [vmem:[#allocation154_spill] sm:$0xff] }
 0x1b6   :  { %v7620_v52 = vpop.permute.xlu1 %725  ;;  %665 = vrot.lane.b32.xlu0 %v11024_v53, %s6066_s8  ;;  %v7642_v53 = vsel %vm779_vm2, %v11055_v61, %v11127_v44  ;;  %v7649_v6 = vrot.slane %v1777_v21, %v7403_v57  ;;  %v985_v26 = vsel %vm779_vm2, %v11131_v1, %v11130_v29  ;;  %v7654_v23 = vor.u32 %v1471_v37, %v1467_v2  ;;  %v11143_v21 = vld [vmem:[#allocation156_spill] sm:$0xff]  ;;  %v11146_v2 = vld [vmem:[#allocation157_spill] sm:$0xff]  ;;  %v11186_v5 = vld [vmem:[#allocation51_spill] sm:$0xff] }
 0x1b7   :  { %11128 = vst [vmem:[#allocation105_spill] sm:$0xff] %v7642_v53  ;;  %v7657_v46 = vrot.slane %v1609_v41, %v7403_v57  ;;  %v7660_v48 = vrot.slane %v1633_v62, %v7403_v57  ;;  %v988_v11 = vsel %vm779_vm2, %v11133_v19, %v11132_v15  ;;  %v991_v12 = vsel %vm779_vm2, %v6461_v39, %v7206_v56  ;;  %v11144_v62 = vld [vmem:[#allocation38_spill] sm:$0xff]  ;;  %v11147_v29 = vld [vmem:[#allocation37_spill] sm:$0xff]  ;;  %v11148_v15 = vld [vmem:[#allocation160_spill] sm:$0xff] }
 0x1b8   :  { %667 = vrot.lane.b32.xlu1 %v11027_v3, %s6066_s8  ;;  %v7646_v31 = vpop.permute.xlu0 %727  ;;  %11129 = vst [vmem:[#allocation106_spill] sm:$0xff] %v7649_v6  ;;  %v1705_v3 = vcombine.low %v7618_v36, %v7445_v22  ;;  %v7675_v25 = vrot.slane %v1657_v20, %v7403_v57  ;;  %v994_v24 = vsel %vm779_vm2, %v6471_v18, %v11134_v51  ;;  %v11142_v18 = vld [vmem:[#allocation155_spill] sm:$0xff]  ;;  %v11145_v20 = vld [vmem:[#allocation77_spill] sm:$0xff] }
 0x1b9   :  { %v997_v34 = vsel %vm779_vm2, %v11136_v8, %v11135_v17  ;;  %v1000_v39 = vsel %vm779_vm2, %v11138_v59, %v11137_v4  ;;  %v7687_v56 = vrot.slane %v1681_v49, %v7403_v57  ;;  %v1026_v63 = vsel %vm806_vm3, %v7642_v53, %v11141_v60  ;;  %v11151_v8 = vld [vmem:[#allocation167_spill] sm:$0xff]  ;;  %v11152_v59 = vld [vmem:[#allocation168_spill] sm:$0xff] }
 0x1ba   :  { %v7670_v58 = vpop.permute.xlu1 %729  ;;  %669 = vrot.lane.b32.xlu0 %v6417_v43, %s6066_s8  ;;  %v11140_v43 = vld [vmem:[#allocation91_spill] sm:$0xff]  ;;  %v1028_v33 = vsel %vm806_vm3, %v985_v26, %v11142_v18  ;;  %v1030_v41 = vsel %vm806_vm3, %v988_v11, %v11143_v21  ;;  %v1729_v49 = vcombine.low %v7654_v23, %v11145_v20  ;;  %v1032_v44 = vsel %vm806_vm3, %v991_v12, %v11146_v2  ;;  %v11149_v26 = vld [vmem:[#allocation158_spill] sm:$0xff]  ;;  %v11150_v11 = vld [vmem:[#allocation36_spill] sm:$0xff] }
 0x1bb   :  { %v1003_v55 = vsel %vm779_vm2, %v11140_v43, %v11139_v13  ;;  %v1058_v19 = vsel %vm833_vm4, %v1026_v63, %v11148_v15  ;;  %v1034_v51 = vsel %vm806_vm3, %v994_v24, %v11149_v26  ;;  %v1036_v17 = vsel %vm806_vm3, %v997_v34, %v11150_v11  ;;  %v11153_v12 = vld [vmem:[#allocation148_spill] sm:$0xff]  ;;  %v11155_v63 = vld [vmem:[#allocation161_spill] sm:$0xff]  ;;  %v11156_v24 = vld [vmem:[#allocation74_spill] sm:$0xff] }
 0x1bc   :  { %671 = vrot.lane.b32.xlu1 %v11144_v62, %s6066_s8  ;;  %v732_v37 = vpop.permute.xlu0 %731  ;;  %v1040_v1 = vsel %vm806_vm3, %v1003_v55, %v11147_v29  ;;  %v1090_v13 = vsel %vm860_vm5, %v1058_v19, %v11152_v59  ;;  %v11154_v55 = vld [vmem:[#allocation159_spill] sm:$0xff]  ;;  %v1060_v18 = vsel %vm833_vm4, %v1028_v33, %v11155_v63  ;;  %v11158_v2 = vld [vmem:[#allocation162_spill] sm:$0xff]  ;;  %v11160_v19 = vld [vmem:[#allocation92_spill] sm:$0xff]  ;;  %v1743_v22 = vrot.slane %v1729_v49, %v7403_v57 }
 0x1bd   :  { %v1072_v4 = vsel %vm833_vm4, %v1040_v1, %v11151_v8  ;;  %v1038_v60 = vsel %vm806_vm3, %v1000_v39, %v11154_v55  ;;  %v11157_v34 = vld [vmem:[#allocation75_spill] sm:$0xff]  ;;  %v1062_v29 = vsel %vm833_vm4, %v1030_v41, %v11158_v2  ;;  %v11159_v1 = vld [vmem:[#allocation57_spill] sm:$0xff]  ;;  %v11161_v33 = vld [vmem:[#allocation150_spill] sm:$0xff]  ;;  %v1767_v23 = vrot.slane %v1753_v42, %v7403_v57 }
 0x1be   :  { %v502_v43 = vpop.permute.xlu1 %501  ;;  %673 = vrot.lane.b32.xlu0 %v11153_v12, %s6066_s8  ;;  %v1104_v21 = vsel %vm860_vm5, %v1072_v4, %v11156_v24  ;;  %v1122_v62 = vsel %vm887_vm6, %v1090_v13, %v11157_v34  ;;  %v1092_v15 = vsel %vm860_vm5, %v1060_v18, %v11159_v1  ;;  %v11162_v8 = vld [vmem:[#allocation163_spill] sm:$0xff]  ;;  %v11163_v59 = vld [vmem:[#allocation76_spill] sm:$0xff]  ;;  %v11165_v18 = vld [vmem:[#allocation165_spill] sm:$0xff] }
 0x1bf   :  { %v1136_v26 = vsel %vm887_vm6, %v1104_v21, %v11160_v19  ;;  %v1154_v39 = vsel %vm918_vm7, %v1122_v62, %v7569_v7  ;;  %v1064_v4 = vsel %vm833_vm4, %v1032_v44, %v11162_v8  ;;  %v1124_v13 = vsel %vm887_vm6, %v1092_v15, %v11163_v59  ;;  %v11164_v55 = vld [vmem:[#allocation164_spill] sm:$0xff]  ;;  %v11166_v24 = vld [vmem:[#allocation59_spill] sm:$0xff]  ;;  %v11168_v2 = vld [vmem:[#allocation166_spill] sm:$0xff] }
 0x1c0   :  { %675 = vrot.lane.b32.xlu1 %v11161_v33, %s6066_s8  ;;  %v750_v11 = vpop.permute.xlu0 %749  ;;  %v1168_v41 = vsel %vm918_vm7, %v1136_v26, %v732_v37  ;;  %v1066_v63 = vsel %vm833_vm4, %v1034_v51, %v11164_v55  ;;  %v1068_v7 = vsel %vm833_vm4, %v1036_v17, %v11165_v18  ;;  %v1094_v21 = vsel %vm860_vm5, %v1062_v29, %v11166_v24  ;;  %v11167_v62 = vld [vmem:[#allocation44_spill] sm:$0xff]  ;;  %v11170_v51 = vld [vmem:[#allocation78_spill] sm:$0xff] }
 0x1c1   :  { %v1186_v12 = vsel %vm949_vm8, %v1154_v39, %v750_v11  ;;  %v1156_v34 = vsel %vm918_vm7, %v1124_v13, %v7577_v30  ;;  %v1070_v37 = vsel %vm833_vm4, %v1038_v60, %v11168_v2  ;;  %v11169_v1 = vld [vmem:[#allocation60_spill] sm:$0xff]  ;;  %v1126_v19 = vsel %vm887_vm6, %v1094_v21, %v11170_v51  ;;  %v11171_v60 = vld [vmem:[#allocation46_spill] sm:$0xff]  ;;  %v11172_v11 = vld [vmem:[#allocation61_spill] sm:$0xff] }
 0x1c2   :  { %v752_v44 = vpop.permute.xlu1 %751  ;;  %699 = vrot.lane.b32.xlu0 %v11167_v62, %s6067_s11  ;;  %v1096_v15 = vsel %vm860_vm5, %v1064_v4, %v11169_v1  ;;  %v1158_v29 = vsel %vm918_vm7, %v1126_v19, %v7583_v10  ;;  %v1200_v30 = vsel %vm949_vm8, %v1168_v41, %v10708_v45  ;;  %v1608_v26 = vcombine.low %v7607_v0, %v1186_v12  ;;  %v11173_v4 = vld [vmem:[#allocation87_spill] sm:$0xff]  ;;  %v11174_v13 = vld [vmem:[#allocation93_spill] sm:$0xff]  ;;  %v11175_v41 = vld [vmem:[#allocation62_spill] sm:$0xff] }
 0x1c3   :  { %v1188_v17 = vsel %vm949_vm8, %v1156_v34, %v752_v44  ;;  %v1098_v8 = vsel %vm860_vm5, %v1066_v63, %v11172_v11  ;;  %v1128_v59 = vsel %vm887_vm6, %v1096_v15, %v11173_v4  ;;  %v955_v10 = vsel %vm949_vm8, %v11174_v13, %v502_v43  ;;  %v11176_v63 = vld [vmem:[#allocation47_spill] sm:$0xff]  ;;  %v11178_v2 = vld [vmem:[#allocation88_spill] sm:$0xff] }
 0x1c4   :  { %v1632_v39 = vcombine.low %v7596_v9, %v1188_v17  ;;  %701 = vrot.lane.b32.xlu1 %v11171_v60, %s6067_s11  ;;  %v754_v33 = vpop.permute.xlu0 %753  ;;  %v1100_v12 = vsel %vm860_vm5, %v1068_v7, %v11175_v41  ;;  %v1160_v9 = vsel %vm918_vm7, %v1128_v59, %v7600_v40  ;;  %v11177_v34 = vld [vmem:[#allocation63_spill] sm:$0xff]  ;;  %v1130_v43 = vsel %vm887_vm6, %v1098_v8, %v11178_v2  ;;  %v11179_v17 = vld [vmem:[#allocation48_spill] sm:$0xff]  ;;  %v11182_v59 = vld [vmem:[#allocation49_spill] sm:$0xff] }
 0x1c5   :  { %v1190_v55 = vsel %vm949_vm8, %v1158_v29, %v754_v33  ;;  %v1102_v44 = vsel %vm860_vm5, %v1070_v37, %v11177_v34  ;;  %v1776_v1 = vcombine.low %v7637_v14, %v1200_v30  ;;  %v1162_v40 = vsel %vm918_vm7, %v1130_v43, %v7620_v52  ;;  %v11180_v29 = vld [vmem:[#allocation89_spill] sm:$0xff]  ;;  %v11181_v33 = vld [vmem:[#allocation90_spill] sm:$0xff]  ;;  %v11185_v2 = vld [vmem:[#allocation16_spill] sm:$0xff] }
 0x1c6   :  { %v1640_v18 = vrot.slane %v1632_v39, %v7403_v57  ;;  %v1656_v24 = vcombine.low %v955_v10, %v1190_v55  ;;  %v756_v21 = vpop.permute.xlu1 %755  ;;  %703 = vrot.lane.b32.xlu0 %v11176_v63, %s6067_s11  ;;  %v1616_v15 = vrot.slane %v1608_v26, %v7403_v57  ;;  %v1132_v39 = vsel %vm887_vm6, %v1100_v12, %v11180_v29  ;;  %v11183_v12 = vld [vmem:[#allocation50_spill] sm:$0xff] }
 0x1c7   :  { %v1192_v7 = vsel %vm949_vm8, %v1160_v9, %v756_v21  ;;  %v1134_v14 = vsel %vm887_vm6, %v1102_v44, %v11181_v33  ;;  %v1164_v26 = vsel %vm918_vm7, %v1132_v39, %v7646_v31  ;;  %v1719_v31 = vrot.slane %v1705_v3, %v7403_v57  ;;  %v11184_v21 = vld [vmem:[#allocation152_spill] sm:$0xff] }
 0x1c8   :  { %v1664_v51 = vrot.slane %v1656_v24, %v7403_v57  ;;  %v1680_v19 = vcombine.low %v7611_v50, %v1192_v7  ;;  %705 = vrot.lane.b32.xlu1 %v11179_v17, %s6067_s11  ;;  %v758_v37 = vpop.permute.xlu0 %757  ;;  %v1648_v30 = vcombine.low %v1640_v18, %v7660_v48  ;;  %v1166_v13 = vsel %vm918_vm7, %v1134_v14, %v7670_v58 }
 0x1c9   :  { %v1194_v52 = vsel %vm949_vm8, %v1162_v40, %v758_v37  ;;  %v1784_v48 = vrot.slane %v1776_v1, %v7403_v57  ;;  %v1624_v10 = vcombine.low %v1616_v15, %v7657_v46 }
 0x1ca   :  { %v1672_v11 = vcombine.low %v1664_v51, %v7675_v25  ;;  %v1688_v50 = vrot.slane %v1680_v19, %v7403_v57  ;;  %v1704_v8 = vcombine.low %v7615_v28, %v1194_v52  ;;  %v760_v4 = vpop.permute.xlu1 %759  ;;  %707 = vrot.lane.b32.xlu0 %v11182_v59, %s6067_s11  ;;  %v1655_v9 = vrot.slane %v1648_v30, %v7403_v57  ;;  %v11187_v19 = vld [vmem:[#allocation52_spill] sm:$0xff]  ;;  %v11188_v30 = vld [vmem:[#allocation53_spill] sm:$0xff] }
 0x1cb   :  { %v1196_v25 = vsel %vm949_vm8, %v1164_v26, %v760_v4  ;;  %v1792_v34 = vcombine.low %v1784_v48, %v7649_v6  ;;  %v1631_v20 = vrot.slane %v1624_v10, %v7403_v57 }
 0x1cc   :  { %v1696_v28 = vcombine.low %v1688_v50, %v7687_v56  ;;  %v1712_v55 = vrot.slane %v1704_v8, %v7403_v57  ;;  %v1728_v41 = vcombine.low %v7626_v32, %v1196_v25  ;;  %709 = vrot.lane.b32.xlu1 %v11183_v12, %s6067_s11  ;;  %v762_v58 = vpop.permute.xlu0 %761  ;;  %v1679_v18 = vrot.slane %v1672_v11, %v7403_v57  ;;  %v11189_v11 = vld [vmem:[#allocation54_spill] sm:$0xff]  ;;  %v11190_v25 = vld [vmem:[#allocation55_spill] sm:$0xff] }
 0x1cd   :  { %v1198_v36 = vsel %vm949_vm8, %v1166_v13, %v762_v58  ;;  %v2041_v42 = vcombine.low %v1631_v20, %v1655_v9  ;;  %v1799_v29 = vrot.slane %v1792_v34, %v7403_v57  ;;  %v11192_v58 = vld [vmem:[#allocation140_spill] sm:$0xff] }
 0x1ce   :  { %v1703_v46 = vrot.slane %v1696_v28, %v7403_v57  ;;  %v1720_v3 = vcombine.low %v1712_v55, %v1719_v31  ;;  %v1736_v32 = vrot.slane %v1728_v41, %v7403_v57  ;;  %v1752_v56 = vcombine.low %v7633_v54, %v1198_v36  ;;  %v7833_v24 = vpop.permute.xlu1 %1220  ;;  %711 = vrot.lane.b32.xlu0 %v11184_v21, %s6067_s11  ;;  %v11191_v55 = vld [vmem:[#allocation56_spill] sm:$0xff] }
 0x1cf   :  { %v2051_v26 = vrot.slane %v2041_v42, %v7403_v57  ;;  %v716_v9 = vrot.slane %v11192_v58, 2 }
 0x1d0   :  { %v1744_v49 = vcombine.low %v1736_v32, %v1743_v22  ;;  %v1760_v44 = vrot.slane %v1752_v56, %v7403_v57  ;;  %713 = vrot.lane.b32.xlu1 %v11185_v2, %s6067_s11  ;;  %v7846_v54 = vpop.permute.xlu0 %1222  ;;  %v2042_v43 = vcombine.low %v1679_v18, %v1703_v46  ;;  %v1727_v1 = vrot.slane %v1720_v3, %v7403_v57  ;;  %v11193_v32 = vld [vmem:[#allocation67_spill] sm:$0xff]  ;;  %s10536_s11 = sld [smem:[#allocation2 + $0x1]] }
 0x1d1   :  { %v11194_v56 = vrot.slane %v11193_v32, 2 }
 0x1d2   :  { %v1751_v7 = vrot.slane %v1744_v49, %v7403_v57  ;;  %v1768_v40 = vcombine.low %v1760_v44, %v1767_v23  ;;  %v7850_v15 = vpop.permute.xlu1 %1228  ;;  %733 = vrot.lane.b32.xlu0 %v11186_v5, %s6068_s14  ;;  %v2058_v33 = vrot.slane %v2042_v43, %v7403_v57  ;;  %v11196_v5 = vld [vmem:[#allocation14_spill] sm:$0xff] }
 0x1d4   :  { %v1775_v51 = vrot.slane %v1768_v40, %v7403_v57  ;;  %735 = vrot.lane.b32.xlu1 %v11187_v19, %s6068_s14  ;;  %v7857_v37 = vpop.permute.xlu0 %1230  ;;  %v2043_v39 = vcombine.low %v1727_v1, %v1751_v7  ;;  %v2074_v13 = vcombine.high %v2051_v26, %v2058_v33  ;;  %v2073_v48 = vcombine.low %v2051_v26, %v2058_v33  ;;  %v11195_v40 = vld [vmem:[#allocation13_spill] sm:$0xff]  ;;  %v11197_v19 = vld [vmem:[#allocation15_spill] sm:$0xff] }
 0x1d5   :  { %v11202_v26 = vld [vmem:[#allocation11_spill] sm:$0xff] }
 0x1d6   :  { %v7861_v14 = vpop.permute.xlu1 %1236  ;;  %737 = vrot.lane.b32.xlu0 %v11188_v30, %s6068_s14  ;;  %v2044_v52 = vcombine.low %v1775_v51, %v1799_v29  ;;  %v2065_v8 = vrot.slane %v2043_v39, %v7403_v57  ;;  %v2090_v18 = vrot.slane %v2074_v13, %v7403_v57  ;;  %v2083_v46 = vrot.slane %v2073_v48, %v7403_v57  ;;  %v11200_v39 = vld [vmem:[#allocation24_spill] sm:$0xff] }
 0x1d8   :  { %739 = vrot.lane.b32.xlu1 %v11189_v11, %s6068_s14  ;;  %v7868_v50 = vpop.permute.xlu0 %1238  ;;  %v2072_v4 = vrot.slane %v2044_v52, %v7403_v57 }
 0x1da   :  { %v7872_v31 = vpop.permute.xlu1 %1280  ;;  %741 = vrot.lane.b32.xlu0 %v11190_v25, %s6068_s14  ;;  %v2076_v10 = vcombine.high %v2065_v8, %v2072_v4  ;;  %v2075_v28 = vcombine.low %v2065_v8, %v2072_v4 }
 0x1dc   :  { %743 = vrot.lane.b32.xlu1 %v11191_v55, %s6068_s14  ;;  %v7878_v41 = vpop.permute.xlu0 %1282  ;;  %v2104_v22 = vrot.slane %v2076_v10, %v7403_v57  ;;  %v2097_v36 = vrot.slane %v2075_v28, %v7403_v57 }
 0x1de   :  { %v7885_v3 = vpop.permute.xlu1 %1284  ;;  %745 = vrot.lane.b32.xlu0 %v11194_v56, %s6068_s14  ;;  %v2107_v34 = vcombine.low %v2090_v18, %v2104_v22  ;;  %v2108_v23 = vcombine.high %v2090_v18, %v2104_v22  ;;  %v2105_v20 = vcombine.low %v2083_v46, %v2097_v36  ;;  %v2106_v49 = vcombine.high %v2083_v46, %v2097_v36 }
 0x1e0   :  { %747 = vrot.lane.b32.xlu1 %v716_v9, %s6068_s14  ;;  %v7891_v44 = vpop.permute.xlu0 %1286  ;;  %2371 = vmatprep.mubr.bf16.mxu0 %v2107_v34 }
 0x1e1   :  { %5712 = vmatprep.mubr.msk.bf16.mxu1 %vm779_vm2, %v2108_v23  ;;  %2372 = vmatmul.mubr.bf16.vlgmr.msra.gmra.mrb[0].mxu0 %v2105_v20 }
 0x1e2   :  { %2421 = vmatmul.mubr.bf16.vlgmr.msra.gmra.mrb[0].mxu1 %v2106_v49  ;;  %v7894_v43 = vpop.permute.xlu1 %1288  ;;  %513 = vrot.lane.b32.xlu0 %v11123_v38, %s6069_s17  ;;  %v11198_v38 = vld [vmem:[#allocation20_spill] sm:$0xff] }
 0x1e4   :  { %515 = vrot.lane.b32.xlu1 %v11125_v47, %s6069_s17  ;;  %v7900_v1 = vpop.permute.xlu0 %1290 }
 0x1e6   :  { %v7902_v7 = vpop.permute.xlu1 %1294  ;;  %765 = vrot.lane.b32.xlu0 %v11195_v40, %s6069_s17 }
 0x1e8   :  { %767 = vrot.lane.b32.xlu1 %v11196_v5, %s6069_s17  ;;  %v7908_v42 = vpop.permute.xlu0 %1298 }
 0x1ea   :  { %v7910_v51 = vpop.permute.xlu1 %517  ;;  %769 = vrot.lane.b32.xlu0 %v11197_v19, %s6069_s17 }
 0x1ec   :  { %771 = vrot.lane.b32.xlu1 %v11198_v38, %s6069_s17  ;;  %v7916_v47 = vpop.permute.xlu0 %519 }
 0x1ee   :  { %v7918_v29 = vpop.permute.xlu1 %521  ;;  %773 = vrot.lane.b32.xlu0 %v11200_v39, %s6069_s17 }
 0x1ef   :  { %11199 = vst [vmem:[#allocation18_spill] sm:$0xff] %v7918_v29 }
 0x1f0   :  { %775 = vrot.lane.b32.xlu1 %v11193_v32, %s6069_s17  ;;  %v7924_v33 = vpop.permute.xlu0 %523 }
 0x1f1   :  { %11201 = vst [vmem:[#allocation103_spill] sm:$0xff] %v7924_v33 }
 0x1f2   :  { %v7926_v30 = vpop.permute.xlu1 %525  ;;  %777 = vrot.lane.b32.xlu0 %v11192_v58, %s6069_s17 }
 0x1f4   :  { %v7930_v52 = vpop.permute.xlu0 %551  ;;  %2711 = vrot.lane.b32.xlu1 %v11202_v26, %s6064_s30 }
 0x1f6   :  { %v7934_v11 = vpop.permute.xlu1 %553 }
 0x1f8   :  { %v7936_v8 = vpop.permute.xlu0 %555 }
 0x1fa   :  { %v7938_v4 = vpop.permute.xlu1 %557 }
 0x1fc   :  { %v7940_v13 = vpop.permute.xlu0 %559 }
 0x1fe   :  { %v7942_v48 = vpop.permute.xlu1 %561 }
 0x200   :  { %v7944_v25 = vpop.permute.xlu0 %563 }
 0x202   :  { %v7946_v10 = vpop.permute.xlu1 %1302 }
 0x204   :  { %v7948_v28 = vpop.permute.xlu0 %583 }
 0x205   :  { %11203 = vst [vmem:[#allocation107_spill] sm:$0xff] %v7948_v28 }
 0x206   :  { %v7950_v55 = vpop.permute.xlu1 %585 }
 0x207   :  { %11204 = vst [vmem:[#allocation104_spill] sm:$0xff] %v7950_v55 }
 0x208   :  { %v7952_v9 = vpop.permute.xlu0 %587 }
 0x209   :  { %11205 = vst [vmem:[#allocation108_spill] sm:$0xff] %v7952_v9 }
 0x20a   :  { %v7954_v18 = vpop.permute.xlu1 %589 }
 0x20b   :  { %11206 = vst [vmem:[#allocation136_spill] sm:$0xff] %v7954_v18 }
 0x20c   :  { %v7956_v22 = vpop.permute.xlu0 %591 }
 0x20d   :  { %11207 = vst [vmem:[#allocation19_spill] sm:$0xff] %v7956_v22  ;;  %v11236_v22 = vld [vmem:[#allocation83_spill] sm:$0xff] }
 0x20e   :  { %v7958_v36 = vpop.permute.xlu1 %593 }
 0x20f   :  { %11208 = vst [vmem:[#allocation120_spill] sm:$0xff] %v7958_v36  ;;  %v11232_v36 = vld [vmem:[#allocation71_spill] sm:$0xff] }
 0x210   :  { %v7960_v46 = vpop.permute.xlu0 %595 }
 0x211   :  { %11209 = vst [vmem:[#allocation121_spill] sm:$0xff] %v7960_v46  ;;  %v11227_v46 = vld [vmem:[#allocation66_spill] sm:$0xff] }
 0x212   :  { %v7962_v56 = vpop.permute.xlu1 %597 }
 0x213   :  { %11210 = vst [vmem:[#allocation133_spill] sm:$0xff] %v7962_v56 }
 0x214   :  { %v7964_v34 = vpop.permute.xlu0 %627 }
 0x215   :  { %11211 = vst [vmem:[#allocation58_spill] sm:$0xff] %v7964_v34 }
 0x216   :  { %v7966_v23 = vpop.permute.xlu1 %629 }
 0x217   :  { %11212 = vst [vmem:[#allocation142_spill] sm:$0xff] %v7966_v23 }
 0x218   :  { %v7968_v20 = vpop.permute.xlu0 %631 }
 0x219   :  { %11213 = vst [vmem:[#allocation143_spill] sm:$0xff] %v7968_v20 }
 0x21a   :  { %v7970_v49 = vpop.permute.xlu1 %633 }
 0x21b   :  { %11214 = vst [vmem:[#allocation122_spill] sm:$0xff] %v7970_v49  ;;  %v11225_v49 = vld [vmem:[#allocation65_spill] sm:$0xff] }
 0x21c   :  { %v7972_v45 = vpop.permute.xlu0 %635 }
 0x21d   :  { %11215 = vst [vmem:[#allocation21_spill] sm:$0xff] %v7972_v45  ;;  %v11226_v45 = vld [vmem:[#allocation12_spill] sm:$0xff] }
 0x21e   :  { %v7974_v61 = vpop.permute.xlu1 %637 }
 0x21f   :  { %11216 = vst [vmem:[#allocation134_spill] sm:$0xff] %v7974_v61  ;;  %v795_v61 = vsel %vm779_vm2, %v11226_v45, %v11225_v49  ;;  %v805_v45 = vsel %vm779_vm2, %v11200_v39, %v11232_v36  ;;  %v11233_v49 = vld [vmem:[#allocation79_spill] sm:$0xff]  ;;  %v11239_v36 = vld [vmem:[#allocation86_spill] sm:$0xff] }
 0x220   :  { %v7976_v26 = vpop.permute.xlu0 %639 }
 0x221   :  { %11217 = vst [vmem:[#allocation109_spill] sm:$0xff] %v7976_v26  ;;  %v797_v26 = vsel %vm779_vm2, %v11195_v40, %v11227_v46  ;;  %v822_v40 = vsel %vm806_vm3, %v795_v61, %v11233_v49  ;;  %v11234_v46 = vld [vmem:[#allocation80_spill] sm:$0xff]  ;;  %v832_v61 = vsel %vm806_vm3, %v805_v45, %v11239_v36  ;;  %v11240_v49 = vld [vmem:[#allocation95_spill] sm:$0xff]  ;;  %v11245_v45 = vld [vmem:[#allocation98_spill] sm:$0xff] }
 0x222   :  { %v7978_v6 = vpop.permute.xlu1 %641  ;;  %v11246_v36 = vld [vmem:[#allocation99_spill] sm:$0xff] }
 0x223   :  { %11218 = vst [vmem:[#allocation144_spill] sm:$0xff] %v7978_v6  ;;  %v11228_v6 = vld [vmem:[#allocation68_spill] sm:$0xff] }
 0x224   :  { %v7980_v16 = vpop.permute.xlu0 %661 }
 0x225   :  { %11219 = vst [vmem:[#allocation123_spill] sm:$0xff] %v7980_v16 }
 0x226   :  { %v7982_v0 = vpop.permute.xlu1 %663 }
 0x227   :  { %11220 = vst [vmem:[#allocation135_spill] sm:$0xff] %v7982_v0  ;;  %v799_v0 = vsel %vm779_vm2, %v11196_v5, %v11228_v6  ;;  %v824_v6 = vsel %vm806_vm3, %v797_v26, %v11234_v46  ;;  %v11235_v5 = vld [vmem:[#allocation81_spill] sm:$0xff]  ;;  %v849_v26 = vsel %vm833_vm4, %v822_v40, %v11240_v49  ;;  %v11241_v46 = vld [vmem:[#allocation96_spill] sm:$0xff]  ;;  %v11248_v49 = vld [vmem:[#allocation31_spill] sm:$0xff] }
 0x228   :  { %v7984_v56 = vpop.permute.xlu0 %665 }
 0x229   :  { %11221 = vst [vmem:[#allocation145_spill] sm:$0xff] %v7984_v56  ;;  %v11230_v56 = vld [vmem:[#allocation69_spill] sm:$0xff] }
 0x22a   :  { %v7986_v34 = vpop.permute.xlu1 %667 }
 0x22b   :  { %11222 = vst [vmem:[#allocation23_spill] sm:$0xff] %v7986_v34  ;;  %v11231_v34 = vld [vmem:[#allocation70_spill] sm:$0xff] }
 0x22c   :  { %v7988_v23 = vpop.permute.xlu0 %669 }
 0x22d   :  { %11223 = vst [vmem:[#allocation137_spill] sm:$0xff] %v7988_v23  ;;  %v801_v23 = vsel %vm779_vm2, %v11197_v19, %v11230_v56 }
 0x22e   :  { %v7990_v20 = vpop.permute.xlu1 %671  ;;  %v828_v19 = vsel %vm806_vm3, %v801_v23, %v11236_v22  ;;  %v851_v22 = vsel %vm833_vm4, %v824_v6, %v11241_v46  ;;  %v11242_v23 = vld [vmem:[#allocation97_spill] sm:$0xff]  ;;  %v11249_v46 = vld [vmem:[#allocation32_spill] sm:$0xff] }
 0x22f   :  { %11224 = vst [vmem:[#allocation139_spill] sm:$0xff] %v7990_v20  ;;  %v803_v20 = vsel %vm779_vm2, %v11198_v38, %v11231_v34  ;;  %v1311_v38 = vsel %vm779_vm2, %v11192_v58, %v7846_v54  ;;  %v11238_v34 = vld [vmem:[#allocation85_spill] sm:$0xff] }
 0x230   :  { %v8001_v16 = vpop.permute.xlu0 %673  ;;  %v830_v39 = vsel %vm806_vm3, %v803_v20, %v11238_v34  ;;  %v11243_v58 = vld [vmem:[#allocation9_spill] sm:$0xff] }
 0x231   :  { %11229 = vst [vmem:[#allocation29_spill] sm:$0xff] %v8001_v16  ;;  %v826_v16 = vsel %vm806_vm3, %v799_v0, %v11235_v5  ;;  %v1319_v0 = vsel %vm806_vm3, %v1311_v38, %v7857_v37  ;;  %v855_v5 = vsel %vm833_vm4, %v828_v19, %v11243_v58  ;;  %v857_v40 = vsel %vm833_vm4, %v830_v39, %v11245_v45  ;;  %v11247_v38 = vld [vmem:[#allocation30_spill] sm:$0xff] }
 0x232   :  { %v8023_v56 = vpop.permute.xlu1 %675  ;;  %v853_v54 = vsel %vm833_vm4, %v826_v16, %v11242_v23  ;;  %v1327_v20 = vsel %vm833_vm4, %v1319_v0, %v7868_v50  ;;  %v859_v37 = vsel %vm833_vm4, %v832_v61, %v11246_v36  ;;  %v876_v6 = vsel %vm860_vm5, %v849_v26, %v11247_v38  ;;  %v11250_v23 = vld [vmem:[#allocation33_spill] sm:$0xff]  ;;  %v11251_v0 = vld [vmem:[#allocation100_spill] sm:$0xff]  ;;  %v11254_v36 = vld [vmem:[#allocation138_spill] sm:$0xff] }
 0x233   :  { %11237 = vst [vmem:[#allocation26_spill] sm:$0xff] %v8023_v56  ;;  %v878_v16 = vsel %vm860_vm5, %v851_v22, %v11248_v49  ;;  %v880_v19 = vsel %vm860_vm5, %v853_v54, %v11249_v46  ;;  %v882_v50 = vsel %vm860_vm5, %v855_v5, %v11250_v23  ;;  %v884_v58 = vsel %vm860_vm5, %v857_v40, %v11251_v0  ;;  %v11253_v61 = vld [vmem:[#allocation101_spill] sm:$0xff]  ;;  %v11255_v23 = vld [vmem:[#allocation110_spill] sm:$0xff]  ;;  %v11256_v56 = vld [vmem:[#allocation64_spill] sm:$0xff] }
 0x234   :  { %v8041_v34 = vpop.permute.xlu0 %699  ;;  %v1344_v39 = vsel %vm860_vm5, %v851_v22, %v7872_v31  ;;  %v886_v26 = vsel %vm860_vm5, %v859_v37, %v11253_v61  ;;  %v1355_v38 = vsel %vm860_vm5, %v1327_v20, %v11254_v36  ;;  %v1346_v49 = vsel %vm860_vm5, %v853_v54, %v7878_v41  ;;  %v11258_v22 = vld [vmem:[#allocation112_spill] sm:$0xff]  ;;  %v11259_v61 = vld [vmem:[#allocation113_spill] sm:$0xff]  ;;  %v11261_v41 = vld [vmem:[#allocation114_spill] sm:$0xff] }
 0x235   :  { %11244 = vst [vmem:[#allocation146_spill] sm:$0xff] %v8041_v34  ;;  %v1348_v46 = vsel %vm860_vm5, %v855_v5, %v7885_v3  ;;  %v905_v0 = vsel %vm887_vm6, %v11256_v56, %v11255_v23  ;;  %v11257_v34 = vld [vmem:[#allocation111_spill] sm:$0xff]  ;;  %v8078_v18 = vsel %vm887_vm6, %v880_v19, %v11259_v61  ;;  %v8084_v54 = vsel %vm887_vm6, %v882_v50, %v11261_v41  ;;  %v11263_v56 = vld [vmem:[#allocation116_spill] sm:$0xff] }
 0x236   :  { %v8059_v45 = vpop.permute.xlu1 %701  ;;  %v907_v31 = vsel %vm887_vm6, %v876_v6, %v11257_v34  ;;  %v11262_v3 = vld [vmem:[#allocation115_spill] sm:$0xff]  ;;  %v8092_v34 = vsel %vm887_vm6, %v886_v26, %v11263_v56  ;;  %v1365_v6 = vsel %vm887_vm6, %v1344_v39, %v11258_v22  ;;  %v1366_v36 = vsel %vm887_vm6, %v1346_v49, %v11259_v61  ;;  %v11268_v61 = vld [vmem:[#allocation126_spill] sm:$0xff] }
 0x237   :  { %11252 = vst [vmem:[#allocation118_spill] sm:$0xff] %v8059_v45  ;;  %v909_v45 = vsel %vm887_vm6, %v878_v16, %v11258_v22  ;;  %v8088_v5 = vsel %vm887_vm6, %v884_v58, %v11262_v3  ;;  %v11264_v16 = vld [vmem:[#allocation102_spill] sm:$0xff]  ;;  %v1367_v50 = vsel %vm887_vm6, %v1348_v46, %v11261_v41  ;;  %v1506_v23 = vshll.u32 %v11176_v63, 16 }
 0x238   :  { %v8080_v20 = vpop.permute.xlu0 %703  ;;  %v1372_v19 = vsel %vm887_vm6, %v1355_v38, %v11264_v16  ;;  %v1350_v39 = vsel %vm860_vm5, %v857_v40, %v7891_v44  ;;  %v1504_v22 = vshrl.u32 %v11176_v63, 16  ;;  %v1518_v38 = vshll.u32 %v11179_v17, 16  ;;  %v11270_v16 = vld [vmem:[#allocation117_spill] sm:$0xff] }
 0x239   :  { %11260 = vst [vmem:[#allocation27_spill] sm:$0xff] %v8080_v20  ;;  %v11266_v20 = vld [vmem:[#allocation124_spill] sm:$0xff]  ;;  %v1309_v49 = vsel %vm779_vm2, %v11193_v32, %v7833_v24  ;;  %v1352_v46 = vsel %vm860_vm5, %v859_v37, %v7894_v43  ;;  %v1382_v41 = vsel %vm918_vm7, %v1365_v6, %v11268_v61  ;;  %v1389_v44 = vsel %vm918_vm7, %v1372_v19, %v11270_v16 }
 0x23a   :  { %v8103_v58 = vpop.permute.xlu1 %705  ;;  %v8107_v26 = vsel %vm918_vm7, %v905_v0, %v11266_v20  ;;  %v1530_v0 = vshll.u32 %v11182_v59, 16  ;;  %v1399_v40 = vsel %vm949_vm8, %v1382_v41, %v7910_v51  ;;  %v11272_v24 = vld [vmem:[#allocation128_spill] sm:$0xff]  ;;  %v1368_v43 = vsel %vm887_vm6, %v1350_v39, %v11262_v3 }
 0x23b   :  { %11265 = vst [vmem:[#allocation119_spill] sm:$0xff] %v8103_v58  ;;  %11267 = vst [vmem:[#allocation141_spill] sm:$0xff] %v8107_v26  ;;  %v11271_v58 = vld [vmem:[#allocation127_spill] sm:$0xff]  ;;  %v1384_v32 = vsel %vm918_vm7, %v1367_v50, %v11272_v24  ;;  %v1508_v37 = vrot.slane %v1506_v23, 1  ;;  %v1369_v41 = vsel %vm887_vm6, %v1352_v46, %v11263_v56  ;;  %v1520_v16 = vrot.slane %v1518_v38, 1  ;;  %v11275_v46 = vld [vmem:[#allocation129_spill] sm:$0xff] }
 0x23c   :  { %v8121_v20 = vpop.permute.xlu0 %707  ;;  %v1383_v26 = vsel %vm918_vm7, %v1366_v36, %v11271_v58  ;;  %v1516_v36 = vshrl.u32 %v11179_v17, 16  ;;  %v1528_v50 = vshrl.u32 %v11182_v59, 16  ;;  %v1317_v3 = vsel %vm806_vm3, %v1309_v49, %v7850_v15  ;;  %v11278_v49 = vld [vmem:[#allocation130_spill] sm:$0xff] }
 0x23d   :  { %11269 = vst [vmem:[#allocation82_spill] sm:$0xff] %v8121_v20  ;;  %v1400_v6 = vsel %vm949_vm8, %v1383_v26, %v7916_v47  ;;  %v1401_v20 = vsel %vm949_vm8, %v1384_v32, %v7918_v29  ;;  %v1406_v23 = vsel %vm949_vm8, %v1389_v44, %v7475_v35  ;;  %v1500_v26 = vshll.u32 %v1399_v40, 16 }
 0x23e   :  { %v8137_v19 = vpop.permute.xlu1 %709  ;;  %v1532_v39 = vrot.slane %v1530_v0, 1  ;;  %v1325_v32 = vsel %vm833_vm4, %v1317_v3, %v7861_v14  ;;  %v1512_v29 = vshll.u32 %v1400_v6, 16  ;;  %v1524_v56 = vshll.u32 %v1401_v20, 16 }
 0x23f   :  { %11273 = vst [vmem:[#allocation34_spill] sm:$0xff] %v8137_v19  ;;  %v1385_v38 = vsel %vm918_vm7, %v1368_v43, %v11275_v46  ;;  %v11276_v19 = vld [vmem:[#allocation125_spill] sm:$0xff]  ;;  %v1354_v15 = vsel %vm860_vm5, %v1325_v32, %v7900_v1  ;;  %v1386_v0 = vsel %vm918_vm7, %v1369_v41, %v11278_v49  ;;  %v940_v14 = vsel %vm918_vm7, %v909_v45, %v11268_v61 }
 0x240   :  { %v8147_v9 = vpop.permute.xlu0 %711  ;;  %v8155_v55 = vsel %vm918_vm7, %v907_v31, %v11276_v19  ;;  %v1402_v35 = vsel %vm949_vm8, %v1385_v38, %v7924_v33  ;;  %v1573_v3 = vshll.u32 %v1406_v23, 16  ;;  %v1509_v43 = vor.u32 %v1508_v37, %v1504_v22 }
 0x241   :  { %11274 = vst [vmem:[#allocation132_spill] sm:$0xff] %v8147_v9  ;;  %11277 = vst [vmem:[#allocation35_spill] sm:$0xff] %v8155_v55  ;;  %v1403_v31 = vsel %vm949_vm8, %v1386_v0, %v7926_v30  ;;  %v1502_v19 = vrot.slane %v1500_v26, 1  ;;  %v1521_v9 = vor.u32 %v1520_v16, %v1516_v36  ;;  %v1533_v55 = vor.u32 %v1532_v39, %v1528_v50 }
 0x242   :  { %v8163_v44 = vpop.permute.xlu1 %713  ;;  %v1542_v1 = vshll.u32 %v11183_v12, 16  ;;  %v1371_v41 = vsel %vm887_vm6, %v1354_v15, %v7902_v7  ;;  %v1514_v38 = vrot.slane %v1512_v29, 1  ;;  %v1526_v33 = vrot.slane %v1524_v56, 1 }
 0x243   :  { %11279 = vst [vmem:[#allocation147_spill] sm:$0xff] %v8163_v44  ;;  %v1536_v44 = vshll.u32 %v1402_v35, 16  ;;  %v1498_v53 = vshrl.u32 %v1399_v40, 16  ;;  %v1540_v45 = vshrl.u32 %v11183_v12, 16  ;;  %v1554_v22 = vshll.u32 %v11184_v21, 16 }
 0x244   :  { %v8170_v32 = vpop.permute.xlu0 %733  ;;  %v1548_v61 = vshll.u32 %v1403_v31, 16  ;;  %v1575_v36 = vrot.slane %v1573_v3, 1  ;;  %v1510_v16 = vshrl.u32 %v1400_v6, 16  ;;  %v1522_v50 = vshrl.u32 %v1401_v20, 16 }
 0x245   :  { %11280 = vst [vmem:[#allocation149_spill] sm:$0xff] %v8170_v32  ;;  %v1567_v26 = vshll.u32 %v11185_v2, 16  ;;  %v1571_v39 = vshrl.u32 %v1406_v23, 16  ;;  %v1388_v7 = vsel %vm918_vm7, %v1371_v41, %v7908_v42  ;;  %v1503_v29 = vor.u32 %v1502_v19, %v1498_v53 }
 0x246   :  { %v8176_v37 = vpop.permute.xlu1 %735  ;;  %v1544_v56 = vrot.slane %v1542_v1, 1  ;;  %v1515_v40 = vor.u32 %v1514_v38, %v1510_v16  ;;  %v1527_v0 = vor.u32 %v1526_v33, %v1522_v50  ;;  %v1538_v32 = vrot.slane %v1536_v44, 1 }
 0x247   :  { %11281 = vst [vmem:[#allocation40_spill] sm:$0xff] %v8176_v37  ;;  %v1405_v28 = vsel %vm949_vm8, %v1388_v7, %v7946_v10  ;;  %v942_v20 = vsel %vm918_vm7, %v8078_v18, %v11271_v58  ;;  %v1552_v6 = vshrl.u32 %v11184_v21, 16  ;;  %v1556_v23 = vrot.slane %v1554_v22, 1 }
 0x248   :  { %v8181_v15 = vpop.permute.xlu0 %737  ;;  %v1550_v3 = vrot.slane %v1548_v61, 1  ;;  %v1534_v53 = vshrl.u32 %v1402_v35, 16  ;;  %v1565_v42 = vshrl.u32 %v11185_v2, 16  ;;  %v1569_v19 = vrot.slane %v1567_v26, 1 }
 0x249   :  { %v8192_v1 = vor.u32 %v1575_v36, %v1571_v39  ;;  %v8197_v33 = vsel %vm918_vm7, %v8084_v54, %v11272_v24  ;;  %v1801_v10 = vcombine.low %v1503_v29, %v1509_v43  ;;  %v1546_v44 = vshrl.u32 %v1403_v31, 16  ;;  %v11282_v39 = vld [vmem:[#allocation107_spill] sm:$0xff] }
 0x24a   :  { %v8189_v37 = vpop.permute.xlu1 %739  ;;  %v1560_v18 = vshll.u32 %v1405_v28, 16  ;;  %v1825_v41 = vcombine.low %v1515_v40, %v1521_v9  ;;  %v1849_v38 = vcombine.low %v1527_v0, %v1533_v55  ;;  %v8201_v22 = vor.u32 %v1544_v56, %v1540_v45  ;;  %v11289_v40 = vld [vmem:[#allocation121_spill] sm:$0xff] }
 0x24b   :  { %v8203_v35 = vor.u32 %v1538_v32, %v1534_v53  ;;  %v8208_v2 = vsel %vm918_vm7, %v8088_v5, %v11275_v46  ;;  %v948_v54 = vsel %vm918_vm7, %v8092_v34, %v11278_v49  ;;  %v8213_v24 = vor.u32 %v1556_v23, %v1552_v6  ;;  %v11291_v23 = vld [vmem:[#allocation133_spill] sm:$0xff]  ;;  %v11292_v53 = vld [vmem:[#allocation142_spill] sm:$0xff] }
 0x24c   :  { %v8199_v58 = vpop.permute.xlu0 %741  ;;  %v8215_v43 = vor.u32 %v1550_v3, %v1546_v44  ;;  %v8221_v55 = vsel %vm949_vm8, %v940_v14, %v7910_v51  ;;  %v8225_v9 = vsel %vm949_vm8, %v942_v20, %v7916_v47  ;;  %v8227_v5 = vor.u32 %v1569_v19, %v1565_v42  ;;  %v11290_v20 = vld [vmem:[#allocation58_spill] sm:$0xff]  ;;  %v11293_v19 = vld [vmem:[#allocation143_spill] sm:$0xff] }
 0x24d   :  { %v1945_v46 = vcombine.low %v8192_v1, %v7401_v27  ;;  %v8233_v34 = vsel %vm949_vm8, %v948_v54, %v7926_v30  ;;  %v1006_v49 = vsel %vm779_vm2, %v11167_v62, %v7930_v52  ;;  %v1562_v32 = vrot.slane %v1560_v18, 1  ;;  %v11294_v44 = vld [vmem:[#allocation123_spill] sm:$0xff] }
 0x24e   :  { %v8217_v31 = vpop.permute.xlu1 %743  ;;  %v8241_v14 = vrot.slane %v1801_v10, %v7403_v57  ;;  %v1873_v47 = vcombine.low %v8203_v35, %v8201_v22  ;;  %v1009_v45 = vsel %vm779_vm2, %v11171_v60, %v7934_v11  ;;  %v8249_v30 = vrot.slane %v1825_v41, %v7403_v57 }
 0x24f   :  { %v8252_v61 = vrot.slane %v1849_v38, %v7403_v57  ;;  %v1897_v62 = vcombine.low %v8215_v43, %v8213_v24  ;;  %v1012_v52 = vsel %vm779_vm2, %v11176_v63, %v7936_v8  ;;  %v1015_v36 = vsel %vm779_vm2, %v11179_v17, %v7938_v4  ;;  %v11283_v63 = vld [vmem:[#allocation105_spill] sm:$0xff]  ;;  %v11284_v17 = vld [vmem:[#allocation104_spill] sm:$0xff]  ;;  %v11295_v38 = vld [vmem:[#allocation122_spill] sm:$0xff] }
 0x250   :  { %v8238_v51 = vpop.permute.xlu0 %745  ;;  %v1558_v16 = vshrl.u32 %v1405_v28, 16  ;;  %v1018_v60 = vsel %vm779_vm2, %v11182_v59, %v7940_v13  ;;  %v1021_v11 = vsel %vm779_vm2, %v11183_v12, %v7942_v48  ;;  %v1024_v26 = vsel %vm779_vm2, %v11184_v21, %v7944_v25  ;;  %v11285_v28 = vld [vmem:[#allocation108_spill] sm:$0xff]  ;;  %v11287_v48 = vld [vmem:[#allocation19_spill] sm:$0xff]  ;;  %v11324_v43 = vld [vmem:[#allocation106_spill] sm:$0xff] }
 0x251   :  { %v1042_v8 = vsel %vm806_vm3, %v11283_v63, %v11282_v39  ;;  %v1044_v4 = vsel %vm806_vm3, %v1006_v49, %v11284_v17  ;;  %v1046_v59 = vsel %vm806_vm3, %v1009_v45, %v11285_v28  ;;  %v11286_v13 = vld [vmem:[#allocation136_spill] sm:$0xff]  ;;  %v1050_v56 = vsel %vm806_vm3, %v1015_v36, %v11287_v48  ;;  %v11296_v49 = vld [vmem:[#allocation21_spill] sm:$0xff]  ;;  %v11298_v36 = vld [vmem:[#allocation146_spill] sm:$0xff] }
 0x252   :  { %v748_v50 = vpop.permute.xlu1 %747  ;;  %v8274_v7 = vor.u32 %v1562_v32, %v1558_v16  ;;  %v1048_v29 = vsel %vm806_vm3, %v1012_v52, %v11286_v13  ;;  %v11288_v21 = vld [vmem:[#allocation120_spill] sm:$0xff]  ;;  %v1054_v0 = vsel %vm806_vm3, %v1021_v11, %v11289_v40  ;;  %v1074_v6 = vsel %vm833_vm4, %v1042_v8, %v11290_v20  ;;  %v11301_v63 = vld [vmem:[#allocation26_spill] sm:$0xff]  ;;  %v11302_v17 = vld [vmem:[#allocation149_spill] sm:$0xff] }
 0x253   :  { %v1052_v25 = vsel %vm806_vm3, %v1018_v60, %v11288_v21  ;;  %v1056_v3 = vsel %vm806_vm3, %v1024_v26, %v11291_v23  ;;  %v1076_v42 = vsel %vm833_vm4, %v1044_v4, %v11292_v53  ;;  %v1078_v10 = vsel %vm833_vm4, %v1046_v59, %v11293_v19  ;;  %v11297_v45 = vld [vmem:[#allocation144_spill] sm:$0xff]  ;;  %v11299_v60 = vld [vmem:[#allocation134_spill] sm:$0xff]  ;;  %v11300_v26 = vld [vmem:[#allocation135_spill] sm:$0xff] }
 0x254   :  { %v514_v12 = vpop.permute.xlu0 %513  ;;  %v1106_v18 = vsel %vm860_vm5, %v1074_v6, %v11294_v44  ;;  %v1080_v54 = vsel %vm833_vm4, %v1048_v29, %v11295_v38  ;;  %v1082_v32 = vsel %vm833_vm4, %v1050_v56, %v11296_v49  ;;  %v1088_v52 = vsel %vm833_vm4, %v1056_v3, %v11297_v45  ;;  %v11303_v59 = vld [vmem:[#allocation109_spill] sm:$0xff]  ;;  %v11304_v29 = vld [vmem:[#allocation118_spill] sm:$0xff]  ;;  %v11305_v56 = vld [vmem:[#allocation147_spill] sm:$0xff] }
 0x255   :  { %v1138_v16 = vsel %vm887_vm6, %v1106_v18, %v11298_v36  ;;  %v1084_v11 = vsel %vm833_vm4, %v1052_v25, %v11299_v60  ;;  %v1108_v39 = vsel %vm860_vm5, %v1076_v42, %v11300_v26  ;;  %v1120_v8 = vsel %vm860_vm5, %v1088_v52, %v11301_v63  ;;  %v11306_v40 = vld [vmem:[#allocation145_spill] sm:$0xff]  ;;  %v11307_v6 = vld [vmem:[#allocation23_spill] sm:$0xff]  ;;  %v11308_v3 = vld [vmem:[#allocation40_spill] sm:$0xff] }
 0x256   :  { %v516_v41 = vpop.permute.xlu1 %515  ;;  %v1170_v4 = vsel %vm918_vm7, %v1138_v16, %v11302_v17  ;;  %v1086_v13 = vsel %vm833_vm4, %v1054_v0, %v11303_v59  ;;  %v1140_v48 = vsel %vm887_vm6, %v1108_v39, %v11304_v29  ;;  %v1152_v21 = vsel %vm887_vm6, %v1120_v8, %v11305_v56  ;;  %v11309_v19 = vld [vmem:[#allocation137_spill] sm:$0xff]  ;;  %v11310_v18 = vld [vmem:[#allocation27_spill] sm:$0xff]  ;;  %v11313_v16 = vld [vmem:[#allocation94_spill] sm:$0xff] }
 0x257   :  { %v1110_v20 = vsel %vm860_vm5, %v1078_v10, %v11306_v40  ;;  %v1112_v23 = vsel %vm860_vm5, %v1080_v54, %v11307_v6  ;;  %v1172_v53 = vsel %vm918_vm7, %v1140_v48, %v11308_v3  ;;  %v1184_v42 = vsel %vm918_vm7, %v1152_v21, %v748_v50  ;;  %v11311_v49 = vld [vmem:[#allocation141_spill] sm:$0xff]  ;;  %v11312_v52 = vld [vmem:[#allocation139_spill] sm:$0xff]  ;;  %v11320_v40 = vld [vmem:[#allocation34_spill] sm:$0xff] }
 0x258   :  { %v766_v28 = vpop.permute.xlu0 %765  ;;  %v1114_v44 = vsel %vm860_vm5, %v1082_v32, %v11309_v19  ;;  %v1142_v38 = vsel %vm887_vm6, %v1110_v20, %v11310_v18  ;;  %v967_v45 = vsel %vm949_vm8, %v11311_v49, %v514_v12  ;;  %v1116_v54 = vsel %vm860_vm5, %v1084_v11, %v11312_v52  ;;  %v11314_v39 = vld [vmem:[#allocation119_spill] sm:$0xff]  ;;  %v11318_v11 = vld [vmem:[#allocation82_spill] sm:$0xff]  ;;  %v11319_v21 = vld [vmem:[#allocation29_spill] sm:$0xff] }
 0x259   :  { %v1202_v25 = vsel %vm949_vm8, %v1170_v4, %v766_v28  ;;  %v1174_v36 = vsel %vm918_vm7, %v1142_v38, %v8181_v15  ;;  %v1144_v32 = vsel %vm887_vm6, %v1112_v23, %v11314_v39  ;;  %v11315_v63 = vld [vmem:[#allocation131_spill] sm:$0xff]  ;;  %v1146_v59 = vsel %vm887_vm6, %v1114_v44, %v11318_v11 }
 0x25a   :  { %v768_v0 = vpop.permute.xlu1 %767  ;;  %v1800_v50 = vcombine.low %v11313_v16, %v1202_v25  ;;  %v11316_v8 = vunpack.i.h.bf16 %v11315_v63  ;;  %v11317_v12 = vld [vmem:[#allocation35_spill] sm:$0xff]  ;;  %v1176_v15 = vsel %vm918_vm7, %v1144_v32, %v8189_v37  ;;  %v1118_v25 = vsel %vm860_vm5, %v1086_v13, %v11319_v21 }
 0x25b   :  { %v1204_v10 = vsel %vm949_vm8, %v1172_v53, %v768_v0  ;;  %v969_v4 = vsel %vm949_vm8, %v11317_v12, %v516_v41  ;;  %v1148_v20 = vsel %vm887_vm6, %v1116_v54, %v11320_v40  ;;  %v1178_v41 = vsel %vm918_vm7, %v1146_v59, %v8199_v58  ;;  %v11321_v0 = vld [vmem:[#allocation132_spill] sm:$0xff]  ;;  %v11323_v54 = vld [vmem:[#allocation103_spill] sm:$0xff] }
 0x25c   :  { %v1824_v60 = vcombine.low %v967_v45, %v1204_v10  ;;  %v770_v26 = vpop.permute.xlu0 %769  ;;  %v1215_v17 = vsel %vm949_vm8, %v1184_v42, %v11316_v8  ;;  %v1808_v3 = vrot.slane %v1800_v50, %v7403_v57  ;;  %v1150_v13 = vsel %vm887_vm6, %v1118_v25, %v11321_v0  ;;  %v11322_v45 = vld [vmem:[#allocation18_spill] sm:$0xff] }
 0x25d   :  { %v1206_v28 = vsel %vm949_vm8, %v1174_v36, %v770_v26  ;;  %v1968_v23 = vcombine.low %v8233_v34, %v1215_v17  ;;  %v1180_v19 = vsel %vm918_vm7, %v1148_v20, %v8217_v31  ;;  %v1887_v58 = vrot.slane %v1873_v47, %v7403_v57 }
 0x25e   :  { %v1832_v29 = vrot.slane %v1824_v60, %v7403_v57  ;;  %v1848_v48 = vcombine.low %v969_v4, %v1206_v28  ;;  %v772_v56 = vpop.permute.xlu1 %771  ;;  %v975_v31 = vsel %vm949_vm8, %v8197_v33, %v11322_v45  ;;  %v1921_v10 = vcombine.low %v8274_v7, %v8227_v5 }
 0x25f   :  { %v1208_v6 = vsel %vm949_vm8, %v1176_v15, %v772_v56  ;;  %v1182_v22 = vsel %vm918_vm7, %v1150_v13, %v8238_v51  ;;  %v1975_v47 = vrot.slane %v1968_v23, %v7403_v57  ;;  %v977_v33 = vsel %vm949_vm8, %v8208_v2, %v11323_v54 }
 0x260   :  { %v1856_v37 = vrot.slane %v1848_v48, %v7403_v57  ;;  %v1872_v53 = vcombine.low %v8221_v55, %v1208_v6  ;;  %v774_v42 = vpop.permute.xlu0 %773  ;;  %v1840_v44 = vcombine.low %v1832_v29, %v8249_v30  ;;  %v1816_v30 = vcombine.low %v1808_v3, %v8241_v14 }
 0x261   :  { %v1210_v34 = vsel %vm949_vm8, %v1178_v41, %v774_v42  ;;  %v1911_v5 = vrot.slane %v1897_v62, %v7403_v57  ;;  %v1935_v2 = vrot.slane %v1921_v10, %v7403_v57  ;;  %v1959_v24 = vrot.slane %v1945_v46, %v7403_v57 }
 0x262   :  { %v1864_v18 = vcombine.low %v1856_v37, %v8252_v61  ;;  %v1880_v55 = vrot.slane %v1872_v53, %v7403_v57  ;;  %v1896_v38 = vcombine.low %v8225_v9, %v1210_v34  ;;  %v776_v49 = vpop.permute.xlu1 %775  ;;  %v1847_v36 = vrot.slane %v1840_v44, %v7403_v57 }
 0x263   :  { %v1212_v35 = vsel %vm949_vm8, %v1180_v19, %v776_v49  ;;  %v1976_v62 = vcombine.low %v1975_v47, %v11324_v43  ;;  %v1823_v39 = vrot.slane %v1816_v30, %v7403_v57 }
 0x264   :  { %v1888_v61 = vcombine.low %v1880_v55, %v1887_v58  ;;  %v1904_v9 = vrot.slane %v1896_v38, %v7403_v57  ;;  %v778_v52 = vpop.permute.xlu0 %777  ;;  %v1920_v51 = vcombine.low %v975_v31, %v1212_v35  ;;  %v1871_v14 = vrot.slane %v1864_v18, %v7403_v57  ;;  %v8424_v58 = vld [vmem:[%s10570_s3] ss:$0 sm:$0xff] }
 0x265   :  { %v1214_v7 = vsel %vm949_vm8, %v1182_v22, %v778_v52  ;;  %v2109_v17 = vcombine.low %v1823_v39, %v1847_v36  ;;  %v1983_v11 = vrot.slane %v1976_v62, %v7403_v57 }
 0x266   :  { %v1895_v16 = vrot.slane %v1888_v61, %v7403_v57  ;;  %v1944_v50 = vcombine.low %v977_v33, %v1214_v7  ;;  %v1912_v60 = vcombine.low %v1904_v9, %v1911_v5  ;;  %v1928_v26 = vrot.slane %v1920_v51, %v7403_v57 }
 0x267   :  { %v2119_v29 = vrot.slane %v2109_v17, %v7403_v57 }
 0x268   :  { %v2110_v32 = vcombine.low %v1871_v14, %v1895_v16  ;;  %v1952_v63 = vrot.slane %v1944_v50, %v7403_v57  ;;  %v1936_v8 = vcombine.low %v1928_v26, %v1935_v2  ;;  %v1919_v4 = vrot.slane %v1912_v60, %v7403_v57 }
 0x26a   :  { %v1960_v12 = vcombine.low %v1952_v63, %v1959_v24  ;;  %v1943_v28 = vrot.slane %v1936_v8, %v7403_v57  ;;  %v2126_v1 = vrot.slane %v2110_v32, %v7403_v57 }
 0x26c   :  { %v1967_v59 = vrot.slane %v1960_v12, %v7403_v57  ;;  %v2111_v46 = vcombine.low %v1919_v4, %v1943_v28  ;;  %v2142_v21 = vcombine.high %v2119_v29, %v2126_v1  ;;  %v2141_v25 = vcombine.low %v2119_v29, %v2126_v1 }
 0x26e   :  { %v2112_v15 = vcombine.low %v1967_v59, %v1983_v11  ;;  %v2133_v48 = vrot.slane %v2111_v46, %v7403_v57  ;;  %v2158_v41 = vrot.slane %v2142_v21, %v7403_v57  ;;  %v2151_v23 = vrot.slane %v2141_v25, %v7403_v57 }
 0x270   :  { %v2140_v56 = vrot.slane %v2112_v15, %v7403_v57 }
 0x272   :  { %v2144_v40 = vcombine.high %v2133_v48, %v2140_v56  ;;  %v2143_v20 = vcombine.low %v2133_v48, %v2140_v56 }
 0x274   :  { %v2172_v6 = vrot.slane %v2144_v40, %v7403_v57  ;;  %v2165_v3 = vrot.slane %v2143_v20, %v7403_v57 }
 0x276   :  { %v2175_v37 = vcombine.low %v2158_v41, %v2172_v6  ;;  %v2176_v53 = vcombine.high %v2158_v41, %v2172_v6  ;;  %v2173_v42 = vcombine.low %v2151_v23, %v2165_v3  ;;  %v2174_v0 = vcombine.high %v2151_v23, %v2165_v3 }
 0x278   :  { %2379 = vmatprep.mubr.bf16.mxu0 %v2175_v37  ;;  %5713 = vmatprep.mubr.msk.bf16.mxu1 %vm779_vm2, %v2176_v53 }
 0x279   :  { %2380 = vmatmul.mubr.bf16.gmra.mrb[4].mxu0 %v2173_v42  ;;  %2429 = vmatmul.mubr.bf16.gmra.mrb[4].mxu1 %v2174_v0 }
 0x2b4   :  { %v5804_v13 = vpop.f32.mrb[0].mxu0 }
 0x2b5   :  { %v2422_v19 = vpop.f32.mrb[0].mxu1  ;;  %v5805_v34 = vpop.f32.mrb[1].mxu0 }
 0x2b6   :  { %v5806_v44 = vadd.f32 %v5805_v34, %v5804_v13  ;;  %v2424_v18 = vpop.f32.mrb[1].mxu1  ;;  %v5807_v55 = vpop.f32.mrb[2].mxu0 }
 0x2b7   :  { %v2425_v38 = vpop.f32.mrb[2].mxu1  ;;  %v5808_v49 = vpop.f32.mrb[3].mxu0 }
 0x2b8   :  { %v2374_v45 = vadd.f32 %v5806_v44, %v8424_v58  ;;  %v5809_v31 = vadd.f32 %v5808_v49, %v5807_v55  ;;  %v2427_v10 = vpop.f32.mrb[3].mxu1 }
 0x2ba   :  { %v2423_v22 = vadd.f32 %v2422_v19, %v2374_v45  ;;  %v2377_v35 = vadd.f32 %v5809_v31, %v8424_v58 }
 0x2bc   :  { %v2441_v47 = vmul.f32 %v2423_v22, %v2423_v22  ;;  %v2426_v30 = vadd.f32 %v2425_v38, %v2377_v35  ;;  %v2437_v60 = vmul.f32 0.5, %v2423_v22 }
 0x2be   :  { %v2445_v61 = vmul.f32 %v2441_v47, %v2423_v22  ;;  %v2442_v9 = vmul.f32 %v2426_v30, %v2426_v30  ;;  %v2438_v26 = vmul.f32 0.5, %v2426_v30 }
 0x2c0   :  { %v2449_v52 = vmul.f32 0.044715, %v2445_v61  ;;  %v2446_v54 = vmul.f32 %v2442_v9, %v2426_v30 }
 0x2c2   :  { %v2453_v33 = vadd.f32 %v2449_v52, %v2423_v22  ;;  %v2450_v5 = vmul.f32 0.044715, %v2446_v54 }
 0x2c4   :  { %v2457_v51 = vmul.f32 0.7978846, %v2453_v33  ;;  %v2454_v7 = vadd.f32 %v2450_v5, %v2426_v30 }
 0x2c6   :  { %6015 = vtanh.f32 %v2457_v51  ;;  %v2458_v36 = vmul.f32 0.7978846, %v2454_v7 }
 0x2c8   :  { %6017 = vtanh.f32 %v2458_v36 }
 0x2d0   :  { %v6016_v14 = vpop.eup %6015 }
 0x2d1   :  { %v2465_v16 = vadd.f32 1.0, %v6016_v14 }
 0x2d2   :  { %v6018_v50 = vpop.eup %6017 }
 0x2d3   :  { %v2466_v2 = vadd.f32 1.0, %v6018_v50  ;;  %v2469_v24 = vmul.f32 %v2465_v16, %v2437_v60 }
 0x2d5   :  { %v2470_v43 = vmul.f32 %v2466_v2, %v2438_v26 }
 0x2d7   :  { %v2473_v62 = vpack.c.bf16 %v2470_v43, %v2469_v24  ;;  %v5714_v39 = vpack.c.bf16 %v2470_v43, %v2470_v43 }
 0x2d9   :  { %v2484_v32 = vrot.slane %v2473_v62, %v7403_v57  ;;  %v2491_v63 = vrot.slane %v5714_v39, %v7403_v57 }
 0x2db   :  { %v2492_v8 = vcombine.high %v2484_v32, %v2484_v32  ;;  %v2493_v17 = vcombine.high %v2491_v63, %v2491_v63  ;;  %v2500_v12 = vrot.slane %v2484_v32, %v7403_v57  ;;  %v2507_v4 = vrot.slane %v2491_v63, %v7403_v57 }
 0x2dd   :  { %v2514_v28 = vrot.slane %v2492_v8, %v7403_v57  ;;  %v2521_v11 = vrot.slane %v2493_v17, %v7403_v57  ;;  %v2522_v59 = vcombine.high %v2500_v12, %v2500_v12  ;;  %v2575_v1 = vrot.slane %v2500_v12, 7 }
 0x2de   :  { %v2579_v46 = vrot.slane %v2507_v4, 7  ;;  %v2523_v42 = vcombine.high %v2507_v4, %v2507_v4 }
 0x2df   :  { %v2524_v15 = vcombine.high %v2514_v28, %v2514_v28  ;;  %v2576_v29 = vrot.slane %v2514_v28, 7  ;;  %v2577_v48 = vrot.slane %v2522_v59, 7  ;;  %v2580_v56 = vrot.slane %v2521_v11, 7 }
 0x2e0   :  { %v2592_v21 = vsel %vm107_vm0, 0, %v2575_v1  ;;  %v2525_v25 = vcombine.high %v2521_v11, %v2521_v11  ;;  %v2600_v41 = vsel %vm107_vm0, 0, %v2579_v46  ;;  %v2581_v47 = vrot.slane %v2523_v42, 7 }
 0x2e1   :  { %v2578_v40 = vrot.slane %v2524_v15, 7  ;;  %v2596_v20 = vsel %vm107_vm0, 0, %v2577_v48  ;;  %v2602_v6 = vsel %vm107_vm0, 0, %v2580_v56  ;;  %v8442_v3 = vsel %vm143_vm1, %v2592_v21, 0 }
 0x2e2   :  { %v8439_v23 = vsel %vm143_vm1, %v2596_v20, 0  ;;  %v2594_v37 = vsel %vm107_vm0, 0, %v2576_v29  ;;  %v8447_v0 = vsel %vm143_vm1, %v2600_v41, 0  ;;  %v2641_v13 = vshll.u32 %v8442_v3, 16 }
 0x2e3   :  { %v2598_v53 = vsel %vm107_vm0, 0, %v2578_v40  ;;  %v8451_v19 = vsel %vm143_vm1, %v2594_v37, 0  ;;  %v8454_v34 = vsel %vm143_vm1, %v2602_v6, 0  ;;  %v2653_v18 = vshll.u32 %v8439_v23, 16 }
 0x2e4   :  { %v2647_v44 = vshll.u32 %v8451_v19, 16  ;;  %v8459_v55 = vsel %vm143_vm1, %v2598_v53, 0  ;;  %v2582_v38 = vrot.slane %v2525_v25, 7  ;;  %v2639_v49 = vshrl.u32 %v8442_v3, 16 }
 0x2e5   :  { %v2643_v45 = vrot.slane %v2641_v13, 1  ;;  %v2659_v31 = vshll.u32 %v8459_v55, 16  ;;  %v2645_v10 = vshrl.u32 %v8451_v19, 16  ;;  %v2665_v35 = vshll.u32 %v8447_v0, 16 }
 0x2e6   :  { %v2649_v22 = vrot.slane %v2647_v44, 1  ;;  %v2655_v61 = vrot.slane %v2653_v18, 1  ;;  %v2671_v9 = vshll.u32 %v8454_v34, 16  ;;  %v2606_v5 = vsel %vm107_vm0, 0, %v2582_v38 }
 0x2e7   :  { %v8465_v30 = vor.u32 %v2643_v45, %v2639_v49  ;;  %v2661_v54 = vrot.slane %v2659_v31, 1  ;;  %v2667_v33 = vrot.slane %v2665_v35, 1  ;;  %v2651_v51 = vshrl.u32 %v8439_v23, 16 }
 0x2e8   :  { %v8468_v52 = vor.u32 %v2649_v22, %v2645_v10  ;;  %v2673_v7 = vrot.slane %v2671_v9, 1  ;;  %v2657_v36 = vshrl.u32 %v8459_v55, 16  ;;  %v2663_v14 = vshrl.u32 %v8447_v0, 16 }
 0x2e9   :  { %2713 = vrot.lane.b32.xlu0 %v8465_v30, %s6064_s30  ;;  %v2669_v16 = vshrl.u32 %v8454_v34, 16  ;;  %v2604_v50 = vsel %vm107_vm0, 0, %v2581_v47  ;;  %v8480_v60 = vor.u32 %v2655_v61, %v2651_v51  ;;  %v8483_v26 = vsel %vm143_vm1, %v2606_v5, 0 }
 0x2ea   :  { %2715 = vrot.lane.b32.xlu1 %v8468_v52, %s6064_s30  ;;  %11325 = vst [vmem:[#allocation151_spill] sm:$0xff] %v8483_v26  ;;  %v8485_v2 = vor.u32 %v2661_v54, %v2657_v36  ;;  %v8487_v24 = vor.u32 %v2667_v33, %v2663_v14  ;;  %v8494_v62 = vsel %vm143_vm1, %v2604_v50, 0  ;;  %v2787_v39 = vrot.slane %v2639_v49, 1 }
 0x2eb   :  { %v8489_v43 = vor.u32 %v2673_v7, %v2669_v16  ;;  %11326 = vst [vmem:[#allocation41_spill] sm:$0xff] %v8494_v62  ;;  %v2788_v32 = vrot.slane %v2641_v13, 2  ;;  %v2790_v63 = vrot.slane %v2645_v10, 1  ;;  %v2791_v8 = vrot.slane %v2647_v44, 2 }
 0x2ec   :  { %v2793_v17 = vrot.slane %v2651_v51, 1  ;;  %v2794_v12 = vrot.slane %v2653_v18, 2  ;;  %v2796_v4 = vrot.slane %v2657_v36, 1  ;;  %v2797_v11 = vrot.slane %v2659_v31, 2 }
 0x2ed   :  { %2717 = vrot.lane.b32.xlu0 %v8480_v60, %s6064_s30  ;;  %v8498_v28 = vor.u32 %v2788_v32, %v2787_v39  ;;  %v2799_v59 = vrot.slane %v2663_v14, 1  ;;  %v2800_v1 = vrot.slane %v2665_v35, 2  ;;  %v8500_v46 = vor.u32 %v2791_v8, %v2790_v63 }
 0x2ee   :  { %2719 = vrot.lane.b32.xlu1 %v8485_v2, %s6064_s30  ;;  %v8502_v15 = vor.u32 %v2794_v12, %v2793_v17  ;;  %v2802_v29 = vrot.slane %v2669_v16, 1  ;;  %v2803_v48 = vrot.slane %v2671_v9, 2  ;;  %v8506_v56 = vor.u32 %v2797_v11, %v2796_v4 }
 0x2ef   :  { %11327 = vst [vmem:[#allocation17_spill] sm:$0xff] %v8498_v28  ;;  %11328 = vst [vmem:[#allocation22_spill] sm:$0xff] %v8500_v46  ;;  %v8508_v21 = vor.u32 %v2800_v1, %v2799_v59  ;;  %v8515_v40 = vshrl.u32 %v8494_v62, 16  ;;  %v8518_v20 = vshll.u32 %v8483_v26, 16  ;;  %v3611_v41 = vrot.slane %v2651_v51, 7 }
 0x2f0   :  { %v8512_v25 = vor.u32 %v2803_v48, %v2802_v29  ;;  %v3613_v6 = vrot.slane %v2657_v36, 7  ;;  %v3615_v53 = vrot.slane %v2663_v14, 7  ;;  %v8523_v42 = vshll.u32 %v8494_v62, 16 }
 0x2f1   :  { %2721 = vrot.lane.b32.xlu0 %v8487_v24, %s6064_s30  ;;  %v8520_v37 = vor.u32 %v3611_v41, %v2653_v18  ;;  %v3617_v44 = vrot.slane %v2669_v16, 7  ;;  %v3619_v38 = vrot.slane %v8515_v40, 7  ;;  %v8529_v49 = vshrl.u32 %v8483_v26, 16 }
 0x2f2   :  { %2723 = vrot.lane.b32.xlu1 %v8489_v43, %s6064_s30  ;;  %v8525_v13 = vor.u32 %v3613_v6, %v2659_v31  ;;  %v8531_v45 = vor.u32 %v3615_v53, %v2665_v35  ;;  %v3043_v10 = vrot.slane %v8518_v20, 1 }
 0x2f3   :  { %11329 = vst [vmem:[#allocation42_spill] sm:$0xff] %v8520_v37  ;;  %v8534_v22 = vor.u32 %v3617_v44, %v2671_v9  ;;  %v8537_v18 = vor.u32 %v3619_v38, %v8523_v42  ;;  %v3621_v31 = vrot.slane %v8529_v49, 7 }
 0x2f4   :  { %11330 = vst [vmem:[#allocation25_spill] sm:$0xff] %v8525_v13  ;;  %11331 = vst [vmem:[#allocation43_spill] sm:$0xff] %v8531_v45  ;;  %v8540_v47 = vor.u32 %v3043_v10, %v8529_v49 }
 0x2f5   :  { %11332 = vst [vmem:[#allocation153_spill] sm:$0xff] %v8534_v22  ;;  %11333 = vst [vmem:[#allocation91_spill] sm:$0xff] %v8537_v18  ;;  %v8544_v61 = vor.u32 %v3621_v31, %v8518_v20 }
 0x2f6   :  { %11334 = vst [vmem:[#allocation154_spill] sm:$0xff] %v8540_v47 }
 0x2f7   :  { %11335 = vst [vmem:[#allocation155_spill] sm:$0xff] %v8544_v61 }
 0x34c   :  { %v5810_v54 = vpop.f32.mrb[4].mxu0  ;;  %v2430_v33 = vpop.f32.mrb[4].mxu1 }
 0x34d   :  { %v5811_v5 = vpop.f32.mrb[5].mxu0  ;;  %v2432_v35 = vpop.f32.mrb[5].mxu1 }
 0x34e   :  { %v5812_v51 = vadd.f32 %v5811_v5, %v5810_v54  ;;  %v5813_v7 = vpop.f32.mrb[6].mxu0  ;;  %v2433_v36 = vpop.f32.mrb[6].mxu1 }
 0x34f   :  { %v5814_v9 = vpop.f32.mrb[7].mxu0  ;;  %v2435_v14 = vpop.f32.mrb[7].mxu1 }
 0x350   :  { %v2382_v16 = vadd.f32 %v5812_v51, %v8424_v58  ;;  %v5815_v50 = vadd.f32 %v5814_v9, %v5813_v7 }
 0x352   :  { %v2431_v39 = vadd.f32 %v2430_v33, %v2382_v16  ;;  %v2385_v32 = vadd.f32 %v5815_v50, %v8424_v58 }
 0x354   :  { %v2443_v63 = vmul.f32 %v2431_v39, %v2431_v39  ;;  %v2434_v8 = vadd.f32 %v2433_v36, %v2385_v32  ;;  %v2439_v38 = vmul.f32 0.5, %v2431_v39 }
 0x356   :  { %v2447_v17 = vmul.f32 %v2443_v63, %v2431_v39  ;;  %v2444_v12 = vmul.f32 %v2434_v8, %v2434_v8  ;;  %v2440_v10 = vmul.f32 0.5, %v2434_v8 }
 0x358   :  { %v2451_v4 = vmul.f32 0.044715, %v2447_v17  ;;  %v2448_v11 = vmul.f32 %v2444_v12, %v2434_v8 }
 0x35a   :  { %v2455_v59 = vadd.f32 %v2451_v4, %v2431_v39  ;;  %v2452_v1 = vmul.f32 0.044715, %v2448_v11 }
 0x35c   :  { %v2459_v29 = vmul.f32 0.7978846, %v2455_v59  ;;  %v2456_v48 = vadd.f32 %v2452_v1, %v2434_v8 }
 0x35e   :  { %6019 = vtanh.f32 %v2459_v29  ;;  %v2460_v41 = vmul.f32 0.7978846, %v2456_v48 }
 0x360   :  { %6021 = vtanh.f32 %v2460_v41 }
 0x368   :  { %v6020_v6 = vpop.eup %6019 }
 0x369   :  { %v2467_v53 = vadd.f32 1.0, %v6020_v6 }
 0x36a   :  { %v6022_v44 = vpop.eup %6021 }
 0x36b   :  { %v2468_v31 = vadd.f32 1.0, %v6022_v44  ;;  %v2471_v58 = vmul.f32 %v2467_v53, %v2439_v38 }
 0x36d   :  { %v2472_v54 = vmul.f32 %v2468_v31, %v2440_v10 }
 0x36f   :  { %v2474_v33 = vpack.c.bf16 %v2472_v54, %v2471_v58  ;;  %v5715_v5 = vpack.c.bf16 %v2472_v54, %v2472_v54 }
 0x371   :  { %v2533_v35 = vrot.slane %v2474_v33, %v7403_v57  ;;  %v2540_v51 = vrot.slane %v5715_v5, %v7403_v57 }
 0x373   :  { %v2541_v7 = vcombine.high %v2533_v35, %v2533_v35  ;;  %v2542_v36 = vcombine.high %v2540_v51, %v2540_v51  ;;  %v2549_v9 = vrot.slane %v2533_v35, %v7403_v57  ;;  %v2556_v14 = vrot.slane %v2540_v51, %v7403_v57 }
 0x375   :  { %v2563_v16 = vrot.slane %v2541_v7, %v7403_v57  ;;  %v2570_v50 = vrot.slane %v2542_v36, %v7403_v57  ;;  %v2571_v39 = vcombine.high %v2549_v9, %v2549_v9  ;;  %v2583_v32 = vrot.slane %v2549_v9, 7 }
 0x376   :  { %v2587_v63 = vrot.slane %v2556_v14, 7  ;;  %v2572_v10 = vcombine.high %v2556_v14, %v2556_v14 }
 0x377   :  { %v2573_v8 = vcombine.high %v2563_v16, %v2563_v16  ;;  %v2584_v17 = vrot.slane %v2563_v16, 7  ;;  %v2585_v12 = vrot.slane %v2571_v39, 7  ;;  %v2588_v4 = vrot.slane %v2570_v50, 7 }
 0x378   :  { %v2608_v11 = vsel %vm107_vm0, 0, %v2583_v32  ;;  %v2574_v59 = vcombine.high %v2570_v50, %v2570_v50  ;;  %v2616_v48 = vsel %vm107_vm0, 0, %v2587_v63  ;;  %v2589_v32 = vrot.slane %v2572_v10, 7 }
 0x379   :  { %v2586_v1 = vrot.slane %v2573_v8, 7  ;;  %v2612_v29 = vsel %vm107_vm0, 0, %v2585_v12  ;;  %v8561_v6 = vsel %vm143_vm1, %v2608_v11, 0  ;;  %v2610_v53 = vsel %vm107_vm0, 0, %v2584_v17 }
 0x37a   :  { %v8558_v41 = vsel %vm143_vm1, %v2612_v29, 0  ;;  %11337 = vst [vmem:[#allocation38_spill] sm:$0xff] %v8561_v6  ;;  %v2618_v38 = vsel %vm107_vm0, 0, %v2588_v4  ;;  %v8567_v31 = vsel %vm143_vm1, %v2616_v48, 0  ;;  %v2677_v58 = vshll.u32 %v8561_v6, 16 }
 0x37b   :  { %11336 = vst [vmem:[#allocation156_spill] sm:$0xff] %v8558_v41  ;;  %v2614_v44 = vsel %vm107_vm0, 0, %v2586_v1  ;;  %11338 = vst [vmem:[#allocation77_spill] sm:$0xff] %v8567_v31  ;;  %v8571_v54 = vsel %vm143_vm1, %v2610_v53, 0  ;;  %v2590_v33 = vrot.slane %v2574_v59, 7  ;;  %v2689_v35 = vshll.u32 %v8558_v41, 16 }
 0x37c   :  { %11339 = vst [vmem:[#allocation157_spill] sm:$0xff] %v8571_v54  ;;  %v2683_v5 = vshll.u32 %v8571_v54, 16  ;;  %v8576_v51 = vsel %vm143_vm1, %v2614_v44, 0  ;;  %v8579_v7 = vsel %vm143_vm1, %v2618_v38, 0  ;;  %v2675_v36 = vshrl.u32 %v8561_v6, 16 }
 0x37d   :  { %11340 = vst [vmem:[#allocation37_spill] sm:$0xff] %v8576_v51  ;;  %11341 = vst [vmem:[#allocation160_spill] sm:$0xff] %v8579_v7  ;;  %v2679_v9 = vrot.slane %v2677_v58, 1  ;;  %v2695_v14 = vshll.u32 %v8576_v51, 16  ;;  %v2681_v16 = vshrl.u32 %v8571_v54, 16  ;;  %v2701_v39 = vshll.u32 %v8567_v31, 16 }
 0x37e   :  { %v2685_v50 = vrot.slane %v2683_v5, 1  ;;  %v2691_v8 = vrot.slane %v2689_v35, 1  ;;  %v2622_v12 = vsel %vm107_vm0, 0, %v2590_v33  ;;  %v2707_v59 = vshll.u32 %v8579_v7, 16 }
 0x37f   :  { %v8585_v63 = vor.u32 %v2679_v9, %v2675_v36  ;;  %v2697_v17 = vrot.slane %v2695_v14, 1  ;;  %v2703_v11 = vrot.slane %v2701_v39, 1  ;;  %v2687_v1 = vshrl.u32 %v8558_v41, 16 }
 0x380   :  { %v8588_v4 = vor.u32 %v2685_v50, %v2681_v16  ;;  %v2693_v29 = vshrl.u32 %v8576_v51, 16  ;;  %v2699_v48 = vshrl.u32 %v8567_v31, 16  ;;  %v2620_v53 = vsel %vm107_vm0, 0, %v2589_v32 }
 0x381   :  { %11342 = vst [vmem:[#allocation158_spill] sm:$0xff] %v8585_v63  ;;  %2725 = vrot.lane.b32.xlu0 %v8585_v63, %s6064_s30  ;;  %v8600_v44 = vsel %vm143_vm1, %v2622_v12, 0  ;;  %v8602_v38 = vor.u32 %v2691_v8, %v2687_v1  ;;  %v2705_v33 = vshrl.u32 %v8579_v7, 16  ;;  %v2709_v50 = vrot.slane %v2707_v59, 1 }
 0x382   :  { %11343 = vst [vmem:[#allocation36_spill] sm:$0xff] %v8588_v4  ;;  %2727 = vrot.lane.b32.xlu1 %v8588_v4, %s6064_s30  ;;  %11344 = vst [vmem:[#allocation167_spill] sm:$0xff] %v8600_v44  ;;  %v8604_v10 = vor.u32 %v2697_v17, %v2693_v29  ;;  %v8607_v9 = vor.u32 %v2703_v11, %v2699_v48  ;;  %v8610_v27 = vsel %vm143_vm1, %v2620_v53, 0  ;;  %v2805_v61 = vrot.slane %v2675_v36, 1 }
 0x383   :  { %11345 = vst [vmem:[#allocation168_spill] sm:$0xff] %v8602_v38  ;;  %11348 = vst [vmem:[#allocation161_spill] sm:$0xff] %v8610_v27  ;;  %v2806_v32 = vrot.slane %v2677_v58, 2  ;;  %v2808_v18 = vrot.slane %v2681_v16, 1  ;;  %v2809_v12 = vrot.slane %v2683_v5, 2  ;;  %v2811_v22 = vrot.slane %v2687_v1, 1 }
 0x384   :  { %11346 = vst [vmem:[#allocation148_spill] sm:$0xff] %v8604_v10  ;;  %11347 = vst [vmem:[#allocation159_spill] sm:$0xff] %v8607_v9  ;;  %v2812_v8 = vrot.slane %v2689_v35, 2  ;;  %v2814_v17 = vrot.slane %v2693_v29, 1  ;;  %v2815_v45 = vrot.slane %v2695_v14, 2  ;;  %v2817_v11 = vrot.slane %v2699_v48, 1 }
 0x385   :  { %2729 = vrot.lane.b32.xlu0 %v8602_v38, %s6064_s30  ;;  %v8616_v13 = vor.u32 %v2806_v32, %v2805_v61  ;;  %v8618_v37 = vor.u32 %v2809_v12, %v2808_v18  ;;  %v2818_v53 = vrot.slane %v2701_v39, 2  ;;  %v2820_v36 = vrot.slane %v2705_v33, 1  ;;  %v11357_v12 = vld [vmem:[#allocation28_spill] sm:$0xff] }
 0x386   :  { %2731 = vrot.lane.b32.xlu1 %v8604_v10, %s6064_s30  ;;  %v8620_v57 = vor.u32 %v2709_v50, %v2705_v33  ;;  %v8622_v38 = vor.u32 %v2812_v8, %v2811_v22  ;;  %v8624_v58 = vor.u32 %v2815_v45, %v2814_v17  ;;  %v2821_v5 = vrot.slane %v2707_v59, 2 }
 0x387   :  { %11349 = vst [vmem:[#allocation74_spill] sm:$0xff] %v8616_v13  ;;  %11350 = vst [vmem:[#allocation75_spill] sm:$0xff] %v8618_v37  ;;  %v8628_v16 = vor.u32 %v2818_v53, %v2817_v11  ;;  %v8635_v18 = vshrl.u32 %v8610_v27, 16  ;;  %v8638_v50 = vshll.u32 %v8600_v44, 16  ;;  %v8641_v45 = vrot.slane %v8442_v3, 1 }
 0x388   :  { %11351 = vst [vmem:[#allocation162_spill] sm:$0xff] %v8620_v57  ;;  %11352 = vst [vmem:[#allocation57_spill] sm:$0xff] %v8622_v38  ;;  %v8632_v61 = vor.u32 %v2821_v5, %v2820_v36  ;;  %v3623_v22 = vrot.slane %v2687_v1, 7  ;;  %v3625_v32 = vrot.slane %v2693_v29, 7  ;;  %v8646_v8 = vshll.u32 %v8610_v27, 16 }
 0x389   :  { %11353 = vst [vmem:[#allocation92_spill] sm:$0xff] %v8624_v58  ;;  %2733 = vrot.lane.b32.xlu0 %v8607_v9, %s6064_s30  ;;  %11354 = vst [vmem:[#allocation150_spill] sm:$0xff] %v8628_v16  ;;  %v3627_v17 = vrot.slane %v2699_v48, 7  ;;  %v3629_v36 = vrot.slane %v2705_v33, 7  ;;  %v3631_v5 = vrot.slane %v8635_v18, 7  ;;  %v8656_v1 = vrot.slane %v8451_v19, 1 }
 0x38a   :  { %2735 = vrot.lane.b32.xlu1 %v8620_v57, %s6064_s30  ;;  %11355 = vst [vmem:[#allocation163_spill] sm:$0xff] %v8632_v61  ;;  %11356 = vst [vmem:[#allocation76_spill] sm:$0xff] %v8641_v45  ;;  %v8650_v11 = vor.u32 %v3623_v22, %v2689_v35  ;;  %v8652_v53 = vor.u32 %v3625_v32, %v2695_v14  ;;  %v8659_v29 = vshrl.u32 %v8600_v44, 16  ;;  %v3049_v48 = vrot.slane %v8638_v50, 1 }
 0x38b   :  { %11360 = vst [vmem:[#allocation59_spill] sm:$0xff] %v8656_v1  ;;  %v8665_v57 = vrot.slane %v8439_v23, 1  ;;  %v8667_v35 = vor.u32 %v3629_v36, %v2707_v59  ;;  %v8670_v14 = vor.u32 %v3631_v5, %v8646_v8  ;;  %v8683_v22 = vrot.slane %v8447_v0, 1 }
 0x38c   :  { %11358 = vst [vmem:[#allocation164_spill] sm:$0xff] %v8650_v11  ;;  %11359 = vst [vmem:[#allocation165_spill] sm:$0xff] %v8652_v53  ;;  %v8675_v33 = vor.u32 %v3049_v48, %v8659_v29  ;;  %v3633_v59 = vrot.slane %v8659_v29, 7  ;;  %v8697_v36 = vrot.slane %v8561_v6, 1  ;;  %v8704_v5 = vrot.slane %v8571_v54, 1 }
 0x38d   :  { %2761 = vrot.lane.b32.xlu0 %v11357_v12, %s6066_s8  ;;  %v8661_v12 = vor.u32 %v3627_v17, %v2701_v39  ;;  %11362 = vst [vmem:[#allocation166_spill] sm:$0xff] %v8665_v57  ;;  %11363 = vst [vmem:[#allocation60_spill] sm:$0xff] %v8667_v35  ;;  %v8680_v39 = vrot.slane %v8459_v55, 1  ;;  %v8694_v17 = vrot.slane %v8454_v34, 1  ;;  %v8707_v48 = vrot.slane %v8558_v41, 1 }
 0x38e   :  { %2763 = vrot.lane.b32.xlu1 %v8641_v45, %s6066_s8  ;;  %11364 = vst [vmem:[#allocation78_spill] sm:$0xff] %v8670_v14  ;;  %11365 = vst [vmem:[#allocation46_spill] sm:$0xff] %v8675_v33  ;;  %v8691_v32 = vor.u32 %v3633_v59, %v8638_v50  ;;  %v11373_v59 = vld [vmem:[#allocation8_spill] sm:$0xff]  ;;  %v8716_v14 = vrot.slane %v8576_v51, 1  ;;  %v8741_v35 = vrot.slane %v8451_v19, 2  ;;  %v8751_v53 = vrot.slane %v8459_v55, 2 }
 0x38f   :  { %11361 = vst [vmem:[#allocation44_spill] sm:$0xff] %v8661_v12  ;;  %11366 = vst [vmem:[#allocation61_spill] sm:$0xff] %v8680_v39  ;;  %v8744_v12 = vrot.slane %v8439_v23, 2  ;;  %v8754_v11 = vrot.slane %v8447_v0, 2  ;;  %v3086_v44 = vrot.slane %v8518_v20, 2  ;;  %v2897_v20 = vrot.slane %v8523_v42, 1 }
 0x390   :  { %11367 = vst [vmem:[#allocation87_spill] sm:$0xff] %v8683_v22  ;;  %11368 = vst [vmem:[#allocation93_spill] sm:$0xff] %v8691_v32  ;;  %v11374_v32 = vld [vmem:[#allocation45_spill] sm:$0xff] }
 0x391   :  { %2765 = vrot.lane.b32.xlu0 %v8656_v1, %s6066_s8  ;;  %11369 = vst [vmem:[#allocation62_spill] sm:$0xff] %v8694_v17  ;;  %11370 = vst [vmem:[#allocation47_spill] sm:$0xff] %v8697_v36  ;;  %v5930_v33 = vpack.i.bf16 %v11374_v32, %v11373_v59  ;;  %v3085_v32 = vrot.slane %v8529_v49, 1  ;;  %v11384_v49 = vld [vmem:[#allocation11_spill] sm:$0xff] }
 0x392   :  { %2767 = vrot.lane.b32.xlu1 %v8665_v57, %s6066_s8  ;;  %11371 = vst [vmem:[#allocation63_spill] sm:$0xff] %v8704_v5  ;;  %11372 = vst [vmem:[#allocation88_spill] sm:$0xff] %v8707_v48 }
 0x393   :  { %11375 = vst [vmem:[#allocation48_spill] sm:$0xff] %v8716_v14  ;;  %11377 = vst [vmem:[#allocation90_spill] sm:$0xff] %v8741_v35  ;;  %v8785_v9 = vor.u32 %v3086_v44, %v3085_v32  ;;  %v8805_v44 = vor.u32 %v2897_v20, %v8515_v40  ;;  %v8809_v32 = vpop.permute.xlu1 %2711 }
 0x394   :  { %11378 = vst [vmem:[#allocation49_spill] sm:$0xff] %v8744_v12  ;;  %11379 = vst [vmem:[#allocation50_spill] sm:$0xff] %v8751_v53 }
 0x395   :  { %2769 = vrot.lane.b32.xlu0 %v8680_v39, %s6066_s8  ;;  %11380 = vst [vmem:[#allocation152_spill] sm:$0xff] %v8754_v11  ;;  %11383 = vst [vmem:[#allocation52_spill] sm:$0xff] %v8785_v9 }
 0x396   :  { %2771 = vrot.lane.b32.xlu1 %v8683_v22, %s6066_s8  ;;  %11385 = vst [vmem:[#allocation53_spill] sm:$0xff] %v8805_v44 }
 0x399   :  { %2773 = vrot.lane.b32.xlu0 %v8694_v17, %s6066_s8 }
 0x39a   :  { %2775 = vrot.lane.b32.xlu1 %v8697_v36, %s6066_s8  ;;  %v2968_v36 = vrot.slane %v8523_v42, 2  ;;  %v8817_v42 = vpop.permute.xlu0 %2713 }
 0x39d   :  { %2777 = vrot.lane.b32.xlu0 %v8704_v5, %s6066_s8  ;;  %v2967_v5 = vrot.slane %v8515_v40, 1 }
 0x39e   :  { %2779 = vrot.lane.b32.xlu1 %v8707_v48, %s6066_s8  ;;  %v2973_v48 = vrot.slane %v8494_v62, 2  ;;  %v8825_v40 = vpop.permute.xlu0 %2717 }
 0x39f   :  { %v8783_v59 = vor.u32 %v2968_v36, %v2967_v5  ;;  %v8819_v36 = vpop.permute.xlu1 %2715 }
 0x3a1   :  { %2781 = vrot.lane.b32.xlu0 %v8716_v14, %s6066_s8  ;;  %v8761_v14 = vrot.slane %v8454_v34, 2  ;;  %11382 = vst [vmem:[#allocation51_spill] sm:$0xff] %v8783_v59 }
 0x3a2   :  { %5931 = vrot.lane.b32.xlu1 %v5930_v33, %s6064_s30  ;;  %v8734_v33 = vrot.slane %v8442_v3, 2 }
 0x3a3   :  { %11381 = vst [vmem:[#allocation16_spill] sm:$0xff] %v8761_v14  ;;  %v8829_v5 = vpop.permute.xlu1 %2719 }
 0x3a4   :  { %11376 = vst [vmem:[#allocation89_spill] sm:$0xff] %v8734_v33  ;;  %11386 = vst [vmem:[#allocation54_spill] sm:$0xff] %v8829_v5 }
 0x3a5   :  { %2865 = vrot.lane.b32.xlu0 %v8442_v3, %s6064_s30 }
 0x3a6   :  { %2867 = vrot.lane.b32.xlu1 %v8451_v19, %s6064_s30 }
 0x3a7   :  { %v8839_v20 = vpop.permute.xlu1 %2723 }
 0x3a9   :  { %2869 = vrot.lane.b32.xlu0 %v8439_v23, %s6064_s30 }
 0x3aa   :  { %2871 = vrot.lane.b32.xlu1 %v8459_v55, %s6064_s30 }
 0x3ad   :  { %2873 = vrot.lane.b32.xlu0 %v8447_v0, %s6064_s30 }
 0x3ae   :  { %2875 = vrot.lane.b32.xlu1 %v8454_v34, %s6064_s30 }
 0x3b1   :  { %2877 = vrot.lane.b32.xlu0 %v8494_v62, %s6064_s30 }
 0x3b2   :  { %2977 = vrot.lane.b32.xlu1 %v8734_v33, %s6064_s30 }
 0x3b5   :  { %2979 = vrot.lane.b32.xlu0 %v8741_v35, %s6064_s30 }
 0x3b6   :  { %2981 = vrot.lane.b32.xlu1 %v8744_v12, %s6064_s30 }
 0x3b9   :  { %2983 = vrot.lane.b32.xlu0 %v8751_v53, %s6064_s30 }
 0x3ba   :  { %2985 = vrot.lane.b32.xlu1 %v8754_v11, %s6064_s30 }
 0x3bd   :  { %2987 = vrot.lane.b32.xlu0 %v8761_v14, %s6064_s30 }
 0x3be   :  { %2989 = vrot.lane.b32.xlu1 %v2973_v48, %s6064_s30 }
 0x3c1   :  { %3091 = vrot.lane.b32.xlu0 %v8498_v28, %s6064_s30 }
 0x3c2   :  { %3093 = vrot.lane.b32.xlu1 %v8500_v46, %s6064_s30 }
 0x3c5   :  { %3095 = vrot.lane.b32.xlu0 %v8502_v15, %s6064_s30 }
 0x3c6   :  { %3097 = vrot.lane.b32.xlu1 %v8506_v56, %s6064_s30 }
 0x3c9   :  { %3099 = vrot.lane.b32.xlu0 %v8508_v21, %s6064_s30 }
 0x3ca   :  { %3101 = vrot.lane.b32.xlu1 %v8512_v25, %s6064_s30 }
 0x3cd   :  { %3103 = vrot.lane.b32.xlu0 %v8783_v59, %s6064_s30 }
 0x3ce   :  { %3105 = vrot.lane.b32.xlu1 %v8785_v9, %s6064_s30 }
 0x3d1   :  { %2905 = vrot.lane.b32.xlu0 %v11384_v49, %s6066_s8  ;;  %v8837_v49 = vpop.permute.xlu0 %2721 }
 0x3d2   :  { %2907 = vrot.lane.b32.xlu1 %v8465_v30, %s6066_s8  ;;  %11387 = vst [vmem:[#allocation55_spill] sm:$0xff] %v8837_v49 }
 0x3d5   :  { %2909 = vrot.lane.b32.xlu0 %v8468_v52, %s6066_s8 }
 0x3d6   :  { %2911 = vrot.lane.b32.xlu1 %v8480_v60, %s6066_s8 }
 0x3d9   :  { %2913 = vrot.lane.b32.xlu0 %v8485_v2, %s6066_s8 }
 0x3da   :  { %2915 = vrot.lane.b32.xlu1 %v8487_v24, %s6066_s8 }
 0x3dd   :  { %2917 = vrot.lane.b32.xlu0 %v8489_v43, %s6066_s8 }
 0x3de   :  { %2919 = vrot.lane.b32.xlu1 %v8805_v44, %s6066_s8 }
 0x3e1   :  { %3007 = vrot.lane.b32.xlu0 %v8442_v3, %s6066_s8 }
 0x3e2   :  { %3009 = vrot.lane.b32.xlu1 %v8451_v19, %s6066_s8 }
 0x3e5   :  { %3011 = vrot.lane.b32.xlu0 %v8439_v23, %s6066_s8 }
 0x3e6   :  { %3013 = vrot.lane.b32.xlu1 %v8459_v55, %s6066_s8 }
 0x3e9   :  { %3015 = vrot.lane.b32.xlu0 %v8447_v0, %s6066_s8 }
 0x3ea   :  { %3017 = vrot.lane.b32.xlu1 %v8454_v34, %s6066_s8 }
 0x3ed   :  { %3019 = vrot.lane.b32.xlu0 %v8494_v62, %s6066_s8 }
 0x3ee   :  { %3021 = vrot.lane.b32.xlu1 %v8483_v26, %s6066_s8 }
 0x3f1   :  { %3125 = vrot.lane.b32.xlu0 %v8734_v33, %s6066_s8 }
 0x3f2   :  { %3127 = vrot.lane.b32.xlu1 %v8741_v35, %s6066_s8 }
 0x3f3   :  { %v8845_v9 = vpop.permute.xlu0 %2725 }
 0x3f4   :  { %11388 = vst [vmem:[#allocation56_spill] sm:$0xff] %v8845_v9  ;;  %v8847_v59 = vpop.permute.xlu1 %2727 }
 0x3f5   :  { %11389 = vst [vmem:[#allocation140_spill] sm:$0xff] %v8847_v59  ;;  %3129 = vrot.lane.b32.xlu0 %v8744_v12, %s6066_s8  ;;  %v3123_v59 = vrot.slane %v8483_v26, 2 }
 0x3f6   :  { %3131 = vrot.lane.b32.xlu1 %v8751_v53, %s6066_s8 }
 0x3f7   :  { %v8853_v5 = vpop.permute.xlu0 %2729 }
 0x3f8   :  { %11390 = vst [vmem:[#allocation67_spill] sm:$0xff] %v8853_v5  ;;  %v8855_v49 = vpop.permute.xlu1 %2731 }
 0x3f9   :  { %11391 = vst [vmem:[#allocation13_spill] sm:$0xff] %v8855_v49  ;;  %3133 = vrot.lane.b32.xlu0 %v8754_v11, %s6066_s8  ;;  %v11394_v49 = vld [vmem:[#allocation39_spill] sm:$0xff] }
 0x3fa   :  { %3135 = vrot.lane.b32.xlu1 %v8761_v14, %s6066_s8 }
 0x3fb   :  { %v8861_v35 = vpop.permute.xlu0 %2733 }
 0x3fc   :  { %11392 = vst [vmem:[#allocation14_spill] sm:$0xff] %v8861_v35  ;;  %v8863_v9 = vpop.permute.xlu1 %2735 }
 0x3fd   :  { %11393 = vst [vmem:[#allocation15_spill] sm:$0xff] %v8863_v9  ;;  %3137 = vrot.lane.b32.xlu0 %v2973_v48, %s6066_s8 }
 0x3fe   :  { %3139 = vrot.lane.b32.xlu1 %v3123_v59, %s6066_s8 }
 0x3ff   :  { %v8868_v53 = vpop.permute.xlu0 %2761 }
 0x400   :  { %v8870_v5 = vpop.permute.xlu1 %2763 }
 0x401   :  { %2823 = vrot.lane.b32.xlu0 %v11394_v49, %s6068_s14 }
 0x402   :  { %2825 = vrot.lane.b32.xlu1 %v8498_v28, %s6068_s14 }
 0x403   :  { %v8876_v14 = vpop.permute.xlu0 %2765 }
 0x404   :  { %v8878_v35 = vpop.permute.xlu1 %2767 }
 0x405   :  { %2827 = vrot.lane.b32.xlu0 %v8500_v46, %s6068_s14  ;;  %v11396_v46 = vld [vmem:[#allocation84_spill] sm:$0xff] }
 0x406   :  { %2829 = vrot.lane.b32.xlu1 %v8502_v15, %s6068_s14 }
 0x407   :  { %v8884_v48 = vpop.permute.xlu0 %2769 }
 0x408   :  { %v8886_v59 = vpop.permute.xlu1 %2771 }
 0x409   :  { %2831 = vrot.lane.b32.xlu0 %v8506_v56, %s6068_s14 }
 0x40a   :  { %2833 = vrot.lane.b32.xlu1 %v8508_v21, %s6068_s14 }
 0x40b   :  { %v8892_v9 = vpop.permute.xlu0 %2773 }
 0x40c   :  { %v8894_v28 = vpop.permute.xlu1 %2775 }
 0x40d   :  { %11395 = vst [vmem:[#allocation20_spill] sm:$0xff] %v8894_v28  ;;  %2835 = vrot.lane.b32.xlu0 %v8512_v25, %s6068_s14 }
 0x40e   :  { %5936 = vrot.lane.b32.xlu1 %v11396_v46, %s6068_s14 }
 0x40f   :  { %v8900_v11 = vpop.permute.xlu0 %2777 }
 0x410   :  { %11397 = vst [vmem:[#allocation24_spill] sm:$0xff] %v8900_v11  ;;  %v8902_v12 = vpop.permute.xlu1 %2779 }
 0x411   :  { %11398 = vst [vmem:[#allocation65_spill] sm:$0xff] %v8902_v12  ;;  %2939 = vrot.lane.b32.xlu0 %v8641_v45, %s6068_s14 }
 0x412   :  { %2941 = vrot.lane.b32.xlu1 %v8656_v1, %s6068_s14  ;;  %v5967_v1 = vld [vmem:[%s10571_s4] sm:$0xff]  }
 0x413   :  { %v8908_v49 = vpop.permute.xlu0 %2781 }
 0x414   :  { %11399 = vst [vmem:[#allocation12_spill] sm:$0xff] %v8908_v49  ;;  %v8910_v33 = vpop.permute.xlu1 %5931  ;;  %v8927_v49 = vrot.slane %v8494_v62, 1 }
 0x415   :  { %2943 = vrot.lane.b32.xlu0 %v8665_v57, %s6068_s14 }
 0x416   :  { %2945 = vrot.lane.b32.xlu1 %v8680_v39, %s6068_s14  ;;  %11400 = vst [vmem:[#allocation66_spill] sm:$0xff] %v8927_v49 }
 0x417   :  { %v8916_v46 = vpop.permute.xlu0 %2865 }
 0x418   :  { %v8918_v28 = vpop.permute.xlu1 %2867 }
 0x419   :  { %2947 = vrot.lane.b32.xlu0 %v8683_v22, %s6068_s14 }
 0x41a   :  { %2949 = vrot.lane.b32.xlu1 %v8694_v17, %s6068_s14 }
 0x41b   :  { %v8924_v12 = vpop.permute.xlu0 %2869 }
 0x41c   :  { %v8929_v11 = vpop.permute.xlu1 %2871 }
 0x41d   :  { %2951 = vrot.lane.b32.xlu0 %v8927_v49, %s6068_s14 }
 0x41e   :  { %3051 = vrot.lane.b32.xlu1 %v8465_v30, %s6068_s14 }
 0x41f   :  { %v8935_v39 = vpop.permute.xlu0 %2873 }
 0x420   :  { %v8937_v57 = vpop.permute.xlu1 %2875 }
 0x421   :  { %3053 = vrot.lane.b32.xlu0 %v8468_v52, %s6068_s14  ;;  %v5965_v52 = vld [vmem:[%s10571_s4 + $0x40] sm:$0xff]  }
 0x422   :  { %3055 = vrot.lane.b32.xlu1 %v8480_v60, %s6068_s14  ;;  %v5966_v60 = vld [vmem:[%s10571_s4 + $0xc0] sm:$0xff]   ;;  %5816 = vmatprep.subr.bf16.mxu0 %v5965_v52  ;;  %v5971_v52 = vld [vmem:[%s10571_s4 + $0x8] sm:$0xff]  }
 0x423   :  { %v8943_v17 = vpop.permute.xlu0 %2877  ;;  %5844 = vmatprep.subr.bf16.mxu1 %v5966_v60  ;;  %5817 = vmatpush3.bf16.msra.mxu0 %v5967_v1  ;;  %v5972_v1 = vld [vmem:[%s10571_s4 + $0x88] sm:$0xff]  }
 0x424   :  { %v8945_v22 = vpop.permute.xlu1 %2977 }
 0x425   :  { %3057 = vrot.lane.b32.xlu0 %v8485_v2, %s6068_s14  ;;  %v5968_v2 = vld [vmem:[%s10571_s4 + $0x80] sm:$0xff]  }
 0x426   :  { %3059 = vrot.lane.b32.xlu1 %v8487_v24, %s6068_s14  ;;  %5845 = vmatpush3.bf16.msra.mxu1 %v5968_v2 }
 0x427   :  { %v8951_v30 = vpop.permute.xlu0 %2979 }
 0x428   :  { %v8953_v49 = vpop.permute.xlu1 %2981 }
 0x429   :  { %11401 = vst [vmem:[#allocation68_spill] sm:$0xff] %v8953_v49  ;;  %3061 = vrot.lane.b32.xlu0 %v8489_v43, %s6068_s14  ;;  %v5969_v43 = vld [vmem:[%s10571_s4 + $0x48] sm:$0xff]  }
 0x42a   :  { %3063 = vrot.lane.b32.xlu1 %v8805_v44, %s6068_s14  ;;  %v5970_v49 = vld [vmem:[%s10571_s4 + $0xc8] sm:$0xff]   ;;  %5818 = vmatprep.subr.bf16.mxu0 %v5969_v43  ;;  %v5974_v44 = vld [vmem:[%s10571_s4 + $0xd0] sm:$0xff]  }
 0x42b   :  { %v8971_v24 = vpop.permute.xlu0 %2983  ;;  %5846 = vmatprep.subr.bf16.mxu1 %v5970_v49  ;;  %5819 = vmatpush3.bf16.msra.mxu0 %v5971_v52  ;;  %v5975_v43 = vld [vmem:[%s10571_s4 + $0x10] sm:$0xff]  }
 0x42c   :  { %11402 = vst [vmem:[#allocation69_spill] sm:$0xff] %v8971_v24  ;;  %v8973_v45 = vpop.permute.xlu1 %2985  ;;  %5847 = vmatpush3.bf16.msra.mxu1 %v5972_v1  ;;  %v5976_v49 = vld [vmem:[%s10571_s4 + $0x90] sm:$0xff]  }
 0x42d   :  { %11403 = vst [vmem:[#allocation70_spill] sm:$0xff] %v8973_v45  ;;  %3065 = vrot.lane.b32.xlu0 %v8540_v47, %s6068_s14  ;;  %v5973_v47 = vld [vmem:[%s10571_s4 + $0x50] sm:$0xff]   ;;  %5848 = vmatprep.subr.bf16.mxu1 %v5974_v44  ;;  %v5984_v45 = vld [vmem:[%s10571_s4 + $0xa0] sm:$0xff]  }
 0x42e   :  { %3157 = vrot.lane.b32.xlu1 %v8451_v19, %s6068_s14  ;;  %5820 = vmatprep.subr.bf16.mxu0 %v5973_v47  ;;  %v5979_v47 = vld [vmem:[%s10571_s4 + $0x18] sm:$0xff]  }
 0x42f   :  { %v8991_v60 = vpop.permute.xlu0 %2987  ;;  %5821 = vmatpush3.bf16.msra.mxu0 %v5975_v43  ;;  %v5980_v43 = vld [vmem:[%s10571_s4 + $0x98] sm:$0xff]  }
 0x430   :  { %11404 = vst [vmem:[#allocation71_spill] sm:$0xff] %v8991_v60  ;;  %v8993_v2 = vpop.permute.xlu1 %2989  ;;  %5849 = vmatpush3.bf16.msra.mxu1 %v5976_v49  ;;  %v5981_v49 = vld [vmem:[%s10571_s4 + $0x60] sm:$0xff]  }
 0x431   :  { %11405 = vst [vmem:[#allocation79_spill] sm:$0xff] %v8993_v2  ;;  %3159 = vrot.lane.b32.xlu0 %v8439_v23, %s6068_s14  ;;  %v5977_v2 = vld [vmem:[%s10571_s4 + $0x58] sm:$0xff]  }
 0x432   :  { %3161 = vrot.lane.b32.xlu1 %v8459_v55, %s6068_s14  ;;  %5822 = vmatprep.subr.bf16.mxu0 %v5977_v2  ;;  %v5985_v2 = vld [vmem:[%s10571_s4 + $0x68] sm:$0xff]  }
 0x433   :  { %v9011_v52 = vpop.permute.xlu0 %3091  ;;  %5823 = vmatpush3.bf16.msra.mxu0 %v5979_v47 }
 0x434   :  { %11406 = vst [vmem:[#allocation80_spill] sm:$0xff] %v9011_v52  ;;  %v9013_v1 = vpop.permute.xlu1 %3093  ;;  %v5978_v52 = vld [vmem:[%s10571_s4 + $0xd8] sm:$0xff]   ;;  %5824 = vmatprep.subr.bf16.mxu0 %v5981_v49 }
 0x435   :  { %11407 = vst [vmem:[#allocation81_spill] sm:$0xff] %v9013_v1  ;;  %3163 = vrot.lane.b32.xlu0 %v8447_v0, %s6068_s14  ;;  %v5982_v1 = vld [vmem:[%s10571_s4 + $0xe0] sm:$0xff]   ;;  %5850 = vmatprep.subr.bf16.mxu1 %v5978_v52  ;;  %v5986_v52 = vld [vmem:[%s10571_s4 + $0xe8] sm:$0xff]  }
 0x436   :  { %3165 = vrot.lane.b32.xlu1 %v8454_v34, %s6068_s14  ;;  %5851 = vmatpush3.bf16.msra.mxu1 %v5980_v43  ;;  %v5987_v43 = vld [vmem:[%s10571_s4 + $0x28] sm:$0xff]  }
 0x437   :  { %v9028_v44 = vpop.permute.xlu0 %3095  ;;  %5852 = vmatprep.subr.bf16.mxu1 %v5982_v1  ;;  %v5988_v1 = vld [vmem:[%s10571_s4 + $0xa8] sm:$0xff]  }
 0x438   :  { %11408 = vst [vmem:[#allocation83_spill] sm:$0xff] %v9028_v44  ;;  %v9039_v60 = vpop.permute.xlu1 %3097  ;;  %v5983_v44 = vld [vmem:[%s10571_s4 + $0x20] sm:$0xff]  }
 0x439   :  { %3167 = vrot.lane.b32.xlu0 %v8494_v62, %s6068_s14  ;;  %5825 = vmatpush3.bf16.msra.mxu0 %v5983_v44  ;;  %v5989_v44 = vld [vmem:[%s10571_s4 + $0x70] sm:$0xff]  }
 0x43a   :  { %3169 = vrot.lane.b32.xlu1 %v8483_v26, %s6068_s14  ;;  %5853 = vmatpush3.bf16.msra.mxu1 %v5984_v45  ;;  %v5990_v62 = vld [vmem:[%s10571_s4 + $0xf0] sm:$0xff]  }
 0x43b   :  { %v9051_v24 = vpop.permute.xlu0 %3099  ;;  %5826 = vmatprep.subr.bf16.mxu0 %v5985_v2  ;;  %5854 = vmatprep.subr.bf16.mxu1 %v5986_v52  ;;  %v5991_v45 = vld [vmem:[%s10571_s4 + $0x30] sm:$0xff]  }
 0x43c   :  { %11409 = vst [vmem:[#allocation85_spill] sm:$0xff] %v9051_v24  ;;  %v9059_v47 = vpop.permute.xlu1 %3101  ;;  %v5992_v2 = vld [vmem:[%s10571_s4 + $0xb0] sm:$0xff]   ;;  %v9125_v24 = vrot.slane %v8571_v54, 2 }
 0x43d   :  { %11410 = vst [vmem:[#allocation86_spill] sm:$0xff] %v9059_v47  ;;  %2879 = vrot.lane.b32.xlu0 %v8561_v6, %s6064_s30  ;;  %5827 = vmatpush3.bf16.msra.mxu0 %v5987_v43  ;;  %v5993_v43 = vld [vmem:[%s10571_s4 + $0x78] sm:$0xff]  }
 0x43e   :  { %2881 = vrot.lane.b32.xlu1 %v8571_v54, %s6064_s30  ;;  %5855 = vmatpush3.bf16.msra.mxu1 %v5988_v1  ;;  %v5995_v1 = vld [vmem:[%s10571_s4 + $0x38] sm:$0xff]   ;;  %11416 = vst [vmem:[#allocation99_spill] sm:$0xff] %v9125_v24 }
 0x43f   :  { %v9071_v49 = vpop.permute.xlu0 %3103  ;;  %5828 = vmatprep.subr.bf16.mxu0 %v5989_v44  ;;  %5856 = vmatprep.subr.bf16.mxu1 %v5990_v62  ;;  %v5996_v62 = vld [vmem:[%s10571_s4 + $0xb8] sm:$0xff]  }
 0x440   :  { %11411 = vst [vmem:[#allocation95_spill] sm:$0xff] %v9071_v49  ;;  %v9079_v47 = vpop.permute.xlu1 %3105 }
 0x441   :  { %11412 = vst [vmem:[#allocation96_spill] sm:$0xff] %v9079_v47  ;;  %2883 = vrot.lane.b32.xlu0 %v8558_v41, %s6064_s30  ;;  %v5994_v47 = vld [vmem:[%s10571_s4 + $0xf8] sm:$0xff]   ;;  %5829 = vmatpush3.bf16.msra.mxu0 %v5991_v45  ;;  %v9116_v45 = vrot.slane %v8561_v6, 2 }
 0x442   :  { %2885 = vrot.lane.b32.xlu1 %v8576_v51, %s6064_s30  ;;  %5857 = vmatpush3.bf16.msra.mxu1 %v5992_v2 }
 0x443   :  { %v9091_v52 = vpop.permute.xlu0 %2905  ;;  %5830 = vmatprep.subr.bf16.mxu0 %v5993_v43  ;;  %5858 = vmatprep.subr.bf16.mxu1 %v5994_v47  ;;  %11414 = vst [vmem:[#allocation9_spill] sm:$0xff] %v9116_v45  ;;  %v9130_v47 = vrot.slane %v8558_v41, 2 }
 0x444   :  { %v9099_v49 = vpop.permute.xlu1 %2907 }
 0x445   :  { %11413 = vst [vmem:[#allocation97_spill] sm:$0xff] %v9099_v49  ;;  %2887 = vrot.lane.b32.xlu0 %v8567_v31, %s6064_s30  ;;  %5831 = vmatpush3.bf16.msra.mxu0 %v5995_v1  ;;  %11418 = vst [vmem:[#allocation31_spill] sm:$0xff] %v9130_v47 }
 0x446   :  { %2889 = vrot.lane.b32.xlu1 %v8579_v7, %s6064_s30  ;;  %5859 = vmatpush3.bf16.msra.mxu1 %v5996_v62  ;;  %v9139_v62 = vrot.slane %v8576_v51, 2 }
 0x447   :  { %v9111_v44 = vpop.permute.xlu0 %2909 }
 0x448   :  { %v9113_v49 = vpop.permute.xlu1 %2911  ;;  %11420 = vst [vmem:[#allocation33_spill] sm:$0xff] %v9139_v62 }
 0x449   :  { %2891 = vrot.lane.b32.xlu0 %v8610_v27, %s6064_s30 }
 0x44a   :  { %2991 = vrot.lane.b32.xlu1 %v9116_v45, %s6064_s30 }
 0x44b   :  { %v9122_v2 = vpop.permute.xlu0 %2913 }
 0x44c   :  { %11415 = vst [vmem:[#allocation98_spill] sm:$0xff] %v9122_v2  ;;  %v9127_v43 = vpop.permute.xlu1 %2915  ;;  %v9144_v2 = vrot.slane %v8567_v31, 2 }
 0x44d   :  { %11417 = vst [vmem:[#allocation30_spill] sm:$0xff] %v9127_v43  ;;  %2993 = vrot.lane.b32.xlu0 %v9125_v24, %s6064_s30  ;;  %v10772_v43 = vrot.slane %v8610_v27, 2 }
 0x44e   :  { %2995 = vrot.lane.b32.xlu1 %v9130_v47, %s6064_s30  ;;  %v9153_v47 = vrot.slane %v8579_v7, 2 }
 0x44f   :  { %v9136_v1 = vpop.permute.xlu0 %2917 }
 0x450   :  { %11419 = vst [vmem:[#allocation32_spill] sm:$0xff] %v9136_v1  ;;  %v9141_v45 = vpop.permute.xlu1 %2919  ;;  %11423 = vst [vmem:[#allocation138_spill] sm:$0xff] %v9153_v47 }
 0x451   :  { %11421 = vst [vmem:[#allocation100_spill] sm:$0xff] %v9141_v45  ;;  %2997 = vrot.lane.b32.xlu0 %v9139_v62, %s6064_s30 }
 0x452   :  { %2999 = vrot.lane.b32.xlu1 %v9144_v2, %s6064_s30 }
 0x453   :  { %v9150_v24 = vpop.permute.xlu0 %3007 }
 0x454   :  { %11422 = vst [vmem:[#allocation101_spill] sm:$0xff] %v9150_v24  ;;  %v9155_v1 = vpop.permute.xlu1 %3009 }
 0x455   :  { %11424 = vst [vmem:[#allocation110_spill] sm:$0xff] %v9155_v1  ;;  %3001 = vrot.lane.b32.xlu0 %v9153_v47, %s6064_s30 }
 0x456   :  { %3003 = vrot.lane.b32.xlu1 %v10772_v43, %s6064_s30 }
 0x457   :  { %v9163_v62 = vpop.permute.xlu0 %3011 }
 0x458   :  { %11425 = vst [vmem:[#allocation64_spill] sm:$0xff] %v9163_v62  ;;  %v9165_v45 = vpop.permute.xlu1 %3013  ;;  %v2971_v62 = vrot.slane %v8646_v8, 2 }
 0x459   :  { %11426 = vst [vmem:[#allocation111_spill] sm:$0xff] %v9165_v45  ;;  %3107 = vrot.lane.b32.xlu0 %v8616_v13, %s6064_s30  ;;  %v2970_v45 = vrot.slane %v8635_v18, 1 }
 0x45a   :  { %3109 = vrot.lane.b32.xlu1 %v8618_v37, %s6064_s30  ;;  %v3088_v37 = vrot.slane %v8659_v29, 1  ;;  %v9206_v29 = vrot.slane %v8567_v31, 1 }
 0x45b   :  { %v9171_v1 = vpop.permute.xlu0 %3015 }
 0x45c   :  { %11427 = vst [vmem:[#allocation112_spill] sm:$0xff] %v9171_v1  ;;  %v9173_v24 = vpop.permute.xlu1 %3017  ;;  %v3089_v1 = vrot.slane %v8638_v50, 2  ;;  %11436 = vst [vmem:[#allocation127_spill] sm:$0xff] %v9206_v29 }
 0x45d   :  { %11428 = vst [vmem:[#allocation113_spill] sm:$0xff] %v9173_v24  ;;  %3111 = vrot.lane.b32.xlu0 %v8622_v38, %s6064_s30 }
 0x45e   :  { %3113 = vrot.lane.b32.xlu1 %v8624_v58, %s6064_s30  ;;  %v9193_v58 = vor.u32 %v2971_v62, %v2970_v45  ;;  %v9197_v24 = vor.u32 %v3089_v1, %v3088_v37  ;;  %v9211_v45 = vrot.slane %v8579_v7, 1  ;;  %v3743_v62 = vshll.u32 %v8502_v15, 16 }
 0x45f   :  { %v9179_v43 = vpop.permute.xlu0 %3019 }
 0x460   :  { %11429 = vst [vmem:[#allocation114_spill] sm:$0xff] %v9179_v43  ;;  %v9183_v13 = vpop.permute.xlu1 %3021  ;;  %11432 = vst [vmem:[#allocation102_spill] sm:$0xff] %v9193_v58 }
 0x461   :  { %11430 = vst [vmem:[#allocation115_spill] sm:$0xff] %v9183_v13  ;;  %3115 = vrot.lane.b32.xlu0 %v8628_v16, %s6064_s30  ;;  %11434 = vst [vmem:[#allocation126_spill] sm:$0xff] %v9197_v24  ;;  %v3797_v16 = vshll.u32 %v8512_v25, 16 }
 0x462   :  { %3117 = vrot.lane.b32.xlu1 %v8632_v61, %s6064_s30  ;;  %11438 = vst [vmem:[#allocation129_spill] sm:$0xff] %v9211_v45 }
 0x463   :  { %v9191_v38 = vpop.permute.xlu0 %3125 }
 0x464   :  { %11431 = vst [vmem:[#allocation116_spill] sm:$0xff] %v9191_v38  ;;  %v9195_v43 = vpop.permute.xlu1 %3127 }
 0x465   :  { %11433 = vst [vmem:[#allocation124_spill] sm:$0xff] %v9195_v43  ;;  %3119 = vrot.lane.b32.xlu0 %v9193_v58, %s6064_s30  ;;  %v3779_v58 = vshll.u32 %v8508_v21, 16  ;;  %v3741_v43 = vshrl.u32 %v8502_v15, 16 }
 0x466   :  { %3121 = vrot.lane.b32.xlu1 %v9197_v24, %s6064_s30  ;;  %v3761_v24 = vshll.u32 %v8506_v56, 16 }
 0x467   :  { %v9203_v50 = vpop.permute.xlu0 %3129 }
 0x468   :  { %11435 = vst [vmem:[#allocation117_spill] sm:$0xff] %v9203_v50  ;;  %v9208_v61 = vpop.permute.xlu1 %3131  ;;  %v3781_v50 = vrot.slane %v3779_v58, 1  ;;  %v11446_v58 = vld [vmem:[#allocation159_spill] sm:$0xff] }
 0x469   :  { %11437 = vst [vmem:[#allocation128_spill] sm:$0xff] %v9208_v61  ;;  %2783 = vrot.lane.b32.xlu0 %v9206_v29, %s6066_s8  ;;  %v3763_v61 = vrot.slane %v3761_v24, 1 }
 0x46a   :  { %2785 = vrot.lane.b32.xlu1 %v9211_v45, %s6066_s8 }
 0x46b   :  { %v9217_v37 = vpop.permute.xlu0 %3133 }
 0x46c   :  { %11439 = vst [vmem:[#allocation125_spill] sm:$0xff] %v9217_v37  ;;  %v9219_v1 = vpop.permute.xlu1 %3135  ;;  %v3745_v37 = vrot.slane %v3743_v62, 1  ;;  %v3795_v62 = vshrl.u32 %v8512_v25, 16 }
 0x46d   :  { %11440 = vst [vmem:[#allocation130_spill] sm:$0xff] %v9219_v1  ;;  %2921 = vrot.lane.b32.xlu0 %v8585_v63, %s6066_s8  ;;  %v11443_v1 = vld [vmem:[#allocation168_spill] sm:$0xff]  ;;  %v3799_v63 = vrot.slane %v3797_v16, 1 }
 0x46e   :  { %2923 = vrot.lane.b32.xlu1 %v8588_v4, %s6066_s8  ;;  %v2903_v4 = vrot.slane %v8646_v8, 1  ;;  %v9246_v24 = vor.u32 %v3745_v37, %v3741_v43  ;;  %v11447_v8 = vld [vmem:[#allocation162_spill] sm:$0xff]  ;;  %v9265_v37 = vrot.slane %v8483_v26, 1 }
 0x46f   :  { %v9229_v29 = vpop.permute.xlu0 %3137 }
 0x470   :  { %11441 = vst [vmem:[#allocation107_spill] sm:$0xff] %v9229_v29  ;;  %v9231_v45 = vpop.permute.xlu1 %3139  ;;  %v3759_v29 = vshrl.u32 %v8506_v56, 16  ;;  %v9259_v47 = vor.u32 %v2903_v4, %v8635_v18  ;;  %11450 = vst [vmem:[#allocation19_spill] sm:$0xff] %v9265_v37  ;;  %v5934_v4 = vunpack.i.h.bf16 %v8910_v33  ;;  %v11452_v18 = vld [vmem:[#allocation54_spill] sm:$0xff] }
 0x471   :  { %11442 = vst [vmem:[#allocation105_spill] sm:$0xff] %v9231_v45  ;;  %2925 = vrot.lane.b32.xlu0 %v11443_v1, %s6066_s8  ;;  %v3777_v45 = vshrl.u32 %v8508_v21, 16  ;;  %v9254_v1 = vor.u32 %v3799_v63, %v3795_v62  ;;  %v5933_v63 = vunpack.i.l.bf16 %v8910_v33  ;;  %v3194_v62 = vsel %vm806_vm3, %v8439_v23, %v8825_v40  ;;  %v11471_v23 = vld [vmem:[#allocation16_spill] sm:$0xff] }
 0x472   :  { %2927 = vrot.lane.b32.xlu1 %v8604_v10, %s6066_s8  ;;  %v9250_v16 = vor.u32 %v3763_v61, %v3759_v29  ;;  %11448 = vst [vmem:[#allocation136_spill] sm:$0xff] %v9259_v47  ;;  %v11451_v29 = vld [vmem:[#allocation73_spill] sm:$0xff] }
 0x473   :  { %v9238_v38 = vpop.permute.xlu0 %2823  ;;  %v9252_v10 = vor.u32 %v3781_v50, %v3777_v45  ;;  %v3192_v45 = vsel %vm806_vm3, %v8451_v19, %v8819_v36  ;;  %v11453_v50 = vld [vmem:[#allocation55_spill] sm:$0xff]  ;;  %v3200_v19 = vsel %vm806_vm3, %v8454_v34, %v8839_v20 }
 0x474   :  { %11444 = vst [vmem:[#allocation104_spill] sm:$0xff] %v9238_v38  ;;  %v9244_v13 = vpop.permute.xlu1 %2825  ;;  %v11454_v36 = vld [vmem:[#allocation167_spill] sm:$0xff] }
 0x475   :  { %11445 = vst [vmem:[#allocation108_spill] sm:$0xff] %v9244_v13  ;;  %2929 = vrot.lane.b32.xlu0 %v11446_v58, %s6066_s8  ;;  %v11449_v13 = vld [vmem:[#allocation8_spill] sm:$0xff] }
 0x476   :  { %2931 = vrot.lane.b32.xlu1 %v11447_v8, %s6066_s8  ;;  %v3188_v43 = vsel %vm806_vm3, %v11449_v13, %v8809_v32  ;;  %v3190_v32 = vsel %vm806_vm3, %v8442_v3, %v8817_v42  ;;  %v3196_v13 = vsel %vm806_vm3, %v8459_v55, %v11452_v18  ;;  %v3198_v3 = vsel %vm806_vm3, %v8447_v0, %v11453_v50  ;;  %v11459_v18 = vld [vmem:[#allocation10_spill] sm:$0xff] }
 0x477   :  { %v2828_v38 = vpop.permute.xlu0 %2827  ;;  %v9302_v33 = vsel %vm860_vm5, %v3188_v43, %v8868_v53  ;;  %v9306_v40 = vsel %vm860_vm5, %v3190_v32, %v8870_v5  ;;  %v3218_v55 = vsel %vm860_vm5, %v3192_v45, %v8876_v14  ;;  %v3220_v0 = vsel %vm860_vm5, %v3194_v62, %v8878_v35  ;;  %v11457_v5 = vld [vmem:[#allocation45_spill] sm:$0xff]  ;;  %v11462_v32 = vld [vmem:[#allocation90_spill] sm:$0xff] }
 0x478   :  { %v2830_v61 = vpop.permute.xlu1 %2829  ;;  %11455 = vst [vmem:[#allocation120_spill] sm:$0xff] %v9302_v33  ;;  %11456 = vst [vmem:[#allocation121_spill] sm:$0xff] %v9306_v40  ;;  %v3222_v34 = vsel %vm860_vm5, %v3196_v13, %v8884_v48  ;;  %v3224_v20 = vsel %vm860_vm5, %v3198_v3, %v8886_v59  ;;  %v9320_v53 = vsel %vm860_vm5, %v3200_v19, %v8892_v9  ;;  %v11458_v14 = vld [vmem:[#allocation89_spill] sm:$0xff]  ;;  %v11460_v13 = vld [vmem:[#allocation39_spill] sm:$0xff] }
 0x479   :  { %2933 = vrot.lane.b32.xlu0 %v9259_v47, %s6066_s8  ;;  %v3267_v43 = vsel %vm806_vm3, %v11457_v5, %v5933_v63  ;;  %v3269_v35 = vsel %vm806_vm3, %v11457_v5, %v8916_v46  ;;  %v3272_v48 = vsel %vm806_vm3, %v11458_v14, %v8918_v28  ;;  %v3685_v59 = vsel %vm806_vm3, %v11459_v18, %v5933_v63  ;;  %v11463_v46 = vld [vmem:[#allocation42_spill] sm:$0xff]  ;;  %v11464_v28 = vld [vmem:[#allocation49_spill] sm:$0xff] }
 0x47a   :  { %3023 = vrot.lane.b32.xlu1 %v8561_v6, %s6066_s8  ;;  %v9336_v9 = vsel %vm806_vm3, %v11460_v13, %v5934_v4  ;;  %v9343_v45 = vsel %vm806_vm3, %v11462_v32, %v8924_v12  ;;  %v3672_v62 = vsel %vm806_vm3, %v11463_v46, %v8924_v12  ;;  %v9351_v63 = vsel %vm806_vm3, %v11464_v28, %v8929_v11  ;;  %v11465_v4 = vld [vmem:[#allocation25_spill] sm:$0xff]  ;;  %v11466_v14 = vld [vmem:[#allocation50_spill] sm:$0xff]  ;;  %v11467_v13 = vld [vmem:[#allocation43_spill] sm:$0xff] }
 0x47b   :  { %v2832_v42 = vpop.permute.xlu0 %2831  ;;  %11461 = vst [vmem:[#allocation58_spill] sm:$0xff] %v9336_v9  ;;  %v3674_v3 = vsel %vm806_vm3, %v11465_v4, %v8929_v11  ;;  %v9361_v18 = vsel %vm806_vm3, %v11466_v14, %v8935_v39  ;;  %v3676_v12 = vsel %vm806_vm3, %v11467_v13, %v8935_v39  ;;  %v11468_v32 = vld [vmem:[#allocation152_spill] sm:$0xff]  ;;  %v11469_v28 = vld [vmem:[#allocation153_spill] sm:$0xff]  ;;  %v9379_v14 = vsel %vm806_vm3, %v11471_v23, %v8943_v17  ;;  %v11472_v6 = vld [vmem:[#allocation91_spill] sm:$0xff] }
 0x47c   :  { %v9312_v50 = vpop.permute.xlu1 %2833  ;;  %v9369_v46 = vsel %vm806_vm3, %v11468_v32, %v8937_v57  ;;  %v3678_v11 = vsel %vm806_vm3, %v11469_v28, %v8937_v57  ;;  %v9384_v39 = vsel %vm806_vm3, %v11472_v6, %v8943_v17  ;;  %v11473_v13 = vld [vmem:[#allocation17_spill] sm:$0xff]  ;;  %v9392_v5 = vsel %vm918_vm7, %v3218_v55, %v2828_v38  ;;  %v11475_v57 = vld [vmem:[#allocation22_spill] sm:$0xff]  ;;  %v11476_v28 = vld [vmem:[#allocation68_spill] sm:$0xff] }
 0x47d   :  { %3025 = vrot.lane.b32.xlu0 %v8571_v54, %s6066_s8  ;;  %v9389_v32 = vsel %vm806_vm3, %v11473_v13, %v8945_v22  ;;  %11474 = vst [vmem:[#allocation142_spill] sm:$0xff] %v9392_v5  ;;  %v9399_v23 = vsel %vm806_vm3, %v11475_v57, %v8951_v30  ;;  %v9404_v6 = vsel %vm806_vm3, %v8502_v15, %v11476_v28  ;;  %v11477_v17 = vld [vmem:[#allocation69_spill] sm:$0xff]  ;;  %v11478_v55 = vld [vmem:[#allocation70_spill] sm:$0xff]  ;;  %v11479_v13 = vld [vmem:[#allocation71_spill] sm:$0xff] }
 0x47e   :  { %3027 = vrot.lane.b32.xlu1 %v8558_v41, %s6066_s8  ;;  %v9409_v22 = vsel %vm806_vm3, %v8506_v56, %v11477_v17  ;;  %v9417_v30 = vsel %vm806_vm3, %v8508_v21, %v11478_v55  ;;  %v9422_v15 = vsel %vm806_vm3, %v8512_v25, %v11479_v13  ;;  %v3706_v57 = vsel %vm860_vm5, %v3685_v59, %v9091_v52  ;;  %v11481_v17 = vld [vmem:[#allocation79_spill] sm:$0xff]  ;;  %v11483_v21 = vld [vmem:[#allocation80_spill] sm:$0xff]  ;;  %v11492_v47 = vld [vmem:[#allocation85_spill] sm:$0xff] }
 0x47f   :  { %v9356_v19 = vpop.permute.xlu0 %2835  ;;  %v9427_v56 = vsel %vm918_vm7, %v3220_v0, %v2830_v61  ;;  %v11482_v38 = vld [vmem:[#allocation51_spill] sm:$0xff]  ;;  %v11484_v55 = vld [vmem:[#allocation76_spill] sm:$0xff]  ;;  %v3731_v25 = vshll.u32 %v9392_v5, 16  ;;  %v11487_v0 = vld [vmem:[#allocation81_spill] sm:$0xff]  ;;  %v9519_v58 = vsel %vm918_vm7, %v3224_v20, %v9312_v50 }
 0x480   :  { %v9374_v4 = vpop.permute.xlu1 %5936  ;;  %11480 = vst [vmem:[#allocation143_spill] sm:$0xff] %v9427_v56  ;;  %v9434_v26 = vsel %vm806_vm3, %v11482_v38, %v11481_v17  ;;  %v11489_v17 = vld [vmem:[#allocation83_spill] sm:$0xff]  ;;  %v11490_v38 = vld [vmem:[#allocation166_spill] sm:$0xff]  ;;  %v3785_v33 = vshll.u32 %v9519_v58, 16 }
 0x481   :  { %11470 = vst [vmem:[#allocation133_spill] sm:$0xff] %v9374_v4  ;;  %3029 = vrot.lane.b32.xlu0 %v8576_v51, %s6066_s8  ;;  %v11485_v13 = vunpack.i.l.bf16 %v9374_v4  ;;  %v11488_v51 = vld [vmem:[#allocation59_spill] sm:$0xff]  ;;  %v9457_v54 = vsel %vm806_vm3, %v11490_v38, %v11489_v17  ;;  %v11499_v17 = vld [vmem:[#allocation66_spill] sm:$0xff] }
 0x482   :  { %3031 = vrot.lane.b32.xlu1 %v8567_v31, %s6066_s8  ;;  %v9439_v31 = vsel %vm806_vm3, %v11484_v55, %v11483_v21  ;;  %v9452_v41 = vsel %vm806_vm3, %v11488_v51, %v11487_v0  ;;  %v11491_v21 = vld [vmem:[#allocation61_spill] sm:$0xff]  ;;  %v11495_v51 = vld [vmem:[#allocation86_spill] sm:$0xff]  ;;  %v11498_v38 = vld [vmem:[#allocation95_spill] sm:$0xff] }
 0x483   :  { %v9429_v28 = vpop.permute.xlu0 %2939  ;;  %v9445_v59 = vsel %vm918_vm7, %v3706_v57, %v11485_v13  ;;  %v9462_v55 = vsel %vm806_vm3, %v11491_v21, %v9039_v60  ;;  %v11493_v57 = vld [vmem:[#allocation87_spill] sm:$0xff]  ;;  %v11496_v0 = vld [vmem:[#allocation62_spill] sm:$0xff]  ;;  %v9479_v8 = vsel %vm806_vm3, %v11499_v17, %v11498_v38  ;;  %v3749_v60 = vshll.u32 %v9427_v56, 16 }
 0x484   :  { %11486 = vst [vmem:[#allocation123_spill] sm:$0xff] %v9445_v59  ;;  %v9447_v61 = vpop.permute.xlu1 %2941  ;;  %v9467_v13 = vsel %vm806_vm3, %v11493_v57, %v11492_v47  ;;  %v9474_v59 = vsel %vm806_vm3, %v11496_v0, %v11495_v51  ;;  %11500 = vst [vmem:[#allocation144_spill] sm:$0xff] %v9479_v8  ;;  %v9483_v21 = vsel %vm918_vm7, %v3222_v34, %v2832_v42  ;;  %v11502_v47 = vld [vmem:[#allocation96_spill] sm:$0xff]  ;;  %v11504_v0 = vld [vmem:[#allocation97_spill] sm:$0xff] }
 0x485   :  { %11494 = vst [vmem:[#allocation122_spill] sm:$0xff] %v9467_v13  ;;  %3033 = vrot.lane.b32.xlu0 %v8579_v7, %s6066_s8  ;;  %11497 = vst [vmem:[#allocation21_spill] sm:$0xff] %v9474_v59  ;;  %v9490_v57 = vsel %vm806_vm3, %v9265_v37, %v11502_v47  ;;  %v9494_v51 = vsel %vm860_vm5, %v3267_v43, %v9091_v52  ;;  %v9498_v38 = vsel %vm860_vm5, %v3269_v35, %v11504_v0  ;;  %v11507_v7 = vld [vmem:[#allocation98_spill] sm:$0xff]  ;;  %v11515_v13 = vld [vmem:[#allocation31_spill] sm:$0xff] }
 0x486   :  { %11501 = vst [vmem:[#allocation146_spill] sm:$0xff] %v9483_v21  ;;  %3035 = vrot.lane.b32.xlu1 %v8610_v27, %s6066_s8  ;;  %11503 = vst [vmem:[#allocation134_spill] sm:$0xff] %v9490_v57  ;;  %v3699_v42 = vsel %vm860_vm5, %v3672_v62, %v9113_v49  ;;  %v9506_v17 = vsel %vm860_vm5, %v3272_v48, %v9111_v44  ;;  %v3700_v47 = vsel %vm860_vm5, %v3674_v3, %v11507_v7  ;;  %v11509_v35 = vld [vmem:[#allocation30_spill] sm:$0xff]  ;;  %v11510_v48 = vld [vmem:[#allocation32_spill] sm:$0xff] }
 0x487   :  { %v9502_v34 = vpop.permute.xlu0 %2943  ;;  %11506 = vst [vmem:[#allocation26_spill] sm:$0xff] %v9506_v17  ;;  %v3733_v37 = vrot.slane %v3731_v25, 1  ;;  %v3701_v0 = vsel %vm860_vm5, %v3676_v12, %v11509_v35  ;;  %v3767_v62 = vshll.u32 %v9483_v21, 16  ;;  %v3702_v3 = vsel %vm860_vm5, %v3678_v11, %v11510_v48  ;;  %v11511_v12 = vld [vmem:[#allocation9_spill] sm:$0xff] }
 0x488   :  { %11505 = vst [vmem:[#allocation135_spill] sm:$0xff] %v9502_v34  ;;  %v3714_v52 = vsel %vm918_vm7, %v3699_v42, %v9502_v34  ;;  %v9512_v43 = vpop.permute.xlu1 %2945  ;;  %v3729_v25 = vshrl.u32 %v9392_v5, 16  ;;  %v3751_v42 = vrot.slane %v3749_v60, 1  ;;  %v3747_v57 = vshrl.u32 %v9427_v56, 16  ;;  %v11513_v5 = vld [vmem:[#allocation99_spill] sm:$0xff] }
 0x489   :  { %11508 = vst [vmem:[#allocation149_spill] sm:$0xff] %v9512_v43  ;;  %v3737_v44 = vshll.u32 %v3714_v52, 16  ;;  %3037 = vrot.lane.b32.xlu0 %v11454_v36, %s6066_s8  ;;  %v3715_v8 = vsel %vm918_vm7, %v3700_v47, %v9512_v43  ;;  %v3735_v50 = vshrl.u32 %v3714_v52, 16  ;;  %v9537_v11 = vsel %vm918_vm7, %v9320_v53, %v9356_v19 }
 0x48a   :  { %3141 = vrot.lane.b32.xlu1 %v11511_v12, %s6066_s8  ;;  %v3755_v59 = vshll.u32 %v3715_v8, 16  ;;  %v3734_v40 = vor.u32 %v3733_v37, %v3729_v25  ;;  %v3769_v12 = vrot.slane %v3767_v62, 1  ;;  %v3753_v52 = vshrl.u32 %v3715_v8, 16  ;;  %v11514_v37 = vld [vmem:[#allocation100_spill] sm:$0xff] }
 0x48b   :  { %v3739_v20 = vrot.slane %v3737_v44, 1  ;;  %v9531_v34 = vpop.permute.xlu0 %2947  ;;  %v3703_v25 = vsel %vm860_vm5, %v9384_v39, %v11514_v37  ;;  %v3752_v43 = vor.u32 %v3751_v42, %v3747_v57  ;;  %v3765_v53 = vshrl.u32 %v9483_v21, 16 }
 0x48c   :  { %11512 = vst [vmem:[#allocation109_spill] sm:$0xff] %v9531_v34  ;;  %v3716_v60 = vsel %vm918_vm7, %v3701_v0, %v9531_v34  ;;  %v9541_v47 = vpop.permute.xlu1 %2949  ;;  %v3757_v44 = vrot.slane %v3755_v59, 1  ;;  %v3803_v0 = vshll.u32 %v9537_v11, 16  ;;  %v3783_v21 = vshrl.u32 %v9519_v58, 16 }
 0x48d   :  { %v3740_v56 = vor.u32 %v3739_v20, %v3735_v50  ;;  %3143 = vrot.lane.b32.xlu0 %v11513_v5, %s6066_s8  ;;  %v3773_v19 = vshll.u32 %v3716_v60, 16  ;;  %v3717_v8 = vsel %vm918_vm7, %v3702_v3, %v9541_v47  ;;  %v3787_v20 = vrot.slane %v3785_v33, 1 }
 0x48e   :  { %3145 = vrot.lane.b32.xlu1 %v11515_v13, %s6066_s8  ;;  %v3758_v50 = vor.u32 %v3757_v44, %v3753_v52  ;;  %v3771_v5 = vshrl.u32 %v3716_v60, 16  ;;  %v3791_v39 = vshll.u32 %v3717_v8, 16  ;;  %v3770_v42 = vor.u32 %v3769_v12, %v3765_v53 }
 0x48f   :  { %v4033_v62 = vcombine.low %v3734_v40, %v3740_v56  ;;  %v9554_v59 = vpop.permute.xlu0 %2951  ;;  %v3775_v34 = vrot.slane %v3773_v19, 1  ;;  %v11516_v40 = vld [vmem:[#allocation33_spill] sm:$0xff]  ;;  %v3789_v52 = vshrl.u32 %v3717_v8, 16  ;;  %v3805_v60 = vrot.slane %v3803_v0, 1 }
 0x490   :  { %v9556_v57 = vpop.permute.xlu1 %3051  ;;  %v4081_v17 = vcombine.low %v3752_v43, %v3758_v50  ;;  %v3793_v3 = vrot.slane %v3791_v39, 1  ;;  %v3718_v33 = vsel %vm918_vm7, %v3703_v25, %v9554_v59  ;;  %v11517_v12 = vrot.slane %v9246_v24, %v11451_v29  ;;  %v11519_v39 = vld [vmem:[#allocation138_spill] sm:$0xff] }
 0x491   :  { %v4054_v13 = vrot.slane %v4033_v62, %v11451_v29  ;;  %3147 = vrot.lane.b32.xlu0 %v11516_v40, %s6066_s8  ;;  %v3776_v56 = vor.u32 %v3775_v34, %v3771_v5  ;;  %v3809_v43 = vshll.u32 %v3718_v33, 16  ;;  %v3315_v5 = vsel %vm860_vm5, %v9343_v45, %v9113_v49 }
 0x492   :  { %3149 = vrot.lane.b32.xlu1 %v9144_v2, %s6066_s8  ;;  %v4102_v53 = vrot.slane %v4081_v17, %v11451_v29  ;;  %v3788_v34 = vor.u32 %v3787_v20, %v3783_v21  ;;  %v3794_v25 = vor.u32 %v3793_v3, %v3789_v52  ;;  %v3801_v0 = vshrl.u32 %v9537_v11, 16 }
 0x493   :  { %v4063_v44 = vcombine.low %v4054_v13, %v11517_v12  ;;  %v9570_v19 = vpop.permute.xlu0 %3053  ;;  %v4129_v62 = vcombine.low %v3770_v42, %v3776_v56  ;;  %v11518_v24 = vrot.slane %v9250_v16, %v11451_v29  ;;  %v3807_v8 = vshrl.u32 %v3718_v33, 16 }
 0x494   :  { %v9575_v50 = vpop.permute.xlu1 %3055  ;;  %v3811_v17 = vrot.slane %v3809_v43, 1  ;;  %v3317_v49 = vsel %vm860_vm5, %v9351_v63, %v11507_v7  ;;  %v9589_v45 = vsel %vm860_vm5, %v9361_v18, %v11509_v35  ;;  %v4177_v20 = vcombine.low %v3788_v34, %v3794_v25  ;;  %v11525_v43 = vld [vmem:[#allocation110_spill] sm:$0xff] }
 0x495   :  { %v4111_v13 = vcombine.low %v4102_v53, %v11518_v24  ;;  %3151 = vrot.lane.b32.xlu0 %v11519_v39, %s6066_s8  ;;  %v4150_v21 = vrot.slane %v4129_v62, %v11451_v29  ;;  %v11520_v16 = vrot.slane %v8610_v27, 2  ;;  %v9595_v42 = vor.u32 %v3805_v60, %v3801_v0  ;;  %v11528_v62 = vld [vmem:[#allocation111_spill] sm:$0xff]  ;;  %v11529_v0 = vld [vmem:[#allocation112_spill] sm:$0xff] }
 0x496   :  { %v9597_v56 = vor.u32 %v3811_v17, %v3807_v8  ;;  %v4077_v7 = vrot.slane %v4063_v44, %v11451_v29  ;;  %v9606_v18 = vsel %vm860_vm5, %v9369_v46, %v11510_v48  ;;  %v9611_v35 = vsel %vm860_vm5, %v9379_v14, %v11514_v37  ;;  %v11524_v44 = vld [vmem:[#allocation101_spill] sm:$0xff]  ;;  %v11527_v37 = vld [vmem:[#allocation64_spill] sm:$0xff]  ;;  %v11531_v8 = vld [vmem:[#allocation74_spill] sm:$0xff] }
 0x497   :  { %3153 = vrot.lane.b32.xlu1 %v11520_v16, %s6066_s8  ;;  %11521 = vst [vmem:[#allocation118_spill] sm:$0xff] %v9595_v42  ;;  %v9599_v52 = vpop.permute.xlu0 %3057  ;;  %v4125_v63 = vrot.slane %v4111_v13, %v11451_v29  ;;  %v11523_v3 = vrot.slane %v9252_v10, %v11451_v29  ;;  %v4198_v60 = vrot.slane %v4177_v20, %v11451_v29  ;;  %v11526_v48 = vrot.slane %v11454_v36, 2  ;;  %v11532_v17 = vld [vmem:[#allocation113_spill] sm:$0xff]  ;;  %v11534_v20 = vld [vmem:[#allocation115_spill] sm:$0xff]  ;;  %v11535_v16 = vld [vmem:[#allocation116_spill] sm:$0xff] }
 0x498   :  { %11522 = vst [vmem:[#allocation147_spill] sm:$0xff] %v9597_v56  ;;  %v9617_v12 = vpop.permute.xlu1 %3059  ;;  %v3413_v53 = vsel %vm860_vm5, %v9336_v9, %v11524_v44  ;;  %v3415_v46 = vsel %vm860_vm5, %v9389_v32, %v11525_v43  ;;  %v3417_v34 = vsel %vm860_vm5, %v9399_v23, %v11527_v37  ;;  %v9636_v25 = vsel %vm860_vm5, %v9404_v6, %v11528_v62  ;;  %v11537_v44 = vld [vmem:[#allocation124_spill] sm:$0xff]  ;;  %v11538_v43 = vld [vmem:[#allocation117_spill] sm:$0xff]  ;;  %v11557_v14 = vld [vmem:[#allocation134_spill] sm:$0xff] }
 0x499   :  { %v4159_v33 = vcombine.low %v4150_v21, %v11523_v3  ;;  %3155 = vrot.lane.b32.xlu0 %v11526_v48, %s6066_s8  ;;  %v5718_v10 = vcombine.low %v4077_v7, %v4125_v63  ;;  %v9641_v32 = vsel %vm860_vm5, %v9409_v22, %v11529_v0  ;;  %v11530_v24 = vrot.slane %v9254_v1, %v11451_v29  ;;  %v11533_v21 = vld [vmem:[#allocation114_spill] sm:$0xff]  ;;  %v11539_v37 = vld [vmem:[#allocation128_spill] sm:$0xff]  ;;  %v11542_v62 = vld [vmem:[#allocation125_spill] sm:$0xff] }
 0x49a   :  { %v9651_v23 = vsel %vm860_vm5, %v9417_v30, %v11532_v17  ;;  %v9656_v6 = vsel %vm860_vm5, %v9422_v15, %v11533_v21  ;;  %v3427_v22 = vsel %vm860_vm5, %v9434_v26, %v11534_v20  ;;  %v3525_v1 = vsel %vm860_vm5, %v9439_v31, %v11535_v16  ;;  %v11543_v0 = vld [vmem:[#allocation122_spill] sm:$0xff]  ;;  %v11548_v21 = vld [vmem:[#allocation121_spill] sm:$0xff]  ;;  %v11598_v42 = vld [vmem:[#allocation19_spill] sm:$0xff] }
 0x49b   :  { %v4207_v13 = vcombine.low %v4198_v60, %v11530_v24  ;;  %2837 = vrot.lane.b32.xlu1 %v11531_v8, %s6068_s14  ;;  %v9664_v7 = vpop.permute.xlu0 %3061  ;;  %v11536_v63 = vunpack.i.l.bf16 %v9374_v4  ;;  %v3341_v15 = vsel %vm918_vm7, %v9498_v38, %v9429_v28  ;;  %v4173_v60 = vrot.slane %v4159_v33, %v11451_v29  ;;  %v11540_v28 = vld [vmem:[#allocation26_spill] sm:$0xff]  ;;  %v11541_v33 = vld [vmem:[#allocation75_spill] sm:$0xff]  ;;  %v11549_v20 = vld [vmem:[#allocation57_spill] sm:$0xff] }
 0x49c   :  { %v9673_v3 = vpop.permute.xlu1 %3063  ;;  %v3527_v31 = vsel %vm860_vm5, %v9452_v41, %v11537_v44  ;;  %v3529_v48 = vsel %vm860_vm5, %v9457_v54, %v11538_v43  ;;  %v3343_v38 = vsel %vm918_vm7, %v11540_v28, %v9447_v61  ;;  %v3533_v24 = vsel %vm860_vm5, %v11543_v0, %v11542_v62  ;;  %v11544_v41 = vld [vmem:[#allocation104_spill] sm:$0xff]  ;;  %v11550_v43 = vld [vmem:[#allocation135_spill] sm:$0xff]  ;;  %v11551_v0 = vld [vmem:[#allocation149_spill] sm:$0xff] }
 0x49d   :  { %v3339_v30 = vsel %vm918_vm7, %v9494_v51, %v11536_v63  ;;  %v4221_v26 = vrot.slane %v4207_v13, %v11451_v29  ;;  %v3531_v51 = vsel %vm860_vm5, %v9462_v55, %v11539_v37  ;;  %2839 = vrot.lane.b32.xlu0 %v11541_v33, %s6068_s14  ;;  %v11545_v13 = vld [vmem:[#allocation120_spill] sm:$0xff]  ;;  %v3345_v37 = vsel %vm918_vm7, %v3315_v5, %v11550_v43 }
 0x49e   :  { %v9697_v17 = vsel %vm918_vm7, %v11545_v13, %v11544_v41  ;;  %v11547_v54 = vld [vmem:[#allocation108_spill] sm:$0xff]  ;;  %v3347_v41 = vsel %vm918_vm7, %v3317_v49, %v11551_v0  ;;  %v11560_v0 = vld [vmem:[#allocation150_spill] sm:$0xff] }
 0x49f   :  { %11546 = vst [vmem:[#allocation145_spill] sm:$0xff] %v9697_v17  ;;  %v3242_v55 = vsel %vm918_vm7, %v11548_v21, %v11547_v54  ;;  %2841 = vrot.lane.b32.xlu1 %v11549_v20, %s6068_s14  ;;  %v5720_v61 = vcombine.low %v4173_v60, %v4221_v26  ;;  %v4031_v63 = vcombine.low %v9697_v17, %v3339_v30  ;;  %v3066_v28 = vpop.permute.xlu0 %3065  ;;  %v11554_v26 = vld [vmem:[#allocation130_spill] sm:$0xff]  ;;  %v11555_v21 = vld [vmem:[#allocation21_spill] sm:$0xff]  ;;  %v11558_v49 = vld [vmem:[#allocation92_spill] sm:$0xff] }
 0x4a0   :  { %v4079_v44 = vcombine.low %v9697_v17, %v3341_v15  ;;  %v4127_v62 = vcombine.low %v3242_v55, %v3343_v38  ;;  %v3158_v13 = vpop.permute.xlu1 %3157  ;;  %v9712_v54 = vrot.slane %v5718_v10, %v11451_v29  ;;  %v3535_v30 = vsel %vm860_vm5, %v11555_v21, %v11554_v26  ;;  %v11556_v15 = vld [vmem:[#allocation105_spill] sm:$0xff]  ;;  %v11559_v55 = vld [vmem:[#allocation142_spill] sm:$0xff]  ;;  %v11561_v21 = vld [vmem:[#allocation107_spill] sm:$0xff] }
 0x4a1   :  { %v9715_v60 = vrot.slane %v5720_v61, %v11451_v29  ;;  %v3539_v5 = vsel %vm860_vm5, %v11557_v14, %v11556_v15  ;;  %v3445_v38 = vsel %vm918_vm7, %v3413_v53, %v9556_v57  ;;  %2843 = vrot.lane.b32.xlu0 %v11558_v49, %s6068_s14  ;;  %v3557_v10 = vsel %vm918_vm7, %v3525_v1, %v3158_v13  ;;  %v11562_v15 = vld [vmem:[#allocation144_spill] sm:$0xff]  ;;  %v11563_v53 = vld [vmem:[#allocation143_spill] sm:$0xff] }
 0x4a2   :  { %11552 = vst [vmem:[#allocation23_spill] sm:$0xff] %v9712_v54  ;;  %v4175_v43 = vcombine.low %v11559_v55, %v3345_v37  ;;  %v4032_v61 = vcombine.low %v3445_v38, %v3557_v10  ;;  %v3537_v57 = vsel %vm860_vm5, %v11562_v15, %v11561_v21  ;;  %v4223_v16 = vcombine.low %v11563_v53, %v3347_v41 }
 0x4a3   :  { %11553 = vst [vmem:[#allocation40_spill] sm:$0xff] %v9715_v60  ;;  %2845 = vrot.lane.b32.xlu1 %v11560_v0, %s6068_s14  ;;  %v11564_v1 = vunpack.i.h.bf16 %v9374_v4  ;;  %v9743_v13 = vrot.slane %v4031_v63, %v11451_v29  ;;  %v3160_v38 = vpop.permute.xlu0 %3159  ;;  %v4088_v10 = vrot.slane %v4079_v44, %v11451_v29  ;;  %v4136_v55 = vrot.slane %v4127_v62, %v11451_v29  ;;  %v11566_v63 = vld [vmem:[#allocation163_spill] sm:$0xff]  ;;  %v11567_v62 = vld [vmem:[#allocation109_spill] sm:$0xff] }
 0x4a4   :  { %v3447_v14 = vsel %vm918_vm7, %v3415_v46, %v9570_v19  ;;  %v3559_v26 = vsel %vm918_vm7, %v3527_v31, %v3160_v38  ;;  %v3162_v21 = vpop.permute.xlu1 %3161  ;;  %v3449_v41 = vsel %vm918_vm7, %v3417_v34, %v9575_v50  ;;  %v3459_v15 = vsel %vm918_vm7, %v3427_v22, %v3066_v28  ;;  %v11570_v38 = vld [vmem:[#allocation146_spill] sm:$0xff] }
 0x4a5   :  { %v3571_v37 = vsel %vm918_vm7, %v3539_v5, %v11564_v1  ;;  %11565 = vst [vmem:[#allocation137_spill] sm:$0xff] %v9743_v13  ;;  %v4080_v5 = vcombine.low %v3447_v14, %v3559_v26  ;;  %2847 = vrot.lane.b32.xlu0 %v11566_v63, %s6068_s14  ;;  %v3561_v53 = vsel %vm918_vm7, %v3529_v48, %v3162_v21  ;;  %v11568_v1 = vld [vmem:[#allocation47_spill] sm:$0xff]  ;;  %v9939_v54 = vrot.slane %v11454_v36, 1 }
 0x4a6   :  { %v4184_v44 = vrot.slane %v4175_v43, %v11451_v29  ;;  %v3349_v19 = vsel %vm918_vm7, %v9589_v45, %v11567_v62  ;;  %v4047_v46 = vrot.slane %v4032_v61, %v11451_v29  ;;  %v4128_v31 = vcombine.low %v3449_v41, %v3561_v53 }
 0x4a7   :  { %2953 = vrot.lane.b32.xlu1 %v11568_v1, %s6068_s14  ;;  %v4232_v50 = vrot.slane %v4223_v16, %v11451_v29  ;;  %v3351_v34 = vsel %vm918_vm7, %v9606_v18, %v9541_v47  ;;  %v3353_v22 = vsel %vm918_vm7, %v9611_v35, %v9554_v59  ;;  %v4095_v48 = vrot.slane %v4080_v5, %v11451_v29  ;;  %v3164_v28 = vpop.permute.xlu0 %3163  ;;  %v11569_v59 = vld [vmem:[#allocation63_spill] sm:$0xff] }
 0x4a8   :  { %v3451_v45 = vsel %vm918_vm7, %v9636_v25, %v9599_v52  ;;  %v4368_v43 = vcombine.low %v3459_v15, %v3571_v37  ;;  %v4143_v61 = vrot.slane %v4128_v31, %v11451_v29  ;;  %v3563_v16 = vsel %vm918_vm7, %v3531_v51, %v3164_v28  ;;  %v3166_v26 = vpop.permute.xlu1 %3165  ;;  %v11571_v51 = vld [vmem:[#allocation88_spill] sm:$0xff] }
 0x4a9   :  { %v3453_v47 = vsel %vm918_vm7, %v9641_v32, %v9617_v12  ;;  %v4110_v18 = vcombine.low %v4088_v10, %v4095_v48  ;;  %v4176_v14 = vcombine.low %v3451_v45, %v3563_v16  ;;  %2955 = vrot.lane.b32.xlu0 %v11569_v59, %s6068_s14  ;;  %v3565_v35 = vsel %vm918_vm7, %v3533_v24, %v3166_v26 }
 0x4aa   :  { %v4271_v21 = vcombine.low %v11570_v38, %v3349_v19  ;;  %v4367_v52 = vcombine.low %v9537_v11, %v3353_v22  ;;  %v4062_v25 = vcombine.low %v9743_v13, %v4047_v46  ;;  %v4224_v37 = vcombine.low %v3453_v47, %v3565_v35 }
 0x4ab   :  { %2957 = vrot.lane.b32.xlu1 %v11571_v51, %s6068_s14  ;;  %v4319_v41 = vcombine.low %v9519_v58, %v3351_v34  ;;  %v3455_v12 = vsel %vm918_vm7, %v9651_v23, %v9664_v7  ;;  %v4158_v32 = vcombine.low %v4136_v55, %v4143_v61  ;;  %v4191_v10 = vrot.slane %v4176_v14, %v11451_v29  ;;  %v3168_v24 = vpop.permute.xlu0 %3167  ;;  %v11572_v23 = vld [vmem:[#allocation48_spill] sm:$0xff]  ;;  %v11573_v34 = vld [vmem:[#allocation127_spill] sm:$0xff]  ;;  %v11574_v14 = vld [vmem:[#allocation129_spill] sm:$0xff] }
 0x4ac   :  { %v3457_v11 = vsel %vm918_vm7, %v9656_v6, %v9673_v3  ;;  %v4383_v15 = vrot.slane %v4368_v43, %v11451_v29  ;;  %v4239_v5 = vrot.slane %v4224_v37, %v11451_v29  ;;  %v3567_v53 = vsel %vm918_vm7, %v3535_v30, %v3168_v24  ;;  %v3170_v62 = vpop.permute.xlu1 %3169  ;;  %v11576_v24 = vld [vmem:[#allocation158_spill] sm:$0xff] }
 0x4ad   :  { %v4118_v58 = vrot.slane %v4110_v18, %v11451_v29  ;;  %v4206_v19 = vcombine.low %v4184_v44, %v4191_v10  ;;  %v4272_v46 = vcombine.low %v3455_v12, %v3567_v53  ;;  %2959 = vrot.lane.b32.xlu0 %v11572_v23, %s6068_s14  ;;  %v3569_v7 = vsel %vm918_vm7, %v3537_v57, %v3170_v62  ;;  %v11578_v62 = vld [vmem:[#allocation36_spill] sm:$0xff] }
 0x4ae   :  { %v4280_v55 = vrot.slane %v4271_v21, %v11451_v29  ;;  %v4376_v6 = vrot.slane %v4367_v52, %v11451_v29  ;;  %v4070_v3 = vrot.slane %v4062_v25, %v11451_v29  ;;  %v4320_v31 = vcombine.low %v3457_v11, %v3569_v7  ;;  %v11577_v11 = vld [vmem:[#allocation165_spill] sm:$0xff] }
 0x4af   :  { %2961 = vrot.lane.b32.xlu1 %v11573_v34, %s6068_s14  ;;  %v4166_v30 = vrot.slane %v4158_v32, %v11451_v29  ;;  %v4214_v44 = vrot.slane %v4206_v19, %v11451_v29  ;;  %v4254_v22 = vcombine.low %v4232_v50, %v4239_v5  ;;  %v4287_v48 = vrot.slane %v4272_v46, %v11451_v29  ;;  %v9810_v28 = vpop.permute.xlu0 %2879  ;;  %v11579_v46 = vld [vmem:[#allocation44_spill] sm:$0xff] }
 0x4b0   :  { %v4328_v57 = vrot.slane %v4319_v41, %v11451_v29  ;;  %v4391_v45 = vcombine.low %v4376_v6, %v4383_v15  ;;  %v4335_v43 = vrot.slane %v4320_v31, %v11451_v29  ;;  %v9814_v61 = vpop.permute.xlu1 %2881  ;;  %v9817_v16 = vrot.slane %v8610_v27, 1  ;;  %v11575_v41 = vld [vmem:[#allocation164_spill] sm:$0xff] }
 0x4b1   :  { %v5717_v26 = vcombine.low %v4070_v3, %v4118_v58  ;;  %v5719_v47 = vcombine.low %v4166_v30, %v4214_v44  ;;  %v4302_v18 = vcombine.low %v4280_v55, %v4287_v48  ;;  %2963 = vrot.lane.b32.xlu0 %v11574_v14, %s6068_s14  ;;  %v4262_v35 = vrot.slane %v4254_v22, %v11451_v29  ;;  %v11580_v30 = vld [vmem:[#allocation168_spill] sm:$0xff] }
 0x4b2   :  { %v4350_v50 = vcombine.low %v4328_v57, %v4335_v43  ;;  %v4399_v25 = vrot.slane %v4391_v45, %v11451_v29  ;;  %v11581_v44 = vld [vmem:[#allocation60_spill] sm:$0xff] }
 0x4b3   :  { %2965 = vrot.lane.b32.xlu1 %v9817_v16, %s6068_s14  ;;  %v4310_v38 = vrot.slane %v4302_v18, %v11451_v29  ;;  %v9825_v21 = vpop.permute.xlu0 %2883  ;;  %v4889_v52 = vrot.slane %v5719_v47, %v11451_v29  ;;  %v4875_v5 = vrot.slane %v5717_v26, %v11451_v29  ;;  %v11582_v48 = vld [vmem:[#allocation148_spill] sm:$0xff]  ;;  %v11583_v47 = vld [vmem:[#allocation78_spill] sm:$0xff] }
 0x4b4   :  { %v4358_v37 = vrot.slane %v4350_v50, %v11451_v29  ;;  %v9833_v12 = vsel %vm806_vm3, %v11575_v41, %v9825_v21  ;;  %v9835_v32 = vpop.permute.xlu1 %2885  ;;  %v11602_v14 = vld [vmem:[#allocation52_spill] sm:$0xff] }
 0x4b5   :  { %v5721_v10 = vcombine.low %v4262_v35, %v4310_v38  ;;  %3067 = vrot.lane.b32.xlu0 %v11576_v24, %s6068_s14  ;;  %v9842_v15 = vsel %vm806_vm3, %v11577_v11, %v9835_v32  ;;  %v4925_v19 = vcombine.low %v4875_v5, %v4889_v52  ;;  %v4926_v31 = vcombine.high %v4875_v5, %v4889_v52 }
 0x4b6   :  { %v5723_v53 = vcombine.low %v4358_v37, %v4399_v25  ;;  %v11584_v25 = vld [vmem:[#allocation159_spill] sm:$0xff]  ;;  %v11585_v37 = vld [vmem:[#allocation162_spill] sm:$0xff] }
 0x4b7   :  { %3069 = vrot.lane.b32.xlu1 %v11578_v62, %s6068_s14  ;;  %v9847_v58 = vpop.permute.xlu0 %2887  ;;  %v4903_v6 = vrot.slane %v5721_v10, %v11451_v29  ;;  %v4939_v26 = vrot.slane %v4925_v19, %v11451_v29  ;;  %v4953_v35 = vrot.slane %v4926_v31, %v11451_v29  ;;  %v11586_v62 = vld [vmem:[#allocation136_spill] sm:$0xff]  ;;  %v11587_v19 = vld [vmem:[#allocation46_spill] sm:$0xff] }
 0x4b8   :  { %v9852_v7 = vsel %vm806_vm3, %v11579_v46, %v9847_v58  ;;  %v9854_v55 = vpop.permute.xlu1 %2889  ;;  %v4917_v3 = vrot.slane %v5723_v53, %v11451_v29  ;;  %v11589_v31 = vld [vmem:[#allocation156_spill] sm:$0xff] }
 0x4b9   :  { %3071 = vrot.lane.b32.xlu0 %v11580_v30, %s6068_s14  ;;  %v9863_v22 = vsel %vm806_vm3, %v11581_v44, %v9854_v55 }
 0x4ba   :  { %v4929_v57 = vcombine.low %v4903_v6, %v4917_v3  ;;  %v4930_v45 = vcombine.high %v4903_v6, %v4917_v3  ;;  %v11588_v3 = vld [vmem:[#allocation157_spill] sm:$0xff] }
 0x4bb   :  { %3073 = vrot.lane.b32.xlu1 %v11582_v48, %s6068_s14  ;;  %v9867_v43 = vpop.permute.xlu0 %2891  ;;  %v11590_v48 = vld [vmem:[#allocation37_spill] sm:$0xff] }
 0x4bc   :  { %v9873_v18 = vsel %vm806_vm3, %v11583_v47, %v9867_v43  ;;  %v9875_v50 = vpop.permute.xlu1 %2991  ;;  %v4981_v38 = vrot.slane %v4930_v45, %v11451_v29  ;;  %v4967_v52 = vrot.slane %v4929_v57, %v11451_v29  ;;  %v11591_v57 = vld [vmem:[#allocation77_spill] sm:$0xff]  ;;  %v11592_v47 = vld [vmem:[#allocation160_spill] sm:$0xff] }
 0x4bd   :  { %3075 = vrot.lane.b32.xlu0 %v11584_v25, %s6068_s14  ;;  %v11593_v25 = vld [vmem:[#allocation53_spill] sm:$0xff] }
 0x4be   :  { %v4993_v41 = vcombine.low %v4953_v35, %v4981_v38  ;;  %v4994_v10 = vcombine.high %v4953_v35, %v4981_v38  ;;  %v4989_v24 = vcombine.low %v4939_v26, %v4967_v52  ;;  %v4990_v11 = vcombine.high %v4939_v26, %v4967_v52  ;;  %v5997_v52 = vld [vmem:[%s10571_s4 + $0x140] sm:$0xff]  }
 0x4bf   :  { %3077 = vrot.lane.b32.xlu1 %v11585_v37, %s6068_s14  ;;  %v9884_v5 = vpop.permute.xlu0 %2993  ;;  %5872 = vmatprep.subr.bf16.mxu0 %v5997_v52 }
 0x4c0   :  { %v9886_v53 = vpop.permute.xlu1 %2995  ;;  %5481 = vmatprep.mubr.bf16.mxu0 %v4993_v41  ;;  %5530 = vmatprep.mubr.bf16.mxu1 %v4994_v10  ;;  %v11594_v10 = vld [vmem:[#allocation154_spill] sm:$0xff] }
 0x4c1   :  { %3079 = vrot.lane.b32.xlu0 %v11586_v62, %s6068_s14  ;;  %5482 = vmatmul.mubr.bf16.vlgmr.msra.gmra.mrb[8].mxu0 %v4989_v24  ;;  %v11595_v24 = vld [vmem:[#allocation151_spill] sm:$0xff] }
 0x4c2   :  { %5531 = vmatmul.mubr.bf16.vlgmr.msra.gmra.mrb[8].mxu1 %v4990_v11  ;;  %v5998_v11 = vld [vmem:[%s10571_s4 + $0x100] sm:$0xff]  }
 0x4c3   :  { %3081 = vrot.lane.b32.xlu1 %v11587_v19, %s6068_s14  ;;  %v9892_v46 = vpop.permute.xlu0 %2997  ;;  %5873 = vmatpush3.bf16.msra.mxu0 %v5998_v11  ;;  %v11600_v11 = vld [vmem:[#allocation45_spill] sm:$0xff] }
 0x4c4   :  { %v9894_v6 = vpop.permute.xlu1 %2999 }
 0x4c5   :  { %3173 = vrot.lane.b32.xlu0 %v11588_v3, %s6068_s14 }
 0x4c7   :  { %3175 = vrot.lane.b32.xlu1 %v11589_v31, %s6068_s14  ;;  %v9900_v30 = vpop.permute.xlu0 %3001 }
 0x4c8   :  { %v9902_v44 = vpop.permute.xlu1 %3003 }
 0x4c9   :  { %3177 = vrot.lane.b32.xlu0 %v11590_v48, %s6068_s14 }
 0x4cb   :  { %3179 = vrot.lane.b32.xlu1 %v11591_v57, %s6068_s14  ;;  %v9908_v45 = vpop.permute.xlu0 %3107 }
 0x4cc   :  { %v9910_v26 = vpop.permute.xlu1 %3109 }
 0x4cd   :  { %3181 = vrot.lane.b32.xlu0 %v11592_v47, %s6068_s14 }
 0x4cf   :  { %3183 = vrot.lane.b32.xlu1 %v8610_v27, %s6068_s14  ;;  %v9916_v35 = vpop.permute.xlu0 %3111  ;;  %v11597_v27 = vld [vmem:[#allocation66_spill] sm:$0xff] }
 0x4d0   :  { %v9918_v38 = vpop.permute.xlu1 %3113 }
 0x4d1   :  { %3185 = vrot.lane.b32.xlu0 %v11454_v36, %s6068_s14 }
 0x4d3   :  { %3587 = vrot.lane.b32.xlu1 %v11593_v25, %s6064_s30  ;;  %v9927_v37 = vpop.permute.xlu0 %3115 }
 0x4d4   :  { %v9929_v41 = vpop.permute.xlu1 %3117 }
 0x4d5   :  { %3589 = vrot.lane.b32.xlu0 %v11594_v10, %s6064_s30 }
 0x4d7   :  { %3635 = vrot.lane.b32.xlu1 %v11595_v24, %s6064_s30  ;;  %v3120_v60 = vpop.permute.xlu0 %3119 }
 0x4d8   :  { %v9943_v52 = vsel %vm806_vm3, %v9817_v16, %v3120_v60  ;;  %v3122_v25 = vpop.permute.xlu1 %3121  ;;  %v11599_v60 = vld [vmem:[#allocation51_spill] sm:$0xff] }
 0x4d9   :  { %11596 = vst [vmem:[#allocation27_spill] sm:$0xff] %v9943_v52  ;;  %3595 = vrot.lane.b32.xlu0 %v11597_v27, %s6066_s8  ;;  %v9949_v56 = vsel %vm806_vm3, %v9939_v54, %v3122_v25  ;;  %v3289_v27 = vsel %vm806_vm3, %v11600_v11, %v9810_v28  ;;  %v11601_v25 = vld [vmem:[#allocation9_spill] sm:$0xff]  ;;  %v11605_v11 = vld [vmem:[#allocation31_spill] sm:$0xff] }
 0x4da   :  { %v3292_v17 = vsel %vm806_vm3, %v11601_v25, %v9814_v61  ;;  %v6000_v28 = vld [vmem:[%s10571_s4 + $0x108] sm:$0xff]   ;;  %v6001_v61 = vld [vmem:[%s10571_s4 + $0x150] sm:$0xff]  }
 0x4db   :  { %3597 = vrot.lane.b32.xlu1 %v11598_v42, %s6066_s8  ;;  %v9953_v24 = vpop.permute.xlu0 %2783 }
 0x4dc   :  { %v9955_v13 = vpop.permute.xlu1 %2785 }
 0x4dd   :  { %3639 = vrot.lane.b32.xlu0 %v11594_v10, %s6066_s8 }
 0x4df   :  { %3603 = vrot.lane.b32.xlu1 %v11599_v60, %s6068_s14  ;;  %v2922_v52 = vpop.permute.xlu0 %2921  ;;  %v5999_v60 = vld [vmem:[%s10571_s4 + $0x148] sm:$0xff]  }
 0x4e0   :  { %v9968_v4 = vsel %vm860_vm5, %v3289_v27, %v2922_v52  ;;  %v2924_v9 = vpop.permute.xlu1 %2923  ;;  %v11604_v52 = vld [vmem:[#allocation99_spill] sm:$0xff]  ;;  %5874 = vmatprep.subr.bf16.mxu0 %v5999_v60  ;;  %v3298_v27 = vsel %vm806_vm3, %v11605_v11, %v9835_v32  ;;  %v3301_v60 = vsel %vm806_vm3, %v11516_v40, %v9847_v58  ;;  %v6005_v58 = vld [vmem:[%s10571_s4 + $0x160] sm:$0xff]  }
 0x4e1   :  { %3605 = vrot.lane.b32.xlu0 %v11602_v14, %s6068_s14  ;;  %v9973_v10 = vsel %vm860_vm5, %v3292_v17, %v2924_v9  ;;  %v3295_v9 = vsel %vm806_vm3, %v11604_v52, %v9825_v21  ;;  %5875 = vmatpush3.bf16.msra.mxu0 %v6000_v28  ;;  %v3304_v28 = vsel %vm806_vm3, %v9144_v2, %v9854_v55  ;;  %v6004_v52 = vld [vmem:[%s10571_s4 + $0x118] sm:$0xff]  }
 0x4e2   :  { %11603 = vst [vmem:[#allocation141_spill] sm:$0xff] %v9973_v10  ;;  %v6002_v10 = vld [vmem:[%s10571_s4 + $0x110] sm:$0xff]   ;;  %5876 = vmatprep.subr.bf16.mxu0 %v6001_v61 }
 0x4e3   :  { %3643 = vrot.lane.b32.xlu1 %v11598_v42, %s6068_s14  ;;  %v2926_v17 = vpop.permute.xlu0 %2925 }
 0x4e4   :  { %v9993_v42 = vsel %vm860_vm5, %v3295_v9, %v2926_v17  ;;  %v9997_v25 = vsel %vm860_vm5, %v9833_v12, %v2926_v17  ;;  %v2928_v14 = vpop.permute.xlu1 %2927  ;;  %v6003_v12 = vld [vmem:[%s10571_s4 + $0x158] sm:$0xff]   ;;  %v6006_v17 = vld [vmem:[%s10571_s4 + $0x120] sm:$0xff]  }
 0x4e5   :  { %3591 = vrot.lane.b32.xlu0 %v11586_v62, %s6064_s30  ;;  %v10005_v21 = vsel %vm860_vm5, %v3298_v27, %v2928_v14  ;;  %v10009_v32 = vsel %vm860_vm5, %v9842_v15, %v2928_v14  ;;  %5877 = vmatpush3.bf16.msra.mxu0 %v6002_v10 }
 0x4e6   :  { %5878 = vmatprep.subr.bf16.mxu0 %v6003_v12  ;;  %v11606_v12 = vld [vmem:[#allocation102_spill] sm:$0xff] }
 0x4e7   :  { %3593 = vrot.lane.b32.xlu1 %v11587_v19, %s6064_s30  ;;  %v2930_v62 = vpop.permute.xlu0 %2929 }
 0x4e8   :  { %v10023_v14 = vsel %vm860_vm5, %v3301_v60, %v2930_v62  ;;  %v10027_v15 = vsel %vm860_vm5, %v9852_v7, %v2930_v62  ;;  %v2932_v61 = vpop.permute.xlu1 %2931  ;;  %v3307_v7 = vsel %vm806_vm3, %v11519_v39, %v9867_v43  ;;  %v6007_v39 = vld [vmem:[%s10571_s4 + $0x168] sm:$0xff]  }
 0x4e9   :  { %3637 = vrot.lane.b32.xlu0 %v11454_v36, %s6064_s30  ;;  %v10035_v40 = vsel %vm860_vm5, %v3304_v28, %v2932_v61  ;;  %v10039_v2 = vsel %vm860_vm5, %v9863_v22, %v2932_v61  ;;  %5879 = vmatpush3.bf16.msra.mxu0 %v6004_v52  ;;  %v6010_v52 = vld [vmem:[%s10571_s4 + $0x130] sm:$0xff]  }
 0x4ea   :  { %5880 = vmatprep.subr.bf16.mxu0 %v6005_v58  ;;  %v6013_v58 = vld [vmem:[%s10571_s4 + $0x180] sm:$0xff]  }
 0x4eb   :  { %3599 = vrot.lane.b32.xlu1 %v9817_v16, %s6066_s8  ;;  %v2934_v55 = vpop.permute.xlu0 %2933  ;;  %v3393_v16 = vsel %vm806_vm3, %v11531_v8, %v9875_v50  ;;  %v6008_v8 = vld [vmem:[%s10571_s4 + $0x128] sm:$0xff]   ;;  %5904 = vmatprep.subr.bf16.mxu1 %v6013_v58 }
 0x4ec   :  { %v10050_v10 = vsel %vm860_vm5, %v3307_v7, %v2934_v55  ;;  %v10054_v22 = vsel %vm860_vm5, %v9873_v18, %v2934_v55  ;;  %v10056_v9 = vpop.permute.xlu1 %3023  ;;  %v3396_v18 = vsel %vm806_vm3, %v11541_v33, %v9884_v5  ;;  %v3399_v33 = vsel %vm806_vm3, %v11549_v20, %v9886_v53  ;;  %v6009_v53 = vld [vmem:[%s10571_s4 + $0x170] sm:$0xff]   ;;  %5905 = vmatpush3.bf16.msra.mxu1 %v6013_v58 }
 0x4ed   :  { %3601 = vrot.lane.b32.xlu0 %v9939_v54, %s6066_s8  ;;  %5881 = vmatpush3.bf16.msra.mxu0 %v6006_v17  ;;  %v3402_v5 = vsel %vm806_vm3, %v11558_v49, %v9892_v46  ;;  %v6011_v46 = vld [vmem:[%s10571_s4 + $0x178] sm:$0xff]   ;;  %v3405_v7 = vsel %vm806_vm3, %v11560_v0, %v9894_v6  ;;  %v3408_v17 = vsel %vm806_vm3, %v11566_v63, %v9900_v30 }
 0x4ee   :  { %5882 = vmatprep.subr.bf16.mxu0 %v6007_v39  ;;  %v3411_v6 = vsel %vm806_vm3, %v11606_v12, %v9902_v44  ;;  %v3508_v44 = vsel %vm806_vm3, %v11571_v51, %v9916_v35 }
 0x4ef   :  { %3641 = vrot.lane.b32.xlu1 %v11587_v19, %s6066_s8  ;;  %v3026_v43 = vpop.permute.xlu0 %3025  ;;  %v11607_v19 = vld [vmem:[#allocation126_spill] sm:$0xff] }
 0x4f0   :  { %v10075_v11 = vsel %vm860_vm5, %v3393_v16, %v3026_v43  ;;  %v3028_v27 = vpop.permute.xlu1 %3027  ;;  %v6012_v43 = vld [vmem:[%s10571_s4 + $0x138] sm:$0xff]  }
 0x4f1   :  { %3607 = vrot.lane.b32.xlu0 %v11606_v12, %s6068_s14  ;;  %v10080_v60 = vsel %vm860_vm5, %v3396_v18, %v3028_v27  ;;  %5883 = vmatpush3.bf16.msra.mxu0 %v6008_v8  ;;  %v3502_v27 = vsel %vm806_vm3, %v11568_v1, %v9908_v45  ;;  %v11617_v12 = vld [vmem:[#allocation13_spill] sm:$0xff] }
 0x4f2   :  { %5884 = vmatprep.subr.bf16.mxu0 %v6009_v53 }
 0x4f3   :  { %3609 = vrot.lane.b32.xlu1 %v11607_v19, %s6068_s14  ;;  %v3030_v50 = vpop.permute.xlu0 %3029  ;;  %v3208_v19 = vsel %vm806_vm3, %v11590_v48, %v11617_v12  ;;  %v11621_v12 = vld [vmem:[#allocation14_spill] sm:$0xff] }
 0x4f4   :  { %v10094_v62 = vsel %vm860_vm5, %v3399_v33, %v3030_v50  ;;  %v3032_v28 = vpop.permute.xlu1 %3031 }
 0x4f5   :  { %11608 = vst [vmem:[#allocation139_spill] sm:$0xff] %v10094_v62  ;;  %3645 = vrot.lane.b32.xlu0 %v9939_v54, %s6068_s14  ;;  %v10099_v61 = vsel %vm860_vm5, %v3402_v5, %v3032_v28  ;;  %v6014_v54 = vld [vmem:[%s10571_s4 + $0x188] sm:$0xff]   ;;  %5885 = vmatpush3.bf16.msra.mxu0 %v6010_v52  ;;  %v3505_v5 = vsel %vm806_vm3, %v11569_v59, %v9910_v26 }
 0x4f6   :  { %11609 = vst [vmem:[#allocation94_spill] sm:$0xff] %v10099_v61  ;;  %5886 = vmatprep.subr.bf16.mxu0 %v6011_v46  ;;  %5906 = vmatprep.subr.bf16.mxu1 %v6014_v54 }
 0x4f7   :  { %v3034_v55 = vpop.permute.xlu0 %3033  ;;  %5907 = vmatpush3.bf16.msra.mxu1 %v6014_v54 }
 0x4f8   :  { %v10123_v39 = vsel %vm860_vm5, %v3405_v7, %v3034_v55  ;;  %v3036_v16 = vpop.permute.xlu1 %3035  ;;  %v3870_v7 = vshll.u32 %v11549_v20, 16  ;;  %v11613_v55 = vld [vmem:[#allocation140_spill] sm:$0xff] }
 0x4f9   :  { %11610 = vst [vmem:[#allocation119_spill] sm:$0xff] %v10123_v39  ;;  %v10129_v18 = vsel %vm860_vm5, %v3408_v17, %v3036_v16  ;;  %5887 = vmatpush3.bf16.msra.mxu0 %v6012_v43  ;;  %v3204_v17 = vsel %vm806_vm3, %v11588_v3, %v11613_v55  ;;  %v3888_v43 = vshll.u32 %v11558_v49, 16  ;;  %v3924_v55 = vshll.u32 %v11566_v63, 16 }
 0x4fa   :  { %11611 = vst [vmem:[#allocation131_spill] sm:$0xff] %v10129_v18  ;;  %v3872_v3 = vrot.slane %v3870_v7, 1  ;;  %v3868_v18 = vshrl.u32 %v11549_v20, 16 }
 0x4fb   :  { %v3038_v30 = vpop.permute.xlu0 %3037  ;;  %v3926_v20 = vrot.slane %v3924_v55, 1 }
 0x4fc   :  { %v10138_v8 = vsel %vm860_vm5, %v3411_v6, %v3038_v30  ;;  %v3142_v33 = vpop.permute.xlu1 %3141  ;;  %v11614_v6 = vld [vmem:[#allocation67_spill] sm:$0xff] }
 0x4fd   :  { %v10141_v50 = vsel %vm860_vm5, %v3502_v27, %v3142_v33  ;;  %v3206_v30 = vsel %vm806_vm3, %v11589_v31, %v11614_v6  ;;  %v11615_v27 = vld [vmem:[#allocation24_spill] sm:$0xff] }
 0x4fe   :  { %v3230_v33 = vsel %vm860_vm5, %v3204_v17, %v11615_v27  ;;  %v11619_v17 = vld [vmem:[#allocation12_spill] sm:$0xff] }
 0x4ff   :  { %v3144_v28 = vpop.permute.xlu0 %3143  ;;  %v3234_v6 = vsel %vm860_vm5, %v3208_v19, %v11619_v17 }
 0x500   :  { %v10150_v1 = vsel %vm860_vm5, %v3505_v5, %v3144_v28  ;;  %v3146_v45 = vpop.permute.xlu1 %3145  ;;  %v3906_v28 = vshll.u32 %v11560_v0, 16 }
 0x501   :  { %v10153_v53 = vsel %vm860_vm5, %v3508_v44, %v3146_v45  ;;  %v11616_v44 = vld [vmem:[#allocation65_spill] sm:$0xff] }
 0x502   :  { %v3232_v45 = vsel %vm860_vm5, %v3206_v30, %v11616_v44  ;;  %v3890_v30 = vrot.slane %v3888_v43, 1  ;;  %v3886_v44 = vshrl.u32 %v11558_v49, 16  ;;  %v3908_v48 = vrot.slane %v3906_v28, 1 }
 0x503   :  { %v10155_v52 = vpop.permute.xlu0 %3147 }
 0x504   :  { %v10157_v46 = vpop.permute.xlu1 %3149  ;;  %v10215_v28 = vor.u32 %v3890_v30, %v3886_v44 }
 0x507   :  { %v10159_v58 = vpop.permute.xlu0 %3151 }
 0x509   :  { %v10161_v54 = vpop.permute.xlu1 %3153 }
 0x50a   :  { %11612 = vst [vmem:[#allocation35_spill] sm:$0xff] %v10161_v54 }
 0x50b   :  { %v10163_v59 = vpop.permute.xlu0 %3155 }
 0x50d   :  { %v10165_v26 = vpop.permute.xlu1 %2837 }
 0x50f   :  { %v2840_v51 = vpop.permute.xlu0 %2839 }
 0x510   :  { %v10181_v36 = vsel %vm918_vm7, %v3230_v33, %v2840_v51 }
 0x511   :  { %v2842_v35 = vpop.permute.xlu1 %2841  ;;  %v3858_v51 = vshll.u32 %v10181_v36, 16 }
 0x512   :  { %v10188_v31 = vsel %vm918_vm7, %v3232_v45, %v2842_v35  ;;  %v3210_v35 = vsel %vm806_vm3, %v11591_v57, %v11621_v12  ;;  %v10204_v45 = vor.u32 %v3872_v3, %v3868_v18  ;;  %v3922_v57 = vshrl.u32 %v11566_v63, 16 }
 0x513   :  { %v2844_v16 = vpop.permute.xlu0 %2843  ;;  %11618 = vst [vmem:[#allocation82_spill] sm:$0xff] %v10188_v31  ;;  %v3876_v19 = vshll.u32 %v10188_v31, 16  ;;  %v3236_v43 = vsel %vm860_vm5, %v3210_v35, %v9953_v24  ;;  %v3860_v12 = vrot.slane %v3858_v51, 1  ;;  %v11623_v35 = vld [vmem:[#allocation15_spill] sm:$0xff]  ;;  %v3856_v63 = vshrl.u32 %v10181_v36, 16 }
 0x514   :  { %v10195_v7 = vsel %vm918_vm7, %v3234_v6, %v2844_v16  ;;  %v3904_v16 = vshrl.u32 %v11560_v0, 16  ;;  %v4430_v0 = vrot.slane %v10204_v45, %v11451_v29  ;;  %v3212_v30 = vsel %vm806_vm3, %v11592_v47, %v11623_v35 }
 0x515   :  { %v2846_v5 = vpop.permute.xlu1 %2845  ;;  %11620 = vst [vmem:[#allocation29_spill] sm:$0xff] %v10195_v7  ;;  %v3894_v17 = vshll.u32 %v10195_v7, 16  ;;  %v3878_v55 = vrot.slane %v3876_v19, 1  ;;  %v3874_v19 = vshrl.u32 %v10188_v31, 16 }
 0x516   :  { %v10211_v6 = vsel %vm918_vm7, %v3236_v43, %v2846_v5  ;;  %v10220_v3 = vor.u32 %v3908_v48, %v3904_v16  ;;  %v10227_v5 = vor.u32 %v3926_v20, %v3922_v57  ;;  %v3238_v48 = vsel %vm860_vm5, %v3212_v30, %v9955_v13 }
 0x517   :  { %v2848_v27 = vpop.permute.xlu0 %2847  ;;  %11622 = vst [vmem:[#allocation34_spill] sm:$0xff] %v10211_v6  ;;  %v3912_v51 = vshll.u32 %v10211_v6, 16  ;;  %v3896_v45 = vrot.slane %v3894_v17, 1  ;;  %v3861_v43 = vor.u32 %v3860_v12, %v3856_v63  ;;  %v3879_v54 = vor.u32 %v3878_v55, %v3874_v19 }
 0x518   :  { %v3892_v13 = vshrl.u32 %v10195_v7, 16  ;;  %v10248_v30 = vsel %vm918_vm7, %v3238_v48, %v2848_v27 }
 0x519   :  { %v10197_v33 = vpop.permute.xlu1 %2953  ;;  %v3914_v39 = vrot.slane %v3912_v51, 1  ;;  %v3930_v55 = vshll.u32 %v10248_v30, 16  ;;  %v3928_v62 = vshrl.u32 %v10248_v30, 16 }
 0x51b   :  { %v10213_v49 = vpop.permute.xlu0 %2955 }
 0x51d   :  { %v10218_v18 = vpop.permute.xlu1 %2957 }
 0x51e   :  { %v3722_v24 = vsel %vm918_vm7, %v9997_v25, %v10218_v18  ;;  %v4478_v25 = vrot.slane %v10215_v28, %v11451_v29  ;;  %v3910_v28 = vshrl.u32 %v10211_v6, 16 }
 0x51f   :  { %v3864_v44 = vshll.u32 %v3722_v24, 16  ;;  %v10239_v20 = vpop.permute.xlu0 %2959  ;;  %v3862_v16 = vshrl.u32 %v3722_v24, 16  ;;  %v3897_v24 = vor.u32 %v3896_v45, %v3892_v13 }
 0x520   :  { %v3723_v47 = vsel %vm918_vm7, %v10009_v32, %v10239_v20 }
 0x521   :  { %v3866_v57 = vrot.slane %v3864_v44, 1  ;;  %v10244_v35 = vpop.permute.xlu1 %2961  ;;  %v3882_v17 = vshll.u32 %v3723_v47, 16  ;;  %v3880_v63 = vshrl.u32 %v3723_v47, 16 }
 0x522   :  { %v3724_v12 = vsel %vm918_vm7, %v10027_v15, %v10244_v35 }
 0x523   :  { %v3867_v61 = vor.u32 %v3866_v57, %v3862_v16  ;;  %v3884_v32 = vrot.slane %v3882_v17, 1  ;;  %v3900_v44 = vshll.u32 %v3724_v12, 16  ;;  %v2964_v31 = vpop.permute.xlu0 %2963  ;;  %v3898_v57 = vshrl.u32 %v3724_v12, 16 }
 0x524   :  { %v10257_v27 = vsel %vm918_vm7, %v10035_v40, %v2964_v31  ;;  %v3725_v51 = vsel %vm918_vm7, %v10039_v2, %v2964_v31  ;;  %v3915_v12 = vor.u32 %v3914_v39, %v3910_v28 }
 0x525   :  { %v4409_v19 = vcombine.low %v3861_v43, %v3867_v61  ;;  %11624 = vst [vmem:[#allocation132_spill] sm:$0xff] %v10257_v27  ;;  %v2966_v48 = vpop.permute.xlu1 %2965  ;;  %v3885_v16 = vor.u32 %v3884_v32, %v3880_v63  ;;  %v3902_v7 = vrot.slane %v3900_v44, 1  ;;  %v3918_v15 = vshll.u32 %v3725_v51, 16 }
 0x526   :  { %v10266_v61 = vsel %vm918_vm7, %v10050_v10, %v2966_v48  ;;  %v3726_v40 = vsel %vm918_vm7, %v10054_v22, %v2966_v48  ;;  %v3916_v2 = vshrl.u32 %v3725_v51, 16  ;;  %v3932_v63 = vrot.slane %v3930_v55, 1 }
 0x527   :  { %v4423_v45 = vrot.slane %v4409_v19, %v11451_v29  ;;  %v4450_v43 = vcombine.low %v3879_v54, %v3885_v16  ;;  %v3903_v13 = vor.u32 %v3902_v7, %v3898_v57  ;;  %v3920_v31 = vrot.slane %v3918_v15, 1  ;;  %v3068_v17 = vpop.permute.xlu0 %3067 }
 0x528   :  { %v3936_v32 = vshll.u32 %v3726_v40, 16  ;;  %v4729_v44 = vcombine.low %v10248_v30, %v10266_v61  ;;  %v3934_v22 = vshrl.u32 %v3726_v40, 16  ;;  %v4526_v51 = vrot.slane %v10220_v3, %v11451_v29  ;;  %v11625_v40 = vld [vmem:[#allocation56_spill] sm:$0xff] }
 0x529   :  { %v3070_v19 = vpop.permute.xlu1 %3069  ;;  %v4432_v47 = vcombine.low %v4423_v45, %v4430_v0  ;;  %v4471_v27 = vrot.slane %v4450_v43, %v11451_v29  ;;  %v4498_v10 = vcombine.low %v3897_v24, %v3903_v13  ;;  %v3921_v6 = vor.u32 %v3920_v31, %v3916_v2  ;;  %v11627_v2 = vld [vmem:[#allocation20_spill] sm:$0xff] }
 0x52a   :  { %v3938_v54 = vrot.slane %v3936_v32, 1  ;;  %v10277_v48 = vor.u32 %v3932_v63, %v3928_v62  ;;  %v4574_v0 = vrot.slane %v10227_v5, %v11451_v29  ;;  %v3555_v13 = vsel %vm860_vm5, %v9949_v56, %v10163_v59  ;;  %v11628_v56 = vld [vmem:[#allocation129_spill] sm:$0xff] }
 0x52b   :  { %v4480_v7 = vcombine.low %v4471_v27, %v4478_v25  ;;  %v4519_v39 = vrot.slane %v4498_v10, %v11451_v29  ;;  %v4546_v28 = vcombine.low %v3915_v12, %v3921_v6  ;;  %v3072_v55 = vpop.permute.xlu0 %3071  ;;  %v4446_v30 = vrot.slane %v4432_v47, %v11451_v29  ;;  %v11626_v47 = vld [vmem:[#allocation38_spill] sm:$0xff] }
 0x52c   :  { %v10281_v16 = vor.u32 %v3938_v54, %v3934_v22  ;;  %v3202_v43 = vsel %vm806_vm3, %v11626_v47, %v11625_v40  ;;  %v3355_v12 = vsel %vm918_vm7, %v9968_v4, %v10197_v33  ;;  %v3511_v10 = vsel %vm806_vm3, %v11572_v23, %v9918_v38  ;;  %v11629_v54 = vld [vmem:[#allocation58_spill] sm:$0xff] }
 0x52d   :  { %v3074_v24 = vpop.permute.xlu1 %3073  ;;  %v4494_v57 = vrot.slane %v4480_v7, %v11451_v29  ;;  %v4528_v25 = vcombine.low %v4519_v39, %v4526_v51  ;;  %v4567_v27 = vrot.slane %v4546_v28, %v11451_v29  ;;  %v3228_v31 = vsel %vm860_vm5, %v3202_v43, %v11627_v2  ;;  %v11630_v51 = vld [vmem:[#allocation133_spill] sm:$0xff] }
 0x52e   :  { %v4594_v3 = vcombine.low %v10277_v48, %v10281_v16  ;;  %v3514_v22 = vsel %vm806_vm3, %v11573_v34, %v9927_v37  ;;  %v3517_v59 = vsel %vm806_vm3, %v11628_v56, %v9929_v41  ;;  %v3429_v7 = vsel %vm860_vm5, %v11629_v54, %v10056_v9  ;;  %v11632_v9 = vld [vmem:[#allocation145_spill] sm:$0xff] }
 0x52f   :  { %v4576_v6 = vcombine.low %v4567_v27, %v4574_v0  ;;  %v10288_v15 = vpop.permute.xlu0 %3075  ;;  %v5726_v62 = vcombine.low %v4446_v30, %v4494_v57  ;;  %v4542_v5 = vrot.slane %v4528_v25, %v11451_v29  ;;  %v11631_v39 = vunpack.i.h.bf16 %v11630_v51  ;;  %v11637_v54 = vld [vmem:[#allocation29_spill] sm:$0xff] }
 0x530   :  { %v3547_v37 = vsel %vm860_vm5, %v3511_v10, %v10155_v52  ;;  %v3549_v41 = vsel %vm860_vm5, %v3514_v22, %v10157_v46  ;;  %v4448_v28 = vcombine.low %v11632_v9, %v3355_v12  ;;  %v3359_v57 = vsel %vm918_vm7, %v9993_v42, %v10218_v18  ;;  %v11634_v12 = vld [vmem:[#allocation139_spill] sm:$0xff] }
 0x531   :  { %v10290_v45 = vpop.permute.xlu1 %3077  ;;  %v4590_v61 = vrot.slane %v4576_v6, %v11451_v29  ;;  %v3586_v23 = vsel %vm918_vm7, %v3555_v13, %v11631_v39  ;;  %v10325_v38 = vrot.slane %v5726_v62, %v11451_v29  ;;  %v10346_v46 = vrot.slane %v4729_v44, %v11451_v29 }
 0x532   :  { %v3461_v6 = vsel %vm918_vm7, %v3429_v7, %v3068_v17  ;;  %v3254_v42 = vsel %vm918_vm7, %v3228_v31, %v10165_v26  ;;  %v3463_v18 = vsel %vm918_vm7, %v10075_v11, %v3070_v19  ;;  %v4544_v17 = vcombine.low %v10181_v36, %v3359_v57 }
 0x533   :  { %v10305_v63 = vpop.permute.xlu0 %3079  ;;  %v5728_v32 = vcombine.low %v4542_v5, %v4590_v61  ;;  %v4457_v13 = vrot.slane %v4448_v28, %v11451_v29  ;;  %v3361_v11 = vsel %vm918_vm7, %v10005_v21, %v10239_v20  ;;  %v3363_v36 = vsel %vm918_vm7, %v10023_v14, %v10244_v35  ;;  %v11635_v21 = vld [vmem:[#allocation137_spill] sm:$0xff] }
 0x534   :  { %v4553_v14 = vrot.slane %v4544_v17, %v11451_v29  ;;  %v4640_v7 = vcombine.low %v11637_v54, %v3363_v36 }
 0x535   :  { %v3082_v4 = vpop.permute.xlu1 %3081  ;;  %v10328_v34 = vrot.slane %v5728_v32, %v11451_v29  ;;  %v3467_v32 = vsel %vm918_vm7, %v11634_v12, %v3074_v24  ;;  %v11645_v12 = vld [vmem:[#allocation132_spill] sm:$0xff] }
 0x536   :  { %v3475_v33 = vsel %vm918_vm7, %v10138_v8, %v3082_v4  ;;  %v11633_v8 = vld [vmem:[#allocation141_spill] sm:$0xff] }
 0x537   :  { %v4730_v0 = vcombine.low %v3475_v33, %v3586_v23  ;;  %v3357_v30 = vsel %vm918_vm7, %v11633_v8, %v10213_v49  ;;  %v3174_v25 = vpop.permute.xlu0 %3173  ;;  %v5062_v27 = vcombine.low %v10325_v38, %v10328_v34  ;;  %v5063_v52 = vcombine.high %v10325_v38, %v10328_v34 }
 0x538   :  { %v3573_v49 = vsel %vm918_vm7, %v10141_v50, %v3174_v25  ;;  %v4496_v40 = vcombine.low %v3254_v42, %v3357_v30  ;;  %v3551_v50 = vsel %vm860_vm5, %v3517_v59, %v10159_v58  ;;  %v11640_v25 = vld [vmem:[#allocation35_spill] sm:$0xff] }
 0x539   :  { %v10350_v62 = vrot.slane %v4730_v0, %v11451_v29  ;;  %v3176_v5 = vpop.permute.xlu1 %3175  ;;  %v4408_v61 = vcombine.low %v3461_v6, %v3573_v49  ;;  %v11639_v0 = vld [vmem:[#allocation119_spill] sm:$0xff] }
 0x53a   :  { %v3575_v44 = vsel %vm918_vm7, %v10150_v1, %v3176_v5  ;;  %v3465_v1 = vsel %vm918_vm7, %v10080_v60, %v3072_v55  ;;  %v4505_v56 = vrot.slane %v4496_v40, %v11451_v29  ;;  %v11636_v55 = vld [vmem:[#allocation82_spill] sm:$0xff]  ;;  %v3471_v8 = vsel %vm918_vm7, %v11639_v0, %v10290_v45  ;;  %v11641_v6 = vld [vmem:[#allocation27_spill] sm:$0xff] }
 0x53b   :  { %v4745_v47 = vcombine.low %v10346_v46, %v10350_v62  ;;  %v4449_v43 = vcombine.low %v3463_v18, %v3575_v44  ;;  %v4416_v26 = vrot.slane %v4408_v61, %v11451_v29  ;;  %v3178_v19 = vpop.permute.xlu0 %3177  ;;  %v4592_v59 = vcombine.low %v11636_v55, %v3361_v11  ;;  %v11642_v44 = vld [vmem:[#allocation131_spill] sm:$0xff] }
 0x53c   :  { %v3577_v58 = vsel %vm918_vm7, %v10153_v53, %v3178_v19  ;;  %v11638_v53 = vld [vmem:[#allocation94_spill] sm:$0xff]  ;;  %v3553_v49 = vsel %vm860_vm5, %v11641_v6, %v11640_v25  ;;  %v3473_v40 = vsel %vm918_vm7, %v11642_v44, %v10305_v63 }
 0x53d   :  { %v4464_v2 = vrot.slane %v4449_v43, %v11451_v29  ;;  %v3180_v31 = vpop.permute.xlu1 %3179  ;;  %v4431_v20 = vcombine.low %v11635_v21, %v4416_v26  ;;  %v4497_v10 = vcombine.low %v3465_v1, %v3577_v58  ;;  %v3469_v4 = vsel %vm918_vm7, %v11638_v53, %v10288_v15  ;;  %v11643_v58 = vld [vmem:[#allocation123_spill] sm:$0xff]  ;;  %v11644_v63 = vld [vmem:[#allocation34_spill] sm:$0xff] }
 0x53e   :  { %v3579_v22 = vsel %vm918_vm7, %v3547_v37, %v3180_v31  ;;  %v4601_v61 = vrot.slane %v4592_v59, %v11451_v29  ;;  %v3846_v31 = vshll.u32 %v11643_v58, 16  ;;  %v3852_v59 = vshll.u32 %v11632_v9, 16 }
 0x53f   :  { %v4479_v35 = vcombine.low %v4457_v13, %v4464_v2  ;;  %v4545_v60 = vcombine.low %v3467_v32, %v3579_v22  ;;  %v4512_v24 = vrot.slane %v4497_v10, %v11451_v29  ;;  %v3182_v33 = vpop.permute.xlu0 %3181  ;;  %v4439_v51 = vrot.slane %v4431_v20, %v11451_v29 }
 0x540   :  { %v3581_v37 = vsel %vm918_vm7, %v3549_v41, %v3182_v33  ;;  %v4649_v41 = vrot.slane %v4640_v7, %v11451_v29  ;;  %v11646_v32 = vcombine.low %v11644_v63, %v11645_v12  ;;  %v3854_v0 = vrot.slane %v3852_v59, 1 }
 0x541   :  { %v4487_v39 = vrot.slane %v4479_v35, %v11451_v29  ;;  %v4560_v23 = vrot.slane %v4545_v60, %v11451_v29  ;;  %v3184_v28 = vpop.permute.xlu1 %3183  ;;  %v4527_v30 = vcombine.low %v4505_v56, %v4512_v24  ;;  %v4593_v57 = vcombine.low %v3469_v4, %v3581_v37 }
 0x542   :  { %v3583_v15 = vsel %vm918_vm7, %v3551_v50, %v3184_v28  ;;  %v4697_v21 = vrot.slane %v11646_v32, %v11451_v29  ;;  %v4752_v4 = vrot.slane %v4745_v47, %v11451_v29  ;;  %v3850_v47 = vshrl.u32 %v11632_v9, 16 }
 0x543   :  { %v5725_v5 = vcombine.low %v4439_v51, %v4487_v39  ;;  %v4575_v42 = vcombine.low %v4553_v14, %v4560_v23  ;;  %v4641_v18 = vcombine.low %v3471_v8, %v3583_v15  ;;  %v4608_v45 = vrot.slane %v4593_v57, %v11451_v29  ;;  %v3186_v17 = vpop.permute.xlu0 %3185  ;;  %v11647_v23 = vld [vmem:[#allocation52_spill] sm:$0xff]  ;;  %v11648_v57 = vld [vmem:[#allocation41_spill] sm:$0xff] }
 0x544   :  { %v4535_v43 = vrot.slane %v4527_v30, %v11451_v29  ;;  %v3585_v11 = vsel %vm918_vm7, %v3553_v49, %v3186_v17  ;;  %v3848_v51 = vrot.slane %v3846_v31, 1  ;;  %v3834_v37 = vshll.u32 %v11647_v23, 16  ;;  %v11649_v49 = vld [vmem:[#allocation51_spill] sm:$0xff] }
 0x545   :  { %v4583_v50 = vrot.slane %v4575_v42, %v11451_v29  ;;  %v4656_v13 = vrot.slane %v4641_v18, %v11451_v29  ;;  %v3588_v26 = vpop.permute.xlu1 %3587  ;;  %v4623_v19 = vcombine.low %v4601_v61, %v4608_v45  ;;  %v4689_v36 = vcombine.low %v3473_v40, %v3585_v11  ;;  %v11650_v17 = vld [vmem:[#allocation151_spill] sm:$0xff] }
 0x546   :  { %v5010_v35 = vrot.slane %v5725_v5, %v11451_v29  ;;  %v3844_v8 = vshrl.u32 %v11643_v58, 16  ;;  %v3832_v30 = vshrl.u32 %v11647_v23, 16  ;;  %v3648_v15 = vsel %vm806_vm3, %v11648_v57, %v3588_v26 }
 0x547   :  { %v5727_v1 = vcombine.low %v4535_v43, %v4583_v50  ;;  %v4671_v2 = vcombine.low %v4649_v41, %v4656_v13  ;;  %v4704_v20 = vrot.slane %v4689_v36, %v11451_v29  ;;  %v3590_v10 = vpop.permute.xlu0 %3589  ;;  %v4631_v22 = vrot.slane %v4623_v19, %v11451_v29  ;;  %v11651_v50 = vld [vmem:[#allocation155_spill] sm:$0xff] }
 0x548   :  { %v10435_v6 = vor.u32 %v3848_v51, %v3844_v8  ;;  %v3815_v5 = vshll.u32 %v11649_v49, 16  ;;  %v3836_v61 = vrot.slane %v3834_v37, 1  ;;  %v3855_v45 = vor.u32 %v3854_v0, %v3850_v47  ;;  %v11653_v0 = vld [vmem:[#allocation118_spill] sm:$0xff]  ;;  %v11654_v8 = vld [vmem:[#allocation147_spill] sm:$0xff] }
 0x549   :  { %v4679_v56 = vrot.slane %v4671_v2, %v11451_v29  ;;  %v3636_v14 = vpop.permute.xlu1 %3635  ;;  %v5024_v60 = vrot.slane %v5727_v1, %v11451_v29  ;;  %v4712_v55 = vcombine.low %v4697_v21, %v4704_v20  ;;  %v3650_v43 = vsel %vm806_vm3, %v11650_v17, %v3590_v10 }
 0x54a   :  { %v3683_v13 = vsel %vm806_vm3, %v11651_v50, %v3636_v14  ;;  %v4369_v2 = vcombine.low %v3855_v45, %v10435_v6  ;;  %v3817_v58 = vrot.slane %v3815_v5, 1  ;;  %v11655_v57 = vcombine.low %v11653_v0, %v11654_v8 }
 0x54b   :  { %v5729_v54 = vcombine.low %v4631_v22, %v4679_v56  ;;  %v5061_v7 = vcombine.high %v5010_v35, %v5024_v60  ;;  %v5060_v53 = vcombine.low %v5010_v35, %v5024_v60  ;;  %v4720_v24 = vrot.slane %v4712_v55, %v11451_v29  ;;  %v3596_v33 = vpop.permute.xlu0 %3595 }
 0x54c   :  { %v3656_v42 = vsel %vm860_vm5, %v3648_v15, %v3596_v33  ;;  %v3813_v22 = vshrl.u32 %v11649_v49, 16  ;;  %v4390_v23 = vrot.slane %v4369_v2, %v11451_v29  ;;  %v4246_v15 = vrot.slane %v11655_v57, %v11451_v29 }
 0x54d   :  { %v3598_v39 = vpop.permute.xlu1 %3597  ;;  %v5731_v28 = vcombine.low %v4720_v24, %v4752_v4  ;;  %v5038_v46 = vrot.slane %v5729_v54, %v11451_v29  ;;  %v5088_v19 = vrot.slane %v5061_v7, %v11451_v29  ;;  %v5074_v10 = vrot.slane %v5060_v53, %v11451_v29  ;;  %v11652_v53 = vld [vmem:[#allocation72_spill] sm:$0xff] }
 0x54e   :  { %v3658_v11 = vsel %vm860_vm5, %v3650_v43, %v3598_v39  ;;  %v3818_v4 = vor.u32 %v3817_v58, %v3813_v22  ;;  %v10457_v37 = vrot.slane %v11652_v53, %v11451_v29  ;;  %v11658_v58 = vld [vmem:[#allocation102_spill] sm:$0xff] }
 0x54f   :  { %v3640_v25 = vpop.permute.xlu0 %3639  ;;  %v5052_v62 = vrot.slane %v5731_v28, %v11451_v29 }
 0x550   :  { %v3705_v31 = vsel %vm860_vm5, %v3683_v13, %v3640_v25  ;;  %v4253_v5 = vrot.slane %v3818_v4, %v11451_v29 }
 0x551   :  { %v3604_v18 = vpop.permute.xlu1 %3603  ;;  %v5065_v44 = vcombine.high %v5038_v46, %v5052_v62  ;;  %v5064_v40 = vcombine.low %v5038_v46, %v5052_v62  ;;  %v3837_v46 = vor.u32 %v3836_v61, %v3832_v30 }
 0x552   :  { %v3664_v41 = vsel %vm918_vm7, %v3656_v42, %v3604_v18 }
 0x553   :  { %v3821_v9 = vshll.u32 %v3664_v41, 16  ;;  %v3606_v26 = vpop.permute.xlu0 %3605  ;;  %v5116_v36 = vrot.slane %v5065_v44, %v11451_v29  ;;  %v5102_v1 = vrot.slane %v5064_v40, %v11451_v29  ;;  %v3819_v24 = vshrl.u32 %v3664_v41, 16 }
 0x554   :  { %v3666_v63 = vsel %vm918_vm7, %v3658_v11, %v3606_v26  ;;  %v4392_v44 = vcombine.low %v4390_v23, %v10457_v37  ;;  %v4255_v40 = vcombine.low %v4246_v15, %v4253_v5  ;;  %v4301_v45 = vrot.slane %v3837_v46, %v11451_v29  ;;  %v11656_v11 = vld [vmem:[#allocation126_spill] sm:$0xff] }
 0x555   :  { %v3644_v12 = vpop.permute.xlu1 %3643  ;;  %v3840_v32 = vshll.u32 %v3666_v63, 16  ;;  %v5128_v20 = vcombine.low %v5088_v19, %v5116_v36  ;;  %v3823_v56 = vrot.slane %v3821_v9, 1  ;;  %v5129_v35 = vcombine.high %v5088_v19, %v5116_v36  ;;  %v11657_v36 = vld [vmem:[#allocation161_spill] sm:$0xff] }
 0x556   :  { %v3720_v21 = vsel %vm918_vm7, %v3705_v31, %v3644_v12  ;;  %v3838_v60 = vshrl.u32 %v3666_v63, 16  ;;  %v5124_v54 = vcombine.low %v5074_v10, %v5102_v1  ;;  %v5125_v7 = vcombine.high %v5074_v10, %v5102_v1  ;;  %v11659_v63 = vld [vmem:[#allocation167_spill] sm:$0xff] }
 0x557   :  { %v3827_v14 = vshll.u32 %v3720_v21, 16  ;;  %v3842_v55 = vrot.slane %v3840_v32, 1  ;;  %v3592_v59 = vpop.permute.xlu0 %3591  ;;  %5489 = vmatprep.mubr.bf16.mxu0 %v5128_v20  ;;  %v3825_v33 = vshrl.u32 %v3720_v21, 16  ;;  %5538 = vmatprep.mubr.bf16.mxu1 %v5129_v35  ;;  %v3824_v25 = vor.u32 %v3823_v56, %v3819_v24 }
 0x558   :  { %5490 = vmatmul.mubr.bf16.gmra.mrb[12].mxu0 %v5124_v54  ;;  %5539 = vmatmul.mubr.bf16.gmra.mrb[12].mxu1 %v5125_v7  ;;  %v10472_v9 = vrot.slane %v4392_v44, %v11451_v29  ;;  %v3961_v26 = vshll.u32 %v11656_v11, 16  ;;  %v3652_v1 = vsel %vm806_vm3, %v11657_v36, %v3592_v59  ;;  %v4269_v2 = vrot.slane %v4255_v40, %v11451_v29  ;;  %v11660_v59 = vld [vmem:[#allocation93_spill] sm:$0xff] }
 0x559   :  { %v3829_v51 = vrot.slane %v3827_v14, 1  ;;  %v3594_v39 = vpop.permute.xlu1 %3593  ;;  %v3843_v28 = vor.u32 %v3842_v55, %v3838_v60  ;;  %v3942_v31 = vshll.u32 %v11658_v58, 16  ;;  %v3959_v35 = vshrl.u32 %v11656_v11, 16 }
 0x55a   :  { %v3654_v12 = vsel %vm806_vm3, %v11659_v63, %v3594_v39  ;;  %v3940_v15 = vshrl.u32 %v11658_v58, 16 }
 0x55b   :  { %v3830_v62 = vor.u32 %v3829_v51, %v3825_v33  ;;  %v4321_v47 = vcombine.low %v3843_v28, %v10435_v6  ;;  %v3638_v49 = vpop.permute.xlu0 %3637  ;;  %v3963_v33 = vrot.slane %v3961_v26, 1  ;;  %v3944_v51 = vrot.slane %v3942_v31, 1 }
 0x55c   :  { %v3698_v54 = vsel %vm806_vm3, %v11660_v59, %v3638_v49  ;;  %v4615_v26 = vrot.slane %v4594_v3, %v11451_v29 }
 0x55d   :  { %v4273_v42 = vcombine.low %v3824_v25, %v3830_v62  ;;  %v3600_v18 = vpop.permute.xlu1 %3599  ;;  %v4342_v41 = vrot.slane %v4321_v47, %v11451_v29  ;;  %v11661_v62 = vld [vmem:[#allocation23_spill] sm:$0xff]  ;;  %v11662_v47 = vld [vmem:[#allocation40_spill] sm:$0xff]  ;;  %v3964_v36 = vor.u32 %v3963_v33, %v3959_v35  ;;  %v5081_v35 = vrot.slane %v5062_v27, %v11451_v29 }
 0x55e   :  { %v3660_v32 = vsel %vm860_vm5, %v3652_v1, %v3600_v18  ;;  %v11663_v49 = vcombine.high %v11661_v62, %v11662_v47  ;;  %v5716_v27 = vld [vmem:[%s10572_s5] ss:$0 sm:$0xff]  ;;  %s5646_s5 = sld [smem:[#allocation2]] }
 0x55f   :  { %v4294_v17 = vrot.slane %v4273_v42, %v11451_v29  ;;  %v4351_v43 = vcombine.low %v4342_v41, %v10457_v37  ;;  %v3602_v30 = vpop.permute.xlu0 %3601  ;;  %v11664_v41 = vcombine.low %v11661_v62, %v11662_v47 }
 0x560   :  { %v3662_v10 = vsel %vm860_vm5, %v3654_v12, %v3602_v30  ;;  %v4960_v5 = vrot.slane %v11663_v49, %v11451_v29  ;;  %v4670_v12 = vrot.slane %v3964_v36, %v11451_v29 }
 0x561   :  { %v4303_v61 = vcombine.low %v4294_v17, %v4301_v45  ;;  %v3642_v50 = vpop.permute.xlu1 %3641  ;;  %v4365_v13 = vrot.slane %v4351_v43, %v11451_v29  ;;  %v4946_v44 = vrot.slane %v11664_v41, %v11451_v29  ;;  %v3945_v45 = vor.u32 %v3944_v51, %v3940_v15 }
 0x562   :  { %v3713_v39 = vsel %vm860_vm5, %v3698_v54, %v3642_v50 }
 0x563   :  { %v4317_v19 = vrot.slane %v4303_v61, %v11451_v29  ;;  %v3608_v21 = vpop.permute.xlu0 %3607  ;;  %v5724_v20 = vcombine.low %v4365_v13, %v10472_v9  ;;  %v4622_v58 = vrot.slane %v3945_v45, %v11451_v29 }
 0x564   :  { %v3668_v22 = vsel %vm918_vm7, %v3660_v32, %v3608_v21 }
 0x565   :  { %v3610_v56 = vpop.permute.xlu1 %3609  ;;  %v5722_v14 = vcombine.low %v4269_v2, %v4317_v19  ;;  %v3948_v60 = vshll.u32 %v3668_v22, 16  ;;  %v4924_v24 = vrot.slane %v5724_v20, %v11451_v29  ;;  %v3946_v17 = vshrl.u32 %v3668_v22, 16 }
 0x566   :  { %v3670_v55 = vsel %vm918_vm7, %v3662_v10, %v3610_v56  ;;  %v4624_v63 = vcombine.low %v4615_v26, %v4622_v58 }
 0x567   :  { %v3967_v7 = vshll.u32 %v3670_v55, 16  ;;  %v4910_v4 = vrot.slane %v5722_v14, %v11451_v29  ;;  %v3965_v23 = vshrl.u32 %v3670_v55, 16  ;;  %v3646_v53 = vpop.permute.xlu0 %3645  ;;  %v3950_v25 = vrot.slane %v3948_v60, 1 }
 0x568   :  { %v3728_v0 = vsel %vm918_vm7, %v3713_v39, %v3646_v53  ;;  %v4638_v32 = vrot.slane %v4624_v63, %v11451_v29  ;;  %v5095_v60 = vrot.slane %v5063_v52, %v11451_v29  ;;  %v5649_v63 = vstv %s5646_s5 }
 0x569   :  { %v3969_v28 = vrot.slane %v3967_v7, 1  ;;  %v4932_v8 = vcombine.high %v4910_v4, %v4924_v24  ;;  %v4931_v57 = vcombine.low %v4910_v4, %v4924_v24  ;;  %v3954_v46 = vshll.u32 %v3728_v0, 16 }
 0x56a   :  { %v3952_v43 = vshrl.u32 %v3728_v0, 16  ;;  %v3951_v19 = vor.u32 %v3950_v25, %v3946_v17 }
 0x56b   :  { %v3970_v42 = vor.u32 %v3969_v28, %v3965_v23  ;;  %v4988_v18 = vrot.slane %v4932_v8, %v11451_v29  ;;  %v4974_v40 = vrot.slane %v4931_v57, %v11451_v29  ;;  %v3956_v30 = vrot.slane %v3954_v46, 1 }
 0x56d   :  { %v4690_v61 = vcombine.low %v3970_v42, %v10435_v6  ;;  %v4995_v50 = vcombine.low %v4960_v5, %v4988_v18  ;;  %v4991_v13 = vcombine.low %v4946_v44, %v4974_v40  ;;  %v4992_v11 = vcombine.high %v4946_v44, %v4974_v40 }
 0x56e   :  { %v3957_v1 = vor.u32 %v3956_v30, %v3952_v43 }
 0x56f   :  { %v4711_v2 = vrot.slane %v4690_v61, %v11451_v29  ;;  %5579 = vmatprep.mubr.bf16.mxu0 %v4995_v50  ;;  %5908 = vmatprep.mubr.msk.bf16.mxu1 %vm806_vm3, %v4992_v11 }
 0x570   :  { %v4642_v31 = vcombine.low %v3951_v19, %v3957_v1  ;;  %5580 = vmatmul.mubr.bf16.vlgmr.msra.gmra.mrb[16].mxu0 %v4991_v13 }
 0x571   :  { %v4713_v6 = vcombine.low %v4711_v2, %v10457_v37 }
 0x572   :  { %v4663_v48 = vrot.slane %v4642_v31, %v11451_v29 }
 0x573   :  { %v4727_v16 = vrot.slane %v4713_v6, %v11451_v29 }
 0x574   :  { %v4672_v3 = vcombine.low %v4663_v48, %v4670_v12 }
 0x575   :  { %v5732_v20 = vcombine.low %v4727_v16, %v10472_v9 }
 0x576   :  { %v4686_v21 = vrot.slane %v4672_v3, %v11451_v29  ;;  %v5647_v3 = vld [vmem:[%s10567_s0] sm:$0xff] }
 0x577   :  { %v5059_v56 = vrot.slane %v5732_v20, %v11451_v29 }
 0x578   :  { %v5730_v10 = vcombine.low %v4638_v32, %v4686_v21 }
 0x57a   :  { %v5045_v22 = vrot.slane %v5730_v10, %v11451_v29 }
 0x57c   :  { %v5066_v37 = vcombine.low %v5045_v22, %v5059_v56  ;;  %v5067_v14 = vcombine.high %v5045_v22, %v5059_v56 }
 0x57e   :  { %v5109_v55 = vrot.slane %v5066_v37, %v11451_v29  ;;  %v5123_v9 = vrot.slane %v5067_v14, %v11451_v29  ;;  %v5648_v14 = vld [vmem:[%s10567_s0 + $0x8] sm:$0xff] }
 0x580   :  { %v5127_v59 = vcombine.high %v5081_v35, %v5109_v55  ;;  %v5130_v54 = vcombine.low %v5095_v60, %v5123_v9  ;;  %v5126_v7 = vcombine.low %v5081_v35, %v5109_v55  ;;  %v5661_v55 = vstv %s10536_s11 }
 0x582   :  { %5587 = vmatprep.mubr.bf16.mxu0 %v5130_v54  ;;  %5909 = vmatmul.mubr.msk.bf16.vlgmr.msra.gmra.mrb[16].mxu1 %vm806_vm3, %v5127_v59 }
 0x583   :  { %5588 = vmatmul.mubr.bf16.gmra.mrb[20].mxu0 %v5126_v7  ;;  %v5786_v7 = vld [vmem:[%s10567_s0 + $0x10] sm:$0xff] }
 0x594   :  { %v5832_v4 = vpop.f32.mrb[8].mxu0 }
 0x595   :  { %v5860_v24 = vpop.f32.mrb[8].mxu1  ;;  %v5833_v33 = vpop.f32.mrb[9].mxu0 }
 0x596   :  { %v5834_v38 = vadd.f32 %v5833_v33, %v5832_v4  ;;  %v5861_v34 = vpop.f32.mrb[9].mxu1  ;;  %v5835_v52 = vpop.f32.mrb[10].mxu0  ;;  %v5787_v33 = vld [vmem:[%s10567_s0 + $0x18] sm:$0xff] }
 0x597   :  { %v5862_v51 = vadd.f32 %v5861_v34, %v5860_v24  ;;  %v5863_v39 = vpop.f32.mrb[10].mxu1  ;;  %v5836_v29 = vpop.f32.mrb[11].mxu0 }
 0x598   :  { %v5484_v23 = vadd.f32 %v5834_v38, %v5716_v27  ;;  %v5837_v53 = vadd.f32 %v5836_v29, %v5835_v52  ;;  %v5864_v28 = vpop.f32.mrb[11].mxu1 }
 0x599   :  { %v5865_v0 = vadd.f32 %v5864_v28, %v5863_v39 }
 0x59a   :  { %v5533_v8 = vadd.f32 %v5862_v51, %v5484_v23  ;;  %v5487_v57 = vadd.f32 %v5837_v53, %v5716_v27 }
 0x59c   :  { %v5536_v15 = vadd.f32 %v5865_v0, %v5487_v57 }
 0x62b   :  { %v5838_v25 = vpop.f32.mrb[12].mxu0  ;;  %v5866_v46 = vpop.f32.mrb[12].mxu1 }
 0x62c   :  { %v5839_v62 = vpop.f32.mrb[13].mxu0  ;;  %v5867_v47 = vpop.f32.mrb[13].mxu1 }
 0x62d   :  { %v5840_v49 = vadd.f32 %v5839_v62, %v5838_v25  ;;  %v5868_v5 = vadd.f32 %v5867_v47, %v5866_v46  ;;  %v5841_v42 = vpop.f32.mrb[14].mxu0  ;;  %v5869_v18 = vpop.f32.mrb[14].mxu1 }
 0x62e   :  { %v5842_v41 = vpop.f32.mrb[15].mxu0  ;;  %v5870_v44 = vpop.f32.mrb[15].mxu1 }
 0x62f   :  { %v5492_v40 = vadd.f32 %v5840_v49, %v5716_v27  ;;  %v5843_v45 = vadd.f32 %v5842_v41, %v5841_v42  ;;  %v5871_v17 = vadd.f32 %v5870_v44, %v5869_v18 }
 0x631   :  { %v5541_v43 = vadd.f32 %v5868_v5, %v5492_v40  ;;  %v5495_v30 = vadd.f32 %v5843_v45, %v5716_v27 }
 0x633   :  { %v5544_v61 = vadd.f32 %v5871_v17, %v5495_v30 }
 0x643   :  { %v5888_v50 = vpop.f32.mrb[16].mxu0 }
 0x644   :  { %v5889_v13 = vpop.f32.mrb[17].mxu0 }
 0x645   :  { %v5890_v11 = vadd.f32 %v5889_v13, %v5888_v50  ;;  %v5891_v26 = vpop.f32.mrb[18].mxu0 }
 0x646   :  { %v5892_v19 = vpop.f32.mrb[19].mxu0 }
 0x647   :  { %v5893_v36 = vadd.f32 %v5892_v19, %v5891_v26  ;;  %v5582_v1 = vadd.f32 %v5890_v11, %v5533_v8 }
 0x649   :  { %v5585_v2 = vadd.f32 %v5893_v36, %v5536_v15 }
 0x655   :  { %v5910_v58 = vpop.f32.mrb[16].mxu1 }
 0x656   :  { %v5894_v31 = vpop.f32.mrb[20].mxu0  ;;  %v5630_v6 = vpop.f32.mrb[17].mxu1 }
 0x657   :  { %v5631_v12 = vadd.f32 %v5630_v6, %v5582_v1  ;;  %v5895_v48 = vpop.f32.mrb[21].mxu0  ;;  %v5911_v16 = vpop.f32.mrb[18].mxu1 }
 0x658   :  { %v5896_v32 = vadd.f32 %v5895_v48, %v5894_v31  ;;  %v5897_v21 = vpop.f32.mrb[22].mxu0  ;;  %v5633_v20 = vpop.f32.mrb[19].mxu1 }
 0x659   :  { %v5650_v10 = vmul.f32 %v5649_v63, %v5631_v12  ;;  %v5634_v22 = vadd.f32 %v5633_v20, %v5585_v2  ;;  %v5898_v56 = vpop.f32.mrb[23].mxu0 }
 0x65a   :  { %v5590_v37 = vadd.f32 %v5896_v32, %v5541_v43  ;;  %v5899_v35 = vadd.f32 %v5898_v56, %v5897_v21 }
 0x65b   :  { %v5652_v60 = vadd.f32 %v5650_v10, %v5647_v3  ;;  %v5651_v9 = vmul.f32 %v5649_v63, %v5634_v22 }
 0x65c   :  { %v5639_v59 = vadd.f32 %v5910_v58, %v5590_v37  ;;  %v5593_v54 = vadd.f32 %v5899_v35, %v5544_v61 }
 0x65d   :  { %5654 = vst.msk [vmem:[#allocation5] sm:$0xff] %vm779_vm2, %v5652_v60  ;;  %v5653_v4 = vadd.f32 %v5651_v9, %v5648_v14 }
 0x65e   :  { %v5662_v24 = vmul.f32 %v5661_v55, %v5639_v59  ;;  %v5642_v27 = vadd.f32 %v5911_v16, %v5593_v54 }
 0x65f   :  { %5655 = vst.msk [vmem:[#allocation5 + $0x8] sm:$0xff] %vm779_vm2, %v5653_v4 }
 0x660   :  { %v5664_v38 = vadd.f32 %v5786_v7, %v5662_v24  ;;  %v5663_v34 = vmul.f32 %v5661_v55, %v5642_v27 }
 0x662   :  { %5667 = vst.msk [vmem:[#allocation5 + $0x10] sm:$0xff] %vm779_vm2, %v5664_v38  ;;  %v5665_v52 = vadd.f32 %v5787_v33, %v5663_v34 }
 0x664   :  { %5668 = vst.msk [vmem:[#allocation5 + $0x18] sm:$0xff] %vm779_vm2, %v5665_v52 }
 0x665   :  { %6046 = shalt.err (!%p6043_p9)
}
 0x666   :  { %s6047_s0 = scalar_lea.hbm %s10574_s7, 512 }
 0x667   :  { %p6048_p10 = scmp.ne.s32.totalorder %s10574_s7, %s6047_s0  ;;  %p6051_p11 = scmp.lt.u32.totalorder %s6047_s0, %s10574_s7 }
 0x669   :  { %p6053_p12 = pnand %p6051_p11, %p6048_p10 }
 0x66b   :  { %6056 = shalt.err (!%p6053_p12)
}
 0x66c   :  { %s6072_s9 = smov 128   ;;  %s6073_s10 = smov 8  }
 0x66d   :  { %5680 = dma.vmem_to_hbm [thread:$0]  %s5675_s24, 512, %s10574_s7, [#allocation3], %s6072_s9, %s6072_s9, %s6073_s10  }
 0x66e   :  { %6059 = dma.done.wait [#allocation3], 512  }
 0x66f   :  { %6060 = vsyncadd [#allocation3], 4294966784 }
 0x670   :  { %5684 = vsyncpa [#allocation3], 1 }
 0x671   :  { %5685 = vsyncpa [#allocation4], 1 }

</bundles_post_ra>
